<compile_context>
chip_gen: v6e
topology: v6e:2x2x1
jax: 0.10.0
libtpu: 0.0.40
codegen_flags: <defaults>
</compile_context>

<pallas_src>
import jax
import jax.numpy as jnp
from jax.experimental import pallas as pl
from jax.experimental.pallas import tpu as pltpu

IMG_DIM = 28 * 28          # 784
HID_DIM = 400
LANE = 128
IMG_PAD = 896              # 7 * 128
HID_PAD = 512              # 4 * 128
HEAD_PAD = 2 * LANE        # fused mu || logvar slab width


def _round_up(x, m):
    return ((x + m - 1) // m) * m


def _tpu_generation():
    """Best-effort TPU generation (5/6/7) from device_kind; None if unknown."""
    try:
        kind = jax.devices()[0].device_kind.lower()
    except Exception:
        return None
    for g in (7, 6, 5):
        if f"v{g}" in kind:
            return g
    return None


def _default_block_batch(gen):
    # v5e: 4x128x128 MXU, balanced roofline -> 128-row tiles.
    # v6e: HBM-bound, 128 MiB VMEM -> large tiles amortize ~0.35us/step overhead.
    # v7x: only 64 MiB VMEM -> cap the tile.
    if gen == 5:
        return 128
    if gen == 7:
        return 256
    if gen == 6:
        return 512
    return 256


def _choose_tb(B, max_tb, num_cores):
    """Batch tile that (a) minimizes padded rows, (b) respects max_tb, and
    (c) on multi-TensorCore chips keeps >= num_cores grid steps when possible."""
    b8 = _round_up(max(B, 8), 8)
    if b8 <= max_tb:
        tb = b8
        if num_cores > 1 and b8 >= 2 * 8:
            tb = max(8, _round_up(pl.cdiv(b8, num_cores), 8))
        return tb
    cands = [c for c in (128, 256, 512, 1024) if c <= max_tb] or [max_tb]
    # minimize batch-padding waste; prefer the largest tile on ties
    return min(cands, key=lambda t: (_round_up(B, t) - B, -t))


def vae_kernel(x_ref, eps_ref,
               w1_ref, b1_ref,
               wh_ref, bh_ref,
               w3_ref, b3_ref,
               w4_ref, b4_ref,
               heads_ref, recon_ref):
    # ---- encoder: Linear(784->400) + ReLU (lane-padded 896->512) ----
    h = jnp.dot(x_ref[...], w1_ref[...],
                preferred_element_type=jnp.float32) + b1_ref[...]          # (TB, 512)
    h = jnp.maximum(h, 0.0).astype(jnp.bfloat16)

    # ---- fused mu/logvar heads: one Linear(400 -> 2*128) ----
    # lanes [0:128)   = mu (padded with zeros past L)
    # lanes [128:256) = logvar
    heads = jnp.dot(h, wh_ref[...],
                    preferred_element_type=jnp.float32) + bh_ref[...]      # (TB, 256)
    heads_ref[...] = heads                                                 # lane-dense f32 store

    mu_pad = heads[:, :LANE]                                               # (TB, 128)
    lv_pad = heads[:, LANE:]                                               # (TB, 128)

    # ---- reparameterize: z = mu + eps * exp(0.5 * logvar) ----
    # Padded lanes: mu/lv are exactly 0 there and eps is 0-padded, so z's padded
    # lanes are 0 (and w3's padded rows are 0 anyway).
    z = mu_pad + eps_ref[...].astype(jnp.float32) * jnp.exp(0.5 * lv_pad)  # (TB, 128)
    zb = z.astype(jnp.bfloat16)

    # ---- decoder: Linear(L->400) + ReLU -> Linear(400->784) + Sigmoid ----
    h2 = jnp.dot(zb, w3_ref[...],
                 preferred_element_type=jnp.float32) + b3_ref[...]         # (TB, 512)
    h2 = jnp.maximum(h2, 0.0).astype(jnp.bfloat16)
    logits = jnp.dot(h2, w4_ref[...],
                     preferred_element_type=jnp.float32) + b4_ref[...]     # (TB, 896)
    # sigmoid in f32 on the EUP; bf16 store halves the recon writeback.
    recon_ref[...] = jax.nn.sigmoid(logits).astype(recon_ref.dtype)


def vae_forward_padded(x, eps, kernel_params, *, block_batch=None):
    """Fused VAE forward.  x: (B, 784) float, eps: (B, L) float.

    Returns PADDED outputs (no post-kernel slice passes; slice/fuse in the
    consumer, e.g. mask the loss over padding):
      recon_pad: (b_pad, 896) bf16  -- rows [:B], lanes [:784] valid
      heads_pad: (b_pad, 256) f32   -- mu in lanes [:L], logvar in [128:128+L]
    plus (B, L) for convenience.
    """
    B = x.shape[0]
    L = eps.shape[1]
    assert x.shape[1] == IMG_DIM and L <= LANE

    gen = _tpu_generation()
    if block_batch is None:
        block_batch = _default_block_batch(gen)
    num_cores = 2 if gen == 7 else 1           # v7x: 2 TCs/chip -> want grid >= 2
    tb = _choose_tb(B, block_batch, num_cores)
    b_pad = _round_up(B, tb)

    # bf16 input DMA (the pad rewrite makes the cast free); zero-pad ragged lanes.
    x_pad = jnp.zeros((b_pad, IMG_PAD), jnp.bfloat16).at[:B, :IMG_DIM].set(
        x.astype(jnp.bfloat16))
    eps_pad = jnp.zeros((b_pad, LANE), jnp.bfloat16).at[:B, :L].set(
        eps.astype(jnp.bfloat16))

    kp = kernel_params
    grid = (b_pad // tb,)
    row = lambda d: pl.BlockSpec((tb, d), lambda i: (i, 0))                # batch-tiled

    def build(single_buffer_weights):
        if single_buffer_weights and hasattr(pl, "Buffered"):
            # constant-index blocks never change -> no second (dead) VMEM buffer
            const = lambda s: pl.BlockSpec(s, lambda i: (0, 0),
                                           pipeline_mode=pl.Buffered(1))
        else:
            const = lambda s: pl.BlockSpec(s, lambda i: (0, 0))
        return pl.pallas_call(
            vae_kernel,
            out_shape=(
                jax.ShapeDtypeStruct((b_pad, HEAD_PAD), jnp.float32),      # mu||logvar slab
                jax.ShapeDtypeStruct((b_pad, IMG_PAD), jnp.bfloat16),      # recon (padded)
            ),
            grid=grid,
            in_specs=[
                row(IMG_PAD),                                              # x
                row(LANE),                                                 # eps
                const((IMG_PAD, HID_PAD)), const((1, HID_PAD)),            # w1, b1
                const((HID_PAD, HEAD_PAD)), const((1, HEAD_PAD)),          # wh, bh
                const((LANE, HID_PAD)), const((1, HID_PAD)),               # w3, b3
                const((HID_PAD, IMG_PAD)), const((1, IMG_PAD)),            # w4, b4
            ],
            out_specs=(row(HEAD_PAD), row(IMG_PAD)),
            compiler_params=pltpu.CompilerParams(
                dimension_semantics=("parallel",)),
        )

    args = (x_pad, eps_pad,
            kp["w1"], kp["b1"], kp["wh"], kp["bh"],
            kp["w3"], kp["b3"], kp["w4"], kp["b4"])
    try:
        heads, recon = build(True)(*args)
    except Exception:
        # pl.Buffered(1) not accepted by this jax version -> default buffering.
        heads, recon = build(False)(*args)
    return recon, heads, B, L


def vae_forward(x, eps, kernel_params, *, block_batch=None):
    """Module-equivalent forward: (recon (B,784) f32, mu (B,L), logvar (B,L)).
    The un-padding slices cost an extra HBM pass; prefer vae_forward_padded and
    fuse the slice/mask into the consumer (e.g. the loss) in a training loop."""
    recon_pad, heads_pad, B, L = vae_forward_padded(
        x, eps, kernel_params, block_batch=block_batch)
    recon = recon_pad[:B, :IMG_DIM].astype(jnp.float32)
    mu = heads_pad[:B, :L]
    logvar = heads_pad[:B, LANE:LANE + L]
    return recon, mu, logvar


def init_params(key, latent_dim):
    """Unpadded f32 reference params.  Weights stored (in_features, out_features),
    i.e. pre-transposed relative to PyTorch's (out, in) nn.Linear storage."""
    ks = jax.random.split(key, 10)

    def linear(kw, kb, fan_in, fan_out):
        bound = 1.0 / jnp.sqrt(fan_in)                    # PyTorch default init
        w = jax.random.uniform(kw, (fan_in, fan_out), jnp.float32, -bound, bound)
        b = jax.random.uniform(kb, (fan_out,), jnp.float32, -bound, bound)
        return w, b

    w1, b1 = linear(ks[0], ks[1], IMG_DIM, HID_DIM)
    wmu, bmu = linear(ks[2], ks[3], HID_DIM, latent_dim)
    wlv, blv = linear(ks[4], ks[5], HID_DIM, latent_dim)
    w3, b3 = linear(ks[6], ks[7], latent_dim, HID_DIM)
    w4, b4 = linear(ks[8], ks[9], HID_DIM, IMG_DIM)
    return {"w1": w1, "b1": b1, "wmu": wmu, "bmu": bmu,
            "wlv": wlv, "blv": blv, "w3": w3, "b3": b3, "w4": w4, "b4": b4}


def pack_params(p, latent_dim):
    """Zero-pad to lane multiples, fuse mu/logvar heads, cast weights to bf16
    (biases kept f32, added after the f32-accumulated matmul).  The zero padding
    of lanes [L:128) and [128+L:256) in wh/bh is load-bearing for correctness."""
    L = latent_dim
    assert L <= LANE

    def pad_w(w, rin, rout):
        out = jnp.zeros((rin, rout), jnp.float32)
        out = out.at[:w.shape[0], :w.shape[1]].set(w)
        return out.astype(jnp.bfloat16)

    def pad_b(b, rout):
        out = jnp.zeros((1, rout), jnp.float32)
        return out.at[0, :b.shape[0]].set(b)

    # fused head: lanes [0:L] = mu, lanes [128:128+L] = logvar
    wh = jnp.zeros((HID_DIM, HEAD_PAD), jnp.float32)
    wh = wh.at[:, :L].set(p["wmu"]).at[:, LANE:LANE + L].set(p["wlv"])
    bh = jnp.zeros((HEAD_PAD,), jnp.float32)
    bh = bh.at[:L].set(p["bmu"]).at[LANE:LANE + L].set(p["blv"])

    return {
        "w1": pad_w(p["w1"], IMG_PAD, HID_PAD), "b1": pad_b(p["b1"], HID_PAD),
        "wh": pad_w(wh, HID_PAD, HEAD_PAD),     "bh": pad_b(bh, HEAD_PAD),
        "w3": pad_w(p["w3"], LANE, HID_PAD),    "b3": pad_b(p["b3"], HID_PAD),
        "w4": pad_w(p["w4"], HID_PAD, IMG_PAD), "b4": pad_b(p["b4"], IMG_PAD),
    }


if __name__ == "__main__":
    key = jax.random.PRNGKey(0)
    k_param, k_x, k_eps = jax.random.split(key, 3)

    batch = 8
    latent_dim = 32

    params = init_params(k_param, latent_dim)
    kernel_params = pack_params(params, latent_dim)

    # flattened "images" in [0, 1] (NCHW (B,1,28,28) flattened to (B, 784))
    x = jax.random.uniform(k_x, (batch, IMG_DIM), jnp.float32)
    # TODO(synk): torch.randn_like is drawn host-side and passed in as eps
    # (deterministic here); an in-kernel pltpu.prng_* draw would avoid the DMA.
    eps = jax.random.normal(k_eps, (batch, latent_dim), jnp.float32)

    # hot path: padded outputs, no post-kernel slice passes
    recon_pad, heads_pad, B, L = vae_forward_padded(x, eps, kernel_params)
    jax.block_until_ready((recon_pad, heads_pad))

    # the "consumer" (this correctness check) does the un-padding
    recon = recon_pad[:B, :IMG_DIM].astype(jnp.float32)
    mu = heads_pad[:B, :L]
    logvar = heads_pad[:B, LANE:LANE + L]

    # pure-JAX f32 reference of the same math (unpadded weights)
    h_ref = jnp.maximum(x @ params["w1"] + params["b1"], 0.0)
    mu_ref = h_ref @ params["wmu"] + params["bmu"]
    lv_ref = h_ref @ params["wlv"] + params["blv"]
    z_ref = mu_ref + eps * jnp.exp(0.5 * lv_ref)
    h2_ref = jnp.maximum(z_ref @ params["w3"] + params["b3"], 0.0)
    recon_ref = jax.nn.sigmoid(h2_ref @ params["w4"] + params["b4"])

    assert recon.shape == (batch, IMG_DIM)
    assert mu.shape == (batch, latent_dim) and logvar.shape == (batch, latent_dim)
    # bf16 weights/activations/IO (f32 accumulation) -> relaxed tolerance
    assert jnp.allclose(recon, recon_ref, atol=4e-2), float(jnp.max(jnp.abs(recon - recon_ref)))
    assert jnp.allclose(mu, mu_ref, atol=3e-2), float(jnp.max(jnp.abs(mu - mu_ref)))
    assert jnp.allclose(logvar, lv_ref, atol=3e-2), float(jnp.max(jnp.abs(logvar - lv_ref)))

    print("KERNEL_OK")
</pallas_src>

<mosaic_0001>
module attributes {stable_mosaic.version = 11 : i64} {
  func.func @vae_kernel(%arg0: i32, %arg1: memref<8x896xbf16, #tpu.memory_space<vmem>>, %arg2: memref<8x128xbf16, #tpu.memory_space<vmem>>, %arg3: memref<896x512xbf16, #tpu.memory_space<vmem>>, %arg4: memref<1x512xf32, #tpu.memory_space<vmem>>, %arg5: memref<512x256xbf16, #tpu.memory_space<vmem>>, %arg6: memref<1x256xf32, #tpu.memory_space<vmem>>, %arg7: memref<128x512xbf16, #tpu.memory_space<vmem>>, %arg8: memref<1x512xf32, #tpu.memory_space<vmem>>, %arg9: memref<512x896xbf16, #tpu.memory_space<vmem>>, %arg10: memref<1x896xf32, #tpu.memory_space<vmem>>, %arg11: memref<8x256xf32, #tpu.memory_space<vmem>>, %arg12: memref<8x896xbf16, #tpu.memory_space<vmem>>) attributes {dimension_semantics = [#tpu.dimension_semantics<parallel>], iteration_bounds = array<i64: 1>, scalar_prefetch = 0 : i64, scratch_operands = 0 : i64, tpu.core_type = #tpu.core_type<tc>, window_params = [{transform_indices = @transform_0, window_bounds = array<i64: 8, 896>}, {transform_indices = @transform_1, window_bounds = array<i64: 8, 128>}, {pipeline_mode = #tpu.pipeline_mode<synchronous>, transform_indices = @transform_2, window_bounds = array<i64: 896, 512>}, {pipeline_mode = #tpu.pipeline_mode<synchronous>, transform_indices = @transform_3, window_bounds = array<i64: 1, 512>}, {pipeline_mode = #tpu.pipeline_mode<synchronous>, transform_indices = @transform_4, window_bounds = array<i64: 512, 256>}, {pipeline_mode = #tpu.pipeline_mode<synchronous>, transform_indices = @transform_5, window_bounds = array<i64: 1, 256>}, {pipeline_mode = #tpu.pipeline_mode<synchronous>, transform_indices = @transform_6, window_bounds = array<i64: 128, 512>}, {pipeline_mode = #tpu.pipeline_mode<synchronous>, transform_indices = @transform_7, window_bounds = array<i64: 1, 512>}, {pipeline_mode = #tpu.pipeline_mode<synchronous>, transform_indices = @transform_8, window_bounds = array<i64: 512, 896>}, {pipeline_mode = #tpu.pipeline_mode<synchronous>, transform_indices = @transform_9, window_bounds = array<i64: 1, 896>}, {transform_indices = @transform_10, window_bounds = array<i64: 8, 256>}, {transform_indices = @transform_11, window_bounds = array<i64: 8, 896>}]} {
    %c0 = arith.constant 0 : index
    %c0_0 = arith.constant 0 : index
    %0 = vector.load %arg1[%c0, %c0_0] : memref<8x896xbf16, #tpu.memory_space<vmem>>, vector<8x896xbf16>
    %c0_1 = arith.constant 0 : index
    %c0_2 = arith.constant 0 : index
    %1 = vector.load %arg3[%c0_1, %c0_2] : memref<896x512xbf16, #tpu.memory_space<vmem>>, vector<896x512xbf16>
    %cst = arith.constant dense<0.000000e+00> : vector<8x512xf32>
    %2 = tpu.matmul %0, %1, %cst {dimension_numbers = #tpu.dot_dimension_numbers<[1], [0], [0], [1], [0, 0, 1, 1], [], []>} : vector<8x896xbf16>, vector<896x512xbf16>, vector<8x512xf32> -> vector<8x512xf32>
    %c0_3 = arith.constant 0 : index
    %c0_4 = arith.constant 0 : index
    %3 = vector.load %arg4[%c0_3, %c0_4] : memref<1x512xf32, #tpu.memory_space<vmem>>, vector<1x512xf32>
    %4 = vector.broadcast %3 : vector<1x512xf32> to vector<8x512xf32>
    %5 = arith.addf %2, %4 : vector<8x512xf32>
    %cst_5 = arith.constant 0.000000e+00 : f32
    %6 = vector.broadcast %cst_5 : f32 to vector<8x512xf32>
    %7 = arith.maximumf %5, %6 : vector<8x512xf32>
    %8 = arith.truncf %7 : vector<8x512xf32> to vector<8x512xbf16>
    %c0_6 = arith.constant 0 : index
    %c0_7 = arith.constant 0 : index
    %9 = vector.load %arg5[%c0_6, %c0_7] : memref<512x256xbf16, #tpu.memory_space<vmem>>, vector<512x256xbf16>
    %cst_8 = arith.constant dense<0.000000e+00> : vector<8x256xf32>
    %10 = tpu.matmul %8, %9, %cst_8 {dimension_numbers = #tpu.dot_dimension_numbers<[1], [0], [0], [1], [0, 0, 1, 1], [], []>} : vector<8x512xbf16>, vector<512x256xbf16>, vector<8x256xf32> -> vector<8x256xf32>
    %c0_9 = arith.constant 0 : index
    %c0_10 = arith.constant 0 : index
    %11 = vector.load %arg6[%c0_9, %c0_10] : memref<1x256xf32, #tpu.memory_space<vmem>>, vector<1x256xf32>
    %12 = vector.broadcast %11 : vector<1x256xf32> to vector<8x256xf32>
    %13 = arith.addf %10, %12 : vector<8x256xf32>
    %c0_11 = arith.constant 0 : index
    %c0_12 = arith.constant 0 : index
    %14 = vector.load %arg11[%c0_11, %c0_12] : memref<8x256xf32, #tpu.memory_space<vmem>>, vector<8x256xf32>
    tpu.vector_store %arg11[%c0_11, %c0_12], %13 {strides = array<i32>} : memref<8x256xf32, #tpu.memory_space<vmem>>, vector<8x256xf32>,
    %15 = vector.extract_strided_slice %13 {offsets = [0, 0], sizes = [8, 128], strides = [1, 1]} : vector<8x256xf32> to vector<8x128xf32>
    %16 = vector.extract_strided_slice %13 {offsets = [0, 128], sizes = [8, 128], strides = [1, 1]} : vector<8x256xf32> to vector<8x128xf32>
    %c0_13 = arith.constant 0 : index
    %c0_14 = arith.constant 0 : index
    %17 = vector.load %arg2[%c0_13, %c0_14] : memref<8x128xbf16, #tpu.memory_space<vmem>>, vector<8x128xbf16>
    %18 = arith.extf %17 : vector<8x128xbf16> to vector<8x128xf32>
    %cst_15 = arith.constant 5.000000e-01 : f32
    %19 = vector.broadcast %cst_15 : f32 to vector<8x128xf32>
    %20 = arith.mulf %19, %16 : vector<8x128xf32>
    %21 = math.exp %20 : vector<8x128xf32>
    %22 = arith.mulf %18, %21 : vector<8x128xf32>
    %23 = arith.addf %15, %22 : vector<8x128xf32>
    %24 = arith.truncf %23 : vector<8x128xf32> to vector<8x128xbf16>
    %c0_16 = arith.constant 0 : index
    %c0_17 = arith.constant 0 : index
    %25 = vector.load %arg7[%c0_16, %c0_17] : memref<128x512xbf16, #tpu.memory_space<vmem>>, vector<128x512xbf16>
    %cst_18 = arith.constant dense<0.000000e+00> : vector<8x512xf32>
    %26 = tpu.matmul %24, %25, %cst_18 {dimension_numbers = #tpu.dot_dimension_numbers<[1], [0], [0], [1], [0, 0, 1, 1], [], []>} : vector<8x128xbf16>, vector<128x512xbf16>, vector<8x512xf32> -> vector<8x512xf32>
    %c0_19 = arith.constant 0 : index
    %c0_20 = arith.constant 0 : index
    %27 = vector.load %arg8[%c0_19, %c0_20] : memref<1x512xf32, #tpu.memory_space<vmem>>, vector<1x512xf32>
    %28 = vector.broadcast %27 : vector<1x512xf32> to vector<8x512xf32>
    %29 = arith.addf %26, %28 : vector<8x512xf32>
    %cst_21 = arith.constant 0.000000e+00 : f32
    %30 = vector.broadcast %cst_21 : f32 to vector<8x512xf32>
    %31 = arith.maximumf %29, %30 : vector<8x512xf32>
    %32 = arith.truncf %31 : vector<8x512xf32> to vector<8x512xbf16>
    %c0_22 = arith.constant 0 : index
    %c0_23 = arith.constant 0 : index
    %33 = vector.load %arg9[%c0_22, %c0_23] : memref<512x896xbf16, #tpu.memory_space<vmem>>, vector<512x896xbf16>
    %cst_24 = arith.constant dense<0.000000e+00> : vector<8x896xf32>
    %34 = tpu.matmul %32, %33, %cst_24 {dimension_numbers = #tpu.dot_dimension_numbers<[1], [0], [0], [1], [0, 0, 1, 1], [], []>} : vector<8x512xbf16>, vector<512x896xbf16>, vector<8x896xf32> -> vector<8x896xf32>
    %c0_25 = arith.constant 0 : index
    %c0_26 = arith.constant 0 : index
    %35 = vector.load %arg10[%c0_25, %c0_26] : memref<1x896xf32, #tpu.memory_space<vmem>>, vector<1x896xf32>
    %36 = vector.broadcast %35 : vector<1x896xf32> to vector<8x896xf32>
    %37 = arith.addf %34, %36 : vector<8x896xf32>
    %38 = arith.negf %37 : vector<8x896xf32>
    %39 = math.exp %38 : vector<8x896xf32>
    %cst_27 = arith.constant 1.000000e+00 : f32
    %40 = vector.broadcast %cst_27 : f32 to vector<8x896xf32>
    %41 = arith.addf %40, %39 : vector<8x896xf32>
    %42 = arith.divf %40, %41 : vector<8x896xf32>
    %43 = arith.truncf %42 : vector<8x896xf32> to vector<8x896xbf16>
    %c0_28 = arith.constant 0 : index
    %c0_29 = arith.constant 0 : index
    %44 = vector.load %arg12[%c0_28, %c0_29] : memref<8x896xbf16, #tpu.memory_space<vmem>>, vector<8x896xbf16>
    tpu.vector_store %arg12[%c0_28, %c0_29], %43 {strides = array<i32>} : memref<8x896xbf16, #tpu.memory_space<vmem>>, vector<8x896xbf16>,
    return
  }
  func.func @transform_0(%arg0: i32) -> (i32, i32) {
    %c0_i32 = arith.constant 0 : i32
    %c0_i32_0 = arith.constant 0 : i32
    return %arg0, %c0_i32 : i32, i32
  }
  func.func @transform_1(%arg0: i32) -> (i32, i32) {
    %c0_i32 = arith.constant 0 : i32
    %c0_i32_0 = arith.constant 0 : i32
    return %arg0, %c0_i32 : i32, i32
  }
  func.func @transform_2(%arg0: i32) -> (i32, i32) {
    %c0_i32 = arith.constant 0 : i32
    %c0_i32_0 = arith.constant 0 : i32
    %c0_i32_1 = arith.constant 0 : i32
    return %c0_i32, %c0_i32_0 : i32, i32
  }
  func.func @transform_3(%arg0: i32) -> (i32, i32) {
    %c0_i32 = arith.constant 0 : i32
    %c0_i32_0 = arith.constant 0 : i32
    %c0_i32_1 = arith.constant 0 : i32
    return %c0_i32, %c0_i32_0 : i32, i32
  }
  func.func @transform_4(%arg0: i32) -> (i32, i32) {
    %c0_i32 = arith.constant 0 : i32
    %c0_i32_0 = arith.constant 0 : i32
    %c0_i32_1 = arith.constant 0 : i32
    return %c0_i32, %c0_i32_0 : i32, i32
  }
  func.func @transform_5(%arg0: i32) -> (i32, i32) {
    %c0_i32 = arith.constant 0 : i32
    %c0_i32_0 = arith.constant 0 : i32
    %c0_i32_1 = arith.constant 0 : i32
    return %c0_i32, %c0_i32_0 : i32, i32
  }
  func.func @transform_6(%arg0: i32) -> (i32, i32) {
    %c0_i32 = arith.constant 0 : i32
    %c0_i32_0 = arith.constant 0 : i32
    %c0_i32_1 = arith.constant 0 : i32
    return %c0_i32, %c0_i32_0 : i32, i32
  }
  func.func @transform_7(%arg0: i32) -> (i32, i32) {
    %c0_i32 = arith.constant 0 : i32
    %c0_i32_0 = arith.constant 0 : i32
    %c0_i32_1 = arith.constant 0 : i32
    return %c0_i32, %c0_i32_0 : i32, i32
  }
  func.func @transform_8(%arg0: i32) -> (i32, i32) {
    %c0_i32 = arith.constant 0 : i32
    %c0_i32_0 = arith.constant 0 : i32
    %c0_i32_1 = arith.constant 0 : i32
    return %c0_i32, %c0_i32_0 : i32, i32
  }
  func.func @transform_9(%arg0: i32) -> (i32, i32) {
    %c0_i32 = arith.constant 0 : i32
    %c0_i32_0 = arith.constant 0 : i32
    %c0_i32_1 = arith.constant 0 : i32
    return %c0_i32, %c0_i32_0 : i32, i32
  }
  func.func @transform_10(%arg0: i32) -> (i32, i32) {
    %c0_i32 = arith.constant 0 : i32
    %c0_i32_0 = arith.constant 0 : i32
    return %arg0, %c0_i32 : i32, i32
  }
  func.func @transform_11(%arg0: i32) -> (i32, i32) {
    %c0_i32 = arith.constant 0 : i32
    %c0_i32_0 = arith.constant 0 : i32
    return %arg0, %c0_i32 : i32, i32
  }
}

module attributes {stable_mosaic.version = 11 : i64} {
  func.func @vae_kernel(%arg0: i32, %arg1: memref<8x896xbf16, #tpu.memory_space<vmem>>, %arg2: memref<8x128xbf16, #tpu.memory_space<vmem>>, %arg3: memref<896x512xbf16, #tpu.memory_space<vmem>>, %arg4: memref<1x512xf32, #tpu.memory_space<vmem>>, %arg5: memref<512x256xbf16, #tpu.memory_space<vmem>>, %arg6: memref<1x256xf32, #tpu.memory_space<vmem>>, %arg7: memref<128x512xbf16, #tpu.memory_space<vmem>>, %arg8: memref<1x512xf32, #tpu.memory_space<vmem>>, %arg9: memref<512x896xbf16, #tpu.memory_space<vmem>>, %arg10: memref<1x896xf32, #tpu.memory_space<vmem>>, %arg11: memref<8x256xf32, #tpu.memory_space<vmem>>, %arg12: memref<8x896xbf16, #tpu.memory_space<vmem>>) attributes {dimension_semantics = [#tpu.dimension_semantics<parallel>], iteration_bounds = array<i64: 1>, scalar_prefetch = 0 : i64, scratch_operands = 0 : i64, tpu.core_type = #tpu.core_type<tc>, window_params = [{transform_indices = @transform_0, window_bounds = array<i64: 8, 896>}, {transform_indices = @transform_1, window_bounds = array<i64: 8, 128>}, {pipeline_mode = #tpu.pipeline_mode<synchronous>, transform_indices = @transform_2, window_bounds = array<i64: 896, 512>}, {pipeline_mode = #tpu.pipeline_mode<synchronous>, transform_indices = @transform_3, window_bounds = array<i64: 1, 512>}, {pipeline_mode = #tpu.pipeline_mode<synchronous>, transform_indices = @transform_4, window_bounds = array<i64: 512, 256>}, {pipeline_mode = #tpu.pipeline_mode<synchronous>, transform_indices = @transform_5, window_bounds = array<i64: 1, 256>}, {pipeline_mode = #tpu.pipeline_mode<synchronous>, transform_indices = @transform_6, window_bounds = array<i64: 128, 512>}, {pipeline_mode = #tpu.pipeline_mode<synchronous>, transform_indices = @transform_7, window_bounds = array<i64: 1, 512>}, {pipeline_mode = #tpu.pipeline_mode<synchronous>, transform_indices = @transform_8, window_bounds = array<i64: 512, 896>}, {pipeline_mode = #tpu.pipeline_mode<synchronous>, transform_indices = @transform_9, window_bounds = array<i64: 1, 896>}, {transform_indices = @transform_10, window_bounds = array<i64: 8, 256>}, {transform_indices = @transform_11, window_bounds = array<i64: 8, 896>}]} {
    %c0 = arith.constant 0 : index
    %c0_0 = arith.constant 0 : index
    %0 = vector.load %arg1[%c0, %c0_0] : memref<8x896xbf16, #tpu.memory_space<vmem>>, vector<8x896xbf16>
    %c0_1 = arith.constant 0 : index
    %c0_2 = arith.constant 0 : index
    %1 = vector.load %arg3[%c0_1, %c0_2] : memref<896x512xbf16, #tpu.memory_space<vmem>>, vector<896x512xbf16>
    %cst = arith.constant dense<0.000000e+00> : vector<8x512xf32>
    %2 = tpu.matmul %0, %1, %cst {dimension_numbers = #tpu.dot_dimension_numbers<[1], [0], [0], [1], [0, 0, 1, 1], [], []>} : vector<8x896xbf16>, vector<896x512xbf16>, vector<8x512xf32> -> vector<8x512xf32>
    %c0_3 = arith.constant 0 : index
    %c0_4 = arith.constant 0 : index
    %3 = vector.load %arg4[%c0_3, %c0_4] : memref<1x512xf32, #tpu.memory_space<vmem>>, vector<1x512xf32>
    %4 = vector.broadcast %3 : vector<1x512xf32> to vector<8x512xf32>
    %5 = arith.addf %2, %4 : vector<8x512xf32>
    %cst_5 = arith.constant 0.000000e+00 : f32
    %6 = vector.broadcast %cst_5 : f32 to vector<8x512xf32>
    %7 = arith.maximumf %5, %6 : vector<8x512xf32>
    %8 = arith.truncf %7 : vector<8x512xf32> to vector<8x512xbf16>
    %c0_6 = arith.constant 0 : index
    %c0_7 = arith.constant 0 : index
    %9 = vector.load %arg5[%c0_6, %c0_7] : memref<512x256xbf16, #tpu.memory_space<vmem>>, vector<512x256xbf16>
    %cst_8 = arith.constant dense<0.000000e+00> : vector<8x256xf32>
    %10 = tpu.matmul %8, %9, %cst_8 {dimension_numbers = #tpu.dot_dimension_numbers<[1], [0], [0], [1], [0, 0, 1, 1], [], []>} : vector<8x512xbf16>, vector<512x256xbf16>, vector<8x256xf32> -> vector<8x256xf32>
    %c0_9 = arith.constant 0 : index
    %c0_10 = arith.constant 0 : index
    %11 = vector.load %arg6[%c0_9, %c0_10] : memref<1x256xf32, #tpu.memory_space<vmem>>, vector<1x256xf32>
    %12 = vector.broadcast %11 : vector<1x256xf32> to vector<8x256xf32>
    %13 = arith.addf %10, %12 : vector<8x256xf32>
    %c0_11 = arith.constant 0 : index
    %c0_12 = arith.constant 0 : index
    %14 = vector.load %arg11[%c0_11, %c0_12] : memref<8x256xf32, #tpu.memory_space<vmem>>, vector<8x256xf32>
    tpu.vector_store %arg11[%c0_11, %c0_12], %13 {strides = array<i32>} : memref<8x256xf32, #tpu.memory_space<vmem>>, vector<8x256xf32>,
    %15 = vector.extract_strided_slice %13 {offsets = [0, 0], sizes = [8, 128], strides = [1, 1]} : vector<8x256xf32> to vector<8x128xf32>
    %16 = vector.extract_strided_slice %13 {offsets = [0, 128], sizes = [8, 128], strides = [1, 1]} : vector<8x256xf32> to vector<8x128xf32>
    %c0_13 = arith.constant 0 : index
    %c0_14 = arith.constant 0 : index
    %17 = vector.load %arg2[%c0_13, %c0_14] : memref<8x128xbf16, #tpu.memory_space<vmem>>, vector<8x128xbf16>
    %18 = arith.extf %17 : vector<8x128xbf16> to vector<8x128xf32>
    %cst_15 = arith.constant 5.000000e-01 : f32
    %19 = vector.broadcast %cst_15 : f32 to vector<8x128xf32>
    %20 = arith.mulf %19, %16 : vector<8x128xf32>
    %21 = math.exp %20 : vector<8x128xf32>
    %22 = arith.mulf %18, %21 : vector<8x128xf32>
    %23 = arith.addf %15, %22 : vector<8x128xf32>
    %24 = arith.truncf %23 : vector<8x128xf32> to vector<8x128xbf16>
    %c0_16 = arith.constant 0 : index
    %c0_17 = arith.constant 0 : index
    %25 = vector.load %arg7[%c0_16, %c0_17] : memref<128x512xbf16, #tpu.memory_space<vmem>>, vector<128x512xbf16>
    %cst_18 = arith.constant dense<0.000000e+00> : vector<8x512xf32>
    %26 = tpu.matmul %24, %25, %cst_18 {dimension_numbers = #tpu.dot_dimension_numbers<[1], [0], [0], [1], [0, 0, 1, 1], [], []>} : vector<8x128xbf16>, vector<128x512xbf16>, vector<8x512xf32> -> vector<8x512xf32>
    %c0_19 = arith.constant 0 : index
    %c0_20 = arith.constant 0 : index
    %27 = vector.load %arg8[%c0_19, %c0_20] : memref<1x512xf32, #tpu.memory_space<vmem>>, vector<1x512xf32>
    %28 = vector.broadcast %27 : vector<1x512xf32> to vector<8x512xf32>
    %29 = arith.addf %26, %28 : vector<8x512xf32>
    %cst_21 = arith.constant 0.000000e+00 : f32
    %30 = vector.broadcast %cst_21 : f32 to vector<8x512xf32>
    %31 = arith.maximumf %29, %30 : vector<8x512xf32>
    %32 = arith.truncf %31 : vector<8x512xf32> to vector<8x512xbf16>
    %c0_22 = arith.constant 0 : index
    %c0_23 = arith.constant 0 : index
    %33 = vector.load %arg9[%c0_22, %c0_23] : memref<512x896xbf16, #tpu.memory_space<vmem>>, vector<512x896xbf16>
    %cst_24 = arith.constant dense<0.000000e+00> : vector<8x896xf32>
    %34 = tpu.matmul %32, %33, %cst_24 {dimension_numbers = #tpu.dot_dimension_numbers<[1], [0], [0], [1], [0, 0, 1, 1], [], []>} : vector<8x512xbf16>, vector<512x896xbf16>, vector<8x896xf32> -> vector<8x896xf32>
    %c0_25 = arith.constant 0 : index
    %c0_26 = arith.constant 0 : index
    %35 = vector.load %arg10[%c0_25, %c0_26] : memref<1x896xf32, #tpu.memory_space<vmem>>, vector<1x896xf32>
    %36 = vector.broadcast %35 : vector<1x896xf32> to vector<8x896xf32>
    %37 = arith.addf %34, %36 : vector<8x896xf32>
    %38 = arith.negf %37 : vector<8x896xf32>
    %39 = math.exp %38 : vector<8x896xf32>
    %cst_27 = arith.constant 1.000000e+00 : f32
    %40 = vector.broadcast %cst_27 : f32 to vector<8x896xf32>
    %41 = arith.addf %40, %39 : vector<8x896xf32>
    %42 = arith.divf %40, %41 : vector<8x896xf32>
    %43 = arith.truncf %42 : vector<8x896xf32> to vector<8x896xbf16>
    %c0_28 = arith.constant 0 : index
    %c0_29 = arith.constant 0 : index
    %44 = vector.load %arg12[%c0_28, %c0_29] : memref<8x896xbf16, #tpu.memory_space<vmem>>, vector<8x896xbf16>
    tpu.vector_store %arg12[%c0_28, %c0_29], %43 {strides = array<i32>} : memref<8x896xbf16, #tpu.memory_space<vmem>>, vector<8x896xbf16>,
    return
  }
  func.func @transform_0(%arg0: i32) -> (i32, i32) {
    %c0_i32 = arith.constant 0 : i32
    %c0_i32_0 = arith.constant 0 : i32
    return %arg0, %c0_i32 : i32, i32
  }
  func.func @transform_1(%arg0: i32) -> (i32, i32) {
    %c0_i32 = arith.constant 0 : i32
    %c0_i32_0 = arith.constant 0 : i32
    return %arg0, %c0_i32 : i32, i32
  }
  func.func @transform_2(%arg0: i32) -> (i32, i32) {
    %c0_i32 = arith.constant 0 : i32
    %c0_i32_0 = arith.constant 0 : i32
    %c0_i32_1 = arith.constant 0 : i32
    return %c0_i32, %c0_i32_0 : i32, i32
  }
  func.func @transform_3(%arg0: i32) -> (i32, i32) {
    %c0_i32 = arith.constant 0 : i32
    %c0_i32_0 = arith.constant 0 : i32
    %c0_i32_1 = arith.constant 0 : i32
    return %c0_i32, %c0_i32_0 : i32, i32
  }
  func.func @transform_4(%arg0: i32) -> (i32, i32) {
    %c0_i32 = arith.constant 0 : i32
    %c0_i32_0 = arith.constant 0 : i32
    %c0_i32_1 = arith.constant 0 : i32
    return %c0_i32, %c0_i32_0 : i32, i32
  }
  func.func @transform_5(%arg0: i32) -> (i32, i32) {
    %c0_i32 = arith.constant 0 : i32
    %c0_i32_0 = arith.constant 0 : i32
    %c0_i32_1 = arith.constant 0 : i32
    return %c0_i32, %c0_i32_0 : i32, i32
  }
  func.func @transform_6(%arg0: i32) -> (i32, i32) {
    %c0_i32 = arith.constant 0 : i32
    %c0_i32_0 = arith.constant 0 : i32
    %c0_i32_1 = arith.constant 0 : i32
    return %c0_i32, %c0_i32_0 : i32, i32
  }
  func.func @transform_7(%arg0: i32) -> (i32, i32) {
    %c0_i32 = arith.constant 0 : i32
    %c0_i32_0 = arith.constant 0 : i32
    %c0_i32_1 = arith.constant 0 : i32
    return %c0_i32, %c0_i32_0 : i32, i32
  }
  func.func @transform_8(%arg0: i32) -> (i32, i32) {
    %c0_i32 = arith.constant 0 : i32
    %c0_i32_0 = arith.constant 0 : i32
    %c0_i32_1 = arith.constant 0 : i32
    return %c0_i32, %c0_i32_0 : i32, i32
  }
  func.func @transform_9(%arg0: i32) -> (i32, i32) {
    %c0_i32 = arith.constant 0 : i32
    %c0_i32_0 = arith.constant 0 : i32
    %c0_i32_1 = arith.constant 0 : i32
    return %c0_i32, %c0_i32_0 : i32, i32
  }
  func.func @transform_10(%arg0: i32) -> (i32, i32) {
    %c0_i32 = arith.constant 0 : i32
    %c0_i32_0 = arith.constant 0 : i32
    return %arg0, %c0_i32 : i32, i32
  }
  func.func @transform_11(%arg0: i32) -> (i32, i32) {
    %c0_i32 = arith.constant 0 : i32
    %c0_i32_0 = arith.constant 0 : i32
    return %arg0, %c0_i32 : i32, i32
  }
}

</mosaic_0001>

<bundles_post_ra>
// kernel: tpu_custom_call.1
= control target key start
LH: loop header
LB: loop body
LE: loop exit
PB: predicated region body
PF: predicated region fallthrough
CT: control target
= control target key end

     0   :  { %17 = vsyncpa [#allocation3], 0  ;;  %s6408_s0 = inlined_call_operand.hbm [shape: bf16[8,896], index: 0, kind: input, shape index: {}]   ;;  %s6409_s1 = inlined_call_operand.hbm [shape: bf16[8,128], index: 1, kind: input, shape index: {}]   ;;  %s6410_s2 = inlined_call_operand.hbm [shape: bf16[896,512], index: 2, kind: input, shape index: {}]   ;;  %s6411_s3 = inlined_call_operand.vmem [shape: f32[1,512], index: 3, kind: input, shape index: {}]   ;;  %s6412_s4 = inlined_call_operand.hbm [shape: bf16[512,256], index: 4, kind: input, shape index: {}]   ;;  %s6413_s5 = inlined_call_operand.vmem [shape: f32[1,256], index: 5, kind: input, shape index: {}]   ;;  %s6414_s6 = inlined_call_operand.hbm [shape: bf16[128,512], index: 6, kind: input, shape index: {}]   ;;  %s6415_s7 = inlined_call_operand.hbm [shape: f32[1,512], index: 7, kind: input, shape index: {}]   ;;  %s6416_s8 = inlined_call_operand.hbm [shape: bf16[512,896], index: 8, kind: input, shape index: {}]   ;;  %s6417_s9 = inlined_call_operand.vmem [shape: f32[1,896], index: 9, kind: input, shape index: {}]   ;;  %s6418_s10 = inlined_call_operand.hbm [shape: f32[8,256], index: 10, kind: output, shape index: {0}]   ;;  %s6419_s11 = inlined_call_operand.hbm [shape: bf16[8,896], index: 11, kind: output, shape index: {1}]  }
   0x1   :  { %18 = vsyncpa [#allocation6], 0 }
   0x2   :  { %19 = vsyncpa [#allocation9], 0 }
   0x3   :  { %20 = vsyncpa [#allocation12], 0 }
   0x4   :  { %21 = vsyncpa [#allocation4], 0 }
   0x5   :  { %22 = vsyncpa [#allocation16], 0  ;;  %s6186_s17 = smov [#allocation5]   ;;  %s6187_s19 = smov [#allocation8]  }
   0x6   :  { %s39_s18 = sshll.u32 %s6186_s17, 4  ;;  %s62_s20 = sshll.u32 %s6187_s19, 4  ;;  %s40_s18 = int_to_ptr.vmem [resolvable:$true] %s39_s18  ;;  %s63_s20 = int_to_ptr.vmem [resolvable:$true] %s62_s20 }
   0x7   :  { %s6002_s21 = scalar_lea.vmem %s40_s18, 64  ;;  %p6007_p1 = scmp.lt.s32.totalorder %s40_s18, %s40_s18 }
   0x8   :  { %p6003_p0 = scmp.ne.s32.totalorder %s40_s18, %s6002_s21  ;;  %p6008_p2 = scmp.lt.s32.totalorder %s6002_s21, %s6002_s21 }
   0xa   :  { %p6009_p3 = por %p6008_p2, %p6007_p1 }
   0xc   :  { %p6010_p4 = pnand %p6009_p3, %p6003_p0 }
   0xe   :  { %6013 = shalt.err (!%p6010_p4)
}
   0xf   :  { %42 = dma.hbm_to_vmem [thread:$0]  %s6409_s1, 64, %s40_s18, [#allocation6]  }
  0x10   :  { %s6022_s24 = scalar_lea.vmem %s63_s20, 8192  ;;  %p6027_p6 = scmp.lt.s32.totalorder %s63_s20, %s63_s20 }
  0x11   :  { %p6023_p5 = scmp.ne.s32.totalorder %s63_s20, %s6022_s24  ;;  %p6028_p7 = scmp.lt.s32.totalorder %s6022_s24, %s6022_s24 }
  0x13   :  { %p6029_p8 = por %p6028_p7, %p6027_p6 }
  0x15   :  { %p6030_p9 = pnand %p6029_p8, %p6023_p5 }
  0x17   :  { %6033 = shalt.err (!%p6030_p9)
}
  0x18   :  { %s6188_s25 = smov 128   ;;  %s6189_s26 = smov 8  }
  0x19   :  { %68 = dma.hbm_to_vmem [thread:$0]  %s6412_s4, 8192, %s63_s20, [#allocation9], %s6188_s25, %s6188_s25, %s6189_s26  }
  0x1a   :  { %s6190_s29 = smov [#allocation11]   ;;  %s6191_s12 = smov [#allocation2]  }
  0x1b   :  { %s89_s30 = sshll.u32 %s6190_s29, 4  ;;  %s29_s13 = sshll.u32 %s6191_s12, 4  ;;  %s90_s30 = int_to_ptr.vmem [resolvable:$true] %s89_s30  ;;  %s30_s13 = int_to_ptr.vmem [resolvable:$true] %s29_s13 }
  0x1c   :  { %s6042_s1 = scalar_lea.vmem %s90_s30, 64  ;;  %p6047_p11 = scmp.lt.s32.totalorder %s90_s30, %s90_s30 }
  0x1d   :  { %p6043_p10 = scmp.ne.s32.totalorder %s90_s30, %s6042_s1  ;;  %p6048_p12 = scmp.lt.s32.totalorder %s6042_s1, %s6042_s1 }
  0x1f   :  { %p6049_p13 = por %p6048_p12, %p6047_p11 }
  0x21   :  { %p6050_p0 = pnand %p6049_p13, %p6043_p10 }
  0x23   :  { %6053 = shalt.err (!%p6050_p0)
}
  0x24   :  { %92 = dma.hbm_to_vmem [thread:$0]  %s6415_s7, 64, %s90_s30, [#allocation12]  }
  0x25   :  { %s6062_s16 = scalar_lea.vmem %s30_s13, 448  ;;  %p6067_p2 = scmp.lt.s32.totalorder %s30_s13, %s30_s13 }
  0x26   :  { %p6063_p1 = scmp.ne.s32.totalorder %s30_s13, %s6062_s16  ;;  %p6068_p3 = scmp.lt.s32.totalorder %s6062_s16, %s6062_s16 }
  0x28   :  { %p6069_p4 = por %p6068_p3, %p6067_p2 }
  0x2a   :  { %p6070_p5 = pnand %p6069_p4, %p6063_p1 }
  0x2c   :  { %6073 = shalt.err (!%p6070_p5)
}
  0x2d   :  { %32 = dma.hbm_to_vmem [thread:$0]  %s6408_s0, 448, %s30_s13, [#allocation3]  }
  0x2e   :  { %s6192_s18 = smov [#allocation7]  }
  0x2f   :  { %s48_s19 = sshll.u32 %s6192_s18, 4  ;;  %s49_s19 = int_to_ptr.vmem [resolvable:$true] %s48_s19 }
  0x30   :  { %s6082_s20 = scalar_lea.vmem %s49_s19, 28672  ;;  %p6087_p7 = scmp.lt.s32.totalorder %s49_s19, %s49_s19 }
  0x31   :  { %p6083_p6 = scmp.ne.s32.totalorder %s49_s19, %s6082_s20  ;;  %p6088_p8 = scmp.lt.s32.totalorder %s6082_s20, %s6082_s20 }
  0x33   :  { %p6089_p9 = por %p6088_p8, %p6087_p7 }
  0x35   :  { %p6090_p10 = pnand %p6089_p9, %p6083_p6 }
  0x37   :  { %6093 = shalt.err (!%p6090_p10)
}
  0x38   :  { %s6193_s7 = smov 256   ;;  %s6194_s21 = smov 16  }
  0x39   :  { %54 = dma.hbm_to_vmem [thread:$0]  %s6410_s2, 28672, %s49_s19, [#allocation6], %s6193_s7, %s6193_s7, %s6194_s21  }
  0x3a   :  { %s6195_s24 = smov [#allocation10]   ;;  %s6196_s0 = smov [#allocation13]  }
  0x3b   :  { %s76_s25 = sshll.u32 %s6195_s24, 4  ;;  %s98_s26 = sshll.u32 %s6196_s0, 4  ;;  %s77_s25 = int_to_ptr.vmem [resolvable:$true] %s76_s25  ;;  %s99_s26 = int_to_ptr.vmem [resolvable:$true] %s98_s26 }
  0x3c   :  { %s6102_s27 = scalar_lea.vmem %s77_s25, 4096  ;;  %p6107_p12 = scmp.lt.s32.totalorder %s77_s25, %s77_s25 }
  0x3d   :  { %p6103_p11 = scmp.ne.s32.totalorder %s77_s25, %s6102_s27  ;;  %p6108_p13 = scmp.lt.s32.totalorder %s6102_s27, %s6102_s27 }
  0x3f   :  { %p6109_p0 = por %p6108_p13, %p6107_p12 }
  0x41   :  { %p6110_p1 = pnand %p6109_p0, %p6103_p11 }
  0x43   :  { %6113 = shalt.err (!%p6110_p1)
}
  0x44   :  { %82 = dma.hbm_to_vmem [thread:$0]  %s6414_s6, 4096, %s77_s25, [#allocation9], %s6193_s7, %s6193_s7, %s6194_s21  }
  0x45   :  { %s6122_s30 = scalar_lea.vmem %s99_s26, 28672  ;;  %p6127_p3 = scmp.lt.s32.totalorder %s99_s26, %s99_s26 }
  0x46   :  { %p6123_p2 = scmp.ne.s32.totalorder %s99_s26, %s6122_s30  ;;  %p6128_p4 = scmp.lt.s32.totalorder %s6122_s30, %s6122_s30 }
  0x48   :  { %p6129_p5 = por %p6128_p4, %p6127_p3 }
  0x4a   :  { %p6130_p6 = pnand %p6129_p5, %p6123_p2 }
  0x4c   :  { %6133 = shalt.err (!%p6130_p6)
}
  0x4d   :  { %s6197_s2 = smov 448   ;;  %s6198_s12 = smov 28  }
  0x4e   :  { %104 = dma.hbm_to_vmem [thread:$0]  %s6416_s8, 28672, %s99_s26, [#allocation12], %s6197_s2, %s6197_s2, %s6198_s12  }
  0x4f   :  { %6174 = dma.done.wait [#allocation3], 448  }
  0x50   :  { %6175 = vsyncadd [#allocation3], 4294966848 }
  0x51   :  { %6176 = dma.done.wait [#allocation6], 28736  }
  0x52   :  { %6177 = vsyncadd [#allocation6], 4294938560 }
  0x53   :  { %6178 = dma.done.wait [#allocation9], 12288  }
  0x54   :  { %6179 = vsyncadd [#allocation9], 4294955008 }
  0x55   :  { %6180 = dma.done.wait [#allocation12], 28736  }
  0x56   :  { %6181 = vsyncadd [#allocation12], 4294938560  ;;  %v5156_v0 = vld [vmem:[#allocation7 + $0xe4] ss:$16 sps:$4 sm:$0xff]   ;;  %v5160_v2 = vld [vmem:[#allocation7 + $0xe0] ss:$16 sps:$4 sm:$0xff]  }
  0x57   :  { %v5158_v1 = vld [vmem:[#allocation7 + $0x2e4] ss:$16 sps:$4 sm:$0xff]   ;;  %1524 = vmatprep.subr.bf16.mxu0 %v5156_v0  ;;  %v5161_v3 = vld [vmem:[#allocation7 + $0x2e0] ss:$16 sps:$4 sm:$0xff]   ;;  %v130_v48 = vld [vmem:[#allocation2 + $0x8] sm:$0xff] }
  0x58   :  { %1565 = vmatprep.subr.bf16.mxu1 %v5158_v1  ;;  %v5162_v4 = vld [vmem:[#allocation7 + $0xc4] ss:$16 sps:$4 sm:$0xff]   ;;  %1525 = vmatpush1.bf16.msra.mxu0 %v5160_v2  ;;  %v5166_v6 = vld [vmem:[#allocation7 + $0xc0] ss:$16 sps:$4 sm:$0xff]   ;;  %v6285_v51 = vcombine.high %v130_v48, %v130_v48 }
  0x59   :  { %1566 = vmatpush1.bf16.msra.mxu1 %v5161_v3  ;;  %v5164_v5 = vld [vmem:[#allocation7 + $0x2c4] ss:$16 sps:$4 sm:$0xff]   ;;  %1526 = vmatprep.subr.bf16.mxu0 %v5162_v4  ;;  %v5167_v7 = vld [vmem:[#allocation7 + $0x2c0] ss:$16 sps:$4 sm:$0xff]  }
  0x5a   :  { %1567 = vmatprep.subr.bf16.mxu1 %v5164_v5  ;;  %v5168_v8 = vld [vmem:[#allocation7 + $0xa4] ss:$16 sps:$4 sm:$0xff]   ;;  %v5172_v10 = vld [vmem:[#allocation7 + $0xa0] ss:$16 sps:$4 sm:$0xff]   ;;  %1597 = vmatprep.mubr.bf16.mxu1 %v6285_v51 }
  0x5b   :  { %v5170_v9 = vld [vmem:[#allocation7 + $0x2a4] ss:$16 sps:$4 sm:$0xff]   ;;  %v5173_v11 = vld [vmem:[#allocation7 + $0x2a0] ss:$16 sps:$4 sm:$0xff]  }
  0x5c   :  { %1527 = vmatpush1.bf16.msra.mxu0 %v5166_v6  ;;  %v5174_v12 = vld [vmem:[#allocation7 + $0x84] ss:$16 sps:$4 sm:$0xff]   ;;  %v5178_v14 = vld [vmem:[#allocation7 + $0x80] ss:$16 sps:$4 sm:$0xff]  }
  0x5d   :  { %1568 = vmatpush1.bf16.msra.mxu1 %v5167_v7  ;;  %1528 = vmatprep.subr.bf16.mxu0 %v5168_v8  ;;  %v5176_v13 = vld [vmem:[#allocation7 + $0x284] ss:$16 sps:$4 sm:$0xff]   ;;  %v5179_v15 = vld [vmem:[#allocation7 + $0x280] ss:$16 sps:$4 sm:$0xff]   ;;  %v6291_v7 = vcombine.low %v130_v48, %v130_v48  ;;  %v5316_v48 = vld [vmem:[#allocation7 + $0xcc] ss:$16 sps:$4 sm:$0xff]  }
  0x5e   :  { %1569 = vmatprep.subr.bf16.mxu1 %v5170_v9  ;;  %v5180_v16 = vld [vmem:[#allocation7 + $0x64] ss:$16 sps:$4 sm:$0xff]   ;;  %v5184_v18 = vld [vmem:[#allocation7 + $0x60] ss:$16 sps:$4 sm:$0xff]  }
  0x5f   :  { %v5182_v17 = vld [vmem:[#allocation7 + $0x264] ss:$16 sps:$4 sm:$0xff]   ;;  %v5185_v19 = vld [vmem:[#allocation7 + $0x260] ss:$16 sps:$4 sm:$0xff]  }
  0x60   :  { %1529 = vmatpush1.bf16.msra.mxu0 %v5172_v10  ;;  %v5186_v20 = vld [vmem:[#allocation7 + $0x44] ss:$16 sps:$4 sm:$0xff]   ;;  %v5190_v22 = vld [vmem:[#allocation7 + $0x40] ss:$16 sps:$4 sm:$0xff]  }
  0x61   :  { %1570 = vmatpush1.bf16.msra.mxu1 %v5173_v11  ;;  %1530 = vmatprep.subr.bf16.mxu0 %v5174_v12  ;;  %v5188_v21 = vld [vmem:[#allocation7 + $0x244] ss:$16 sps:$4 sm:$0xff]   ;;  %v5191_v23 = vld [vmem:[#allocation7 + $0x240] ss:$16 sps:$4 sm:$0xff]  }
  0x62   :  { %1571 = vmatprep.subr.bf16.mxu1 %v5176_v13  ;;  %v5192_v24 = vld [vmem:[#allocation7 + $0x24] ss:$16 sps:$4 sm:$0xff]   ;;  %v5196_v26 = vld [vmem:[#allocation7 + $0x20] ss:$16 sps:$4 sm:$0xff]  }
  0x63   :  { %v5194_v25 = vld [vmem:[#allocation7 + $0x224] ss:$16 sps:$4 sm:$0xff]   ;;  %v5197_v27 = vld [vmem:[#allocation7 + $0x220] ss:$16 sps:$4 sm:$0xff]  }
  0x64   :  { %1531 = vmatpush1.bf16.msra.mxu0 %v5178_v14  ;;  %v5198_v28 = vld [vmem:[#allocation7 + $0x4] ss:$16 sps:$4 sm:$0xff]   ;;  %v5202_v30 = vld [vmem:[#allocation7] ss:$16 sps:$4 sm:$0xff]  }
  0x65   :  { %1572 = vmatpush1.bf16.msra.mxu1 %v5179_v15  ;;  %1532 = vmatprep.subr.bf16.mxu0 %v5180_v16  ;;  %v5200_v29 = vld [vmem:[#allocation7 + $0x204] ss:$16 sps:$4 sm:$0xff]   ;;  %v5203_v31 = vld [vmem:[#allocation7 + $0x200] ss:$16 sps:$4 sm:$0xff]   ;;  %v6199_v16 = vmov 0  }
  0x66   :  { %1573 = vmatprep.subr.bf16.mxu1 %v5182_v17  ;;  %v5204_v32 = vld [vmem:[#allocation7 + $0x1e4] ss:$16 sps:$4 sm:$0xff]   ;;  %v5208_v34 = vld [vmem:[#allocation7 + $0x1e0] ss:$16 sps:$4 sm:$0xff]  }
  0x67   :  { %v5206_v33 = vld [vmem:[#allocation7 + $0x3e4] ss:$16 sps:$4 sm:$0xff]   ;;  %v5209_v35 = vld [vmem:[#allocation7 + $0x3e0] ss:$16 sps:$4 sm:$0xff]  }
  0x68   :  { %1533 = vmatpush1.bf16.msra.mxu0 %v5184_v18  ;;  %v5210_v36 = vld [vmem:[#allocation7 + $0x1c4] ss:$16 sps:$4 sm:$0xff]   ;;  %v5214_v38 = vld [vmem:[#allocation7 + $0x1c0] ss:$16 sps:$4 sm:$0xff]  }
  0x69   :  { %1574 = vmatpush1.bf16.msra.mxu1 %v5185_v19  ;;  %1534 = vmatprep.subr.bf16.mxu0 %v5186_v20  ;;  %v5212_v37 = vld [vmem:[#allocation7 + $0x3c4] ss:$16 sps:$4 sm:$0xff]   ;;  %v5215_v39 = vld [vmem:[#allocation7 + $0x3c0] ss:$16 sps:$4 sm:$0xff]  }
  0x6a   :  { %1575 = vmatprep.subr.bf16.mxu1 %v5188_v21  ;;  %v5216_v40 = vld [vmem:[#allocation7 + $0x1a4] ss:$16 sps:$4 sm:$0xff]   ;;  %v5220_v42 = vld [vmem:[#allocation7 + $0x1a0] ss:$16 sps:$4 sm:$0xff]  }
  0x6b   :  { %v5218_v41 = vld [vmem:[#allocation7 + $0x3a4] ss:$16 sps:$4 sm:$0xff]   ;;  %v5221_v43 = vld [vmem:[#allocation7 + $0x3a0] ss:$16 sps:$4 sm:$0xff]  }
  0x6c   :  { %1535 = vmatpush1.bf16.msra.mxu0 %v5190_v22  ;;  %v5222_v44 = vld [vmem:[#allocation7 + $0x184] ss:$16 sps:$4 sm:$0xff]   ;;  %v5226_v49 = vld [vmem:[#allocation7 + $0x180] ss:$16 sps:$4 sm:$0xff]  }
  0x6d   :  { %1576 = vmatpush1.bf16.msra.mxu1 %v5191_v23  ;;  %1536 = vmatprep.subr.bf16.mxu0 %v5192_v24  ;;  %v5224_v45 = vld [vmem:[#allocation7 + $0x384] ss:$16 sps:$4 sm:$0xff]   ;;  %v5227_v50 = vld [vmem:[#allocation7 + $0x380] ss:$16 sps:$4 sm:$0xff]  }
  0x6e   :  { %1577 = vmatprep.subr.bf16.mxu1 %v5194_v25  ;;  %v129_v46 = vld [vmem:[#allocation2] sm:$0xff] }
  0x6f   :  { %v6283_v47 = vcombine.high %v129_v46, %v129_v46  ;;  %v5228_v52 = vld [vmem:[#allocation7 + $0x164] ss:$16 sps:$4 sm:$0xff]   ;;  %v5232_v54 = vld [vmem:[#allocation7 + $0x160] ss:$16 sps:$4 sm:$0xff]   ;;  %v6289_v6 = vcombine.low %v129_v46, %v129_v46 }
  0x70   :  { %1537 = vmatpush1.bf16.msra.mxu0 %v5196_v26  ;;  %v5230_v53 = vld [vmem:[#allocation7 + $0x364] ss:$16 sps:$4 sm:$0xff]   ;;  %v5233_v55 = vld [vmem:[#allocation7 + $0x360] ss:$16 sps:$4 sm:$0xff]  }
  0x71   :  { %1578 = vmatpush1.bf16.msra.mxu1 %v5197_v27  ;;  %1538 = vmatprep.subr.bf16.mxu0 %v5198_v28  ;;  %v5234_v56 = vld [vmem:[#allocation7 + $0x144] ss:$16 sps:$4 sm:$0xff]   ;;  %v5238_v58 = vld [vmem:[#allocation7 + $0x140] ss:$16 sps:$4 sm:$0xff]  }
  0x72   :  { %1579 = vmatprep.subr.bf16.mxu1 %v5200_v29  ;;  %1556 = vmatprep.mubr.bf16.mxu0 %v6283_v47  ;;  %v5236_v57 = vld [vmem:[#allocation7 + $0x344] ss:$16 sps:$4 sm:$0xff]   ;;  %v5239_v59 = vld [vmem:[#allocation7 + $0x340] ss:$16 sps:$4 sm:$0xff]  }
  0x73   :  { %v5240_v60 = vld [vmem:[#allocation7 + $0x124] ss:$16 sps:$4 sm:$0xff]   ;;  %v5244_v62 = vld [vmem:[#allocation7 + $0x120] ss:$16 sps:$4 sm:$0xff]  }
  0x74   :  { %1539 = vmatpush1.bf16.msra.mxu0 %v5202_v30  ;;  %v5242_v61 = vld [vmem:[#allocation7 + $0x324] ss:$16 sps:$4 sm:$0xff]   ;;  %v5245_v63 = vld [vmem:[#allocation7 + $0x320] ss:$16 sps:$4 sm:$0xff]  }
  0x75   :  { %1580 = vmatpush1.bf16.msra.mxu1 %v5203_v31  ;;  %1540 = vmatprep.subr.bf16.mxu0 %v5204_v32  ;;  %v5246_v0 = vld [vmem:[#allocation7 + $0x104] ss:$16 sps:$4 sm:$0xff]   ;;  %v5250_v2 = vld [vmem:[#allocation7 + $0x100] ss:$16 sps:$4 sm:$0xff]  }
  0x76   :  { %1581 = vmatprep.subr.bf16.mxu1 %v5206_v33  ;;  %v5248_v1 = vld [vmem:[#allocation7 + $0x304] ss:$16 sps:$4 sm:$0xff]   ;;  %v5251_v3 = vld [vmem:[#allocation7 + $0x300] ss:$16 sps:$4 sm:$0xff]  }
  0x77   :  { %v5258_v4 = vld [vmem:[#allocation7 + $0x4e4] ss:$16 sps:$4 sm:$0xff]   ;;  %v5256_v8 = vld [vmem:[#allocation7 + $0x4e0] ss:$16 sps:$4 sm:$0xff]  }
  0x78   :  { %1541 = vmatpush2.bf16.msra.mxu0 %v5208_v34  ;;  %v5261_v5 = vld [vmem:[#allocation7 + $0x6e4] ss:$16 sps:$4 sm:$0xff]   ;;  %v5259_v9 = vld [vmem:[#allocation7 + $0x6e0] ss:$16 sps:$4 sm:$0xff]  }
  0x79   :  { %1582 = vmatpush2.bf16.msra.mxu1 %v5209_v35  ;;  %1542 = vmatprep.subr.bf16.mxu0 %v5210_v36  ;;  %v5264_v10 = vld [vmem:[#allocation7 + $0x4c4] ss:$16 sps:$4 sm:$0xff]   ;;  %v5262_v12 = vld [vmem:[#allocation7 + $0x4c0] ss:$16 sps:$4 sm:$0xff]  }
  0x7a   :  { %1583 = vmatprep.subr.bf16.mxu1 %v5212_v37  ;;  %v5267_v11 = vld [vmem:[#allocation7 + $0x6c4] ss:$16 sps:$4 sm:$0xff]   ;;  %v5265_v13 = vld [vmem:[#allocation7 + $0x6c0] ss:$16 sps:$4 sm:$0xff]  }
  0x7b   :  { %v5270_v14 = vld [vmem:[#allocation7 + $0x4a4] ss:$16 sps:$4 sm:$0xff]   ;;  %v5268_v17 = vld [vmem:[#allocation7 + $0x4a0] ss:$16 sps:$4 sm:$0xff]  }
  0x7c   :  { %1543 = vmatpush2.bf16.msra.mxu0 %v5214_v38  ;;  %v5273_v15 = vld [vmem:[#allocation7 + $0x6a4] ss:$16 sps:$4 sm:$0xff]   ;;  %v5271_v18 = vld [vmem:[#allocation7 + $0x6a0] ss:$16 sps:$4 sm:$0xff]  }
  0x7d   :  { %1584 = vmatpush2.bf16.msra.mxu1 %v5215_v39  ;;  %1544 = vmatprep.subr.bf16.mxu0 %v5216_v40  ;;  %v5276_v19 = vld [vmem:[#allocation7 + $0x484] ss:$16 sps:$4 sm:$0xff]   ;;  %v5274_v21 = vld [vmem:[#allocation7 + $0x480] ss:$16 sps:$4 sm:$0xff]  }
  0x7e   :  { %1585 = vmatprep.subr.bf16.mxu1 %v5218_v41  ;;  %v5279_v20 = vld [vmem:[#allocation7 + $0x684] ss:$16 sps:$4 sm:$0xff]   ;;  %v5277_v22 = vld [vmem:[#allocation7 + $0x680] ss:$16 sps:$4 sm:$0xff]  }
  0x7f   :  { %v5282_v23 = vld [vmem:[#allocation7 + $0x464] ss:$16 sps:$4 sm:$0xff]   ;;  %v5280_v25 = vld [vmem:[#allocation7 + $0x460] ss:$16 sps:$4 sm:$0xff]  }
  0x80   :  { %1545 = vmatpush2.bf16.msra.mxu0 %v5220_v42  ;;  %v5285_v24 = vld [vmem:[#allocation7 + $0x664] ss:$16 sps:$4 sm:$0xff]   ;;  %v5283_v26 = vld [vmem:[#allocation7 + $0x660] ss:$16 sps:$4 sm:$0xff]   ;;  %v5310_v42 = vld [vmem:[#allocation7 + $0xec] ss:$16 sps:$4 sm:$0xff]  }
  0x81   :  { %1586 = vmatpush2.bf16.msra.mxu1 %v5221_v43  ;;  %1546 = vmatprep.subr.bf16.mxu0 %v5222_v44  ;;  %v5288_v27 = vld [vmem:[#allocation7 + $0x444] ss:$16 sps:$4 sm:$0xff]   ;;  %v5286_v29 = vld [vmem:[#allocation7 + $0x440] ss:$16 sps:$4 sm:$0xff]   ;;  %v5307_v44 = vld [vmem:[#allocation2 + $0x18] ss:$0 sps:$4 sm:$0xff]  }
  0x82   :  { %1587 = vmatprep.subr.bf16.mxu1 %v5224_v45  ;;  %v5291_v28 = vld [vmem:[#allocation7 + $0x644] ss:$16 sps:$4 sm:$0xff]   ;;  %v5289_v30 = vld [vmem:[#allocation7 + $0x640] ss:$16 sps:$4 sm:$0xff]   ;;  %v5308_v45 = vld [vmem:[#allocation7 + $0xe8] ss:$16 sps:$4 sm:$0xff]  }
  0x83   :  { %v5294_v31 = vld [vmem:[#allocation7 + $0x424] ss:$16 sps:$4 sm:$0xff]   ;;  %v5292_v34 = vld [vmem:[#allocation7 + $0x420] ss:$16 sps:$4 sm:$0xff]  }
  0x84   :  { %1547 = vmatpush2.bf16.msra.mxu0 %v5226_v49  ;;  %v5297_v32 = vld [vmem:[#allocation7 + $0x624] ss:$16 sps:$4 sm:$0xff]   ;;  %v5295_v36 = vld [vmem:[#allocation7 + $0x620] ss:$16 sps:$4 sm:$0xff]  }
  0x85   :  { %1588 = vmatpush2.bf16.msra.mxu1 %v5227_v50  ;;  %1548 = vmatprep.subr.bf16.mxu0 %v5228_v52  ;;  %v6296_v33 = vld [vmem:[#allocation2 + $0x10] sm:$0xff]  ;;  %v5314_v50 = vld [vmem:[#allocation7 + $0xc8] ss:$16 sps:$4 sm:$0xff]  }
  0x86   :  { %1589 = vmatprep.subr.bf16.mxu1 %v5230_v53  ;;  %v6300_v35 = vcombine.high %v6296_v33, %v6296_v33  ;;  %v5300_v37 = vld [vmem:[#allocation7 + $0x404] ss:$16 sps:$4 sm:$0xff]   ;;  %v5298_v39 = vld [vmem:[#allocation7 + $0x400] ss:$16 sps:$4 sm:$0xff]   ;;  %v5322_v53 = vld [vmem:[#allocation7 + $0xac] ss:$16 sps:$4 sm:$0xff]  }
  0x87   :  { %v5303_v38 = vld [vmem:[#allocation7 + $0x604] ss:$16 sps:$4 sm:$0xff]   ;;  %v5301_v40 = vld [vmem:[#allocation7 + $0x600] ss:$16 sps:$4 sm:$0xff]  }
  0x88   :  { %1549 = vmatpush2.bf16.msra.mxu0 %v5232_v54  ;;  %v5306_v41 = vld [vmem:[#allocation7 + $0x5e4] ss:$16 sps:$4 sm:$0xff]   ;;  %v5304_v43 = vld [vmem:[#allocation7 + $0x5e0] ss:$16 sps:$4 sm:$0xff]  }
  0x89   :  { %1590 = vmatpush2.bf16.msra.mxu1 %v5233_v55  ;;  %1550 = vmatprep.subr.bf16.mxu0 %v5234_v56  ;;  %v5313_v46 = vld [vmem:[#allocation7 + $0x5c4] ss:$16 sps:$4 sm:$0xff]   ;;  %v5311_v49 = vld [vmem:[#allocation7 + $0x5c0] ss:$16 sps:$4 sm:$0xff]   ;;  %v5320_v55 = vld [vmem:[#allocation7 + $0xa8] ss:$16 sps:$4 sm:$0xff]  }
  0x8a   :  { %1591 = vmatprep.subr.bf16.mxu1 %v5236_v57  ;;  %v5319_v52 = vld [vmem:[#allocation7 + $0x5a4] ss:$16 sps:$4 sm:$0xff]   ;;  %v5317_v54 = vld [vmem:[#allocation7 + $0x5a0] ss:$16 sps:$4 sm:$0xff]   ;;  %v5328_v57 = vld [vmem:[#allocation7 + $0x8c] ss:$16 sps:$4 sm:$0xff]  }
  0x8b   :  { %v5325_v56 = vld [vmem:[#allocation7 + $0x584] ss:$16 sps:$4 sm:$0xff]  }
  0x8c   :  { %1551 = vmatpush2.bf16.msra.mxu0 %v5238_v58  ;;  %v5323_v58 = vld [vmem:[#allocation7 + $0x580] ss:$16 sps:$4 sm:$0xff]  }
  0x8d   :  { %1592 = vmatpush2.bf16.msra.mxu1 %v5239_v59  ;;  %1552 = vmatprep.subr.bf16.mxu0 %v5240_v60  ;;  %v5326_v59 = vld [vmem:[#allocation7 + $0x88] ss:$16 sps:$4 sm:$0xff]   ;;  %v5331_v60 = vld [vmem:[#allocation7 + $0x564] ss:$16 sps:$4 sm:$0xff]  }
  0x8e   :  { %1593 = vmatprep.subr.bf16.mxu1 %v5242_v61  ;;  %v5334_v61 = vld [vmem:[#allocation7 + $0x6c] ss:$16 sps:$4 sm:$0xff]  }
  0x90   :  { %1553 = vmatpush2.bf16.msra.mxu0 %v5244_v62  ;;  %v5329_v62 = vld [vmem:[#allocation7 + $0x560] ss:$16 sps:$4 sm:$0xff]  }
  0x91   :  { %1594 = vmatpush2.bf16.msra.mxu1 %v5245_v63  ;;  %1554 = vmatprep.subr.bf16.mxu0 %v5246_v0  ;;  %v5337_v63 = vld [vmem:[#allocation7 + $0x544] ss:$16 sps:$4 sm:$0xff]   ;;  %v5340_v0 = vld [vmem:[#allocation7 + $0x4c] ss:$16 sps:$4 sm:$0xff]  }
  0x92   :  { %1595 = vmatprep.subr.bf16.mxu1 %v5248_v1  ;;  %v5335_v1 = vld [vmem:[#allocation7 + $0x540] ss:$16 sps:$4 sm:$0xff]  }
  0x94   :  { %1555 = vmatpush2.bf16.msra.mxu0 %v5250_v2  ;;  %v5338_v2 = vld [vmem:[#allocation7 + $0x48] ss:$16 sps:$4 sm:$0xff]  }
  0x95   :  { %1596 = vmatpush2.bf16.msra.mxu1 %v5251_v3  ;;  %1606 = vmatprep.subr.bf16.mxu0 %v5258_v4  ;;  %v5343_v3 = vld [vmem:[#allocation7 + $0x524] ss:$16 sps:$4 sm:$0xff]   ;;  %v5346_v4 = vld [vmem:[#allocation7 + $0x2c] ss:$16 sps:$4 sm:$0xff]  }
  0x96   :  { %1647 = vmatprep.subr.bf16.mxu1 %v5261_v5  ;;  %v5341_v5 = vld [vmem:[#allocation7 + $0x520] ss:$16 sps:$4 sm:$0xff]  }
  0x97   :  { %1557 = vmatmul.mubr.bf16.vlgmr.msra.gmra.mxu0 %v6289_v6 }
  0x98   :  { %1598 = vmatmul.mubr.bf16.vlgmr.msra.gmra.mxu1 %v6291_v7  ;;  %1607 = vmatpush1.bf16.msra.mxu0 %v5256_v8  ;;  %v5344_v8 = vld [vmem:[#allocation7 + $0x28] ss:$16 sps:$4 sm:$0xff]  }
  0x99   :  { %1648 = vmatpush1.bf16.msra.mxu1 %v5259_v9  ;;  %1608 = vmatprep.subr.bf16.mxu0 %v5264_v10  ;;  %v5349_v9 = vld [vmem:[#allocation7 + $0x504] ss:$16 sps:$4 sm:$0xff]   ;;  %v5352_v10 = vld [vmem:[#allocation7 + $0xc] ss:$16 sps:$4 sm:$0xff]  }
  0x9a   :  { %1649 = vmatprep.subr.bf16.mxu1 %v5267_v11  ;;  %1679 = vmatprep.mubr.bf16.mxu1 %v6199_v16  ;;  %v5347_v11 = vld [vmem:[#allocation7 + $0x500] ss:$16 sps:$4 sm:$0xff]  }
  0x9b   :  { %1638 = vmatprep.mubr.bf16.mxu0 %v6300_v35 }
  0x9c   :  { %1609 = vmatpush1.bf16.msra.mxu0 %v5262_v12  ;;  %v5350_v12 = vld [vmem:[#allocation7 + $0x8] ss:$16 sps:$4 sm:$0xff]  }
  0x9d   :  { %1650 = vmatpush1.bf16.msra.mxu1 %v5265_v13  ;;  %1610 = vmatprep.subr.bf16.mxu0 %v5270_v14  ;;  %v5357_v13 = vld [vmem:[#allocation7 + $0x1ec] ss:$16 sps:$4 sm:$0xff]  }
  0x9e   :  { %1651 = vmatprep.subr.bf16.mxu1 %v5273_v15  ;;  %v5360_v14 = vld [vmem:[#allocation7 + $0x2ec] ss:$16 sps:$4 sm:$0xff]   ;;  %v6306_v15 = vcombine.low %v6296_v33, %v6296_v33  ;;  %v5379_v33 = vld [vmem:[#allocation7 + $0x168] ss:$16 sps:$4 sm:$0xff]  }
  0xa0   :  { %1611 = vmatpush1.bf16.msra.mxu0 %v5268_v17  ;;  %v5355_v17 = vld [vmem:[#allocation7 + $0x1e8] ss:$16 sps:$4 sm:$0xff]  }
  0xa1   :  { %1652 = vmatpush1.bf16.msra.mxu1 %v5271_v18  ;;  %1612 = vmatprep.subr.bf16.mxu0 %v5276_v19  ;;  %v5358_v18 = vld [vmem:[#allocation7 + $0x2e8] ss:$16 sps:$4 sm:$0xff]   ;;  %v5363_v19 = vld [vmem:[#allocation7 + $0x1cc] ss:$16 sps:$4 sm:$0xff]  }
  0xa2   :  { %1653 = vmatprep.subr.bf16.mxu1 %v5279_v20  ;;  %v5366_v20 = vld [vmem:[#allocation7 + $0x2cc] ss:$16 sps:$4 sm:$0xff]  }
  0xa4   :  { %1613 = vmatpush1.bf16.msra.mxu0 %v5274_v21  ;;  %v5361_v21 = vld [vmem:[#allocation7 + $0x1c8] ss:$16 sps:$4 sm:$0xff]  }
  0xa5   :  { %1654 = vmatpush1.bf16.msra.mxu1 %v5277_v22  ;;  %1614 = vmatprep.subr.bf16.mxu0 %v5282_v23  ;;  %v5364_v22 = vld [vmem:[#allocation7 + $0x2c8] ss:$16 sps:$4 sm:$0xff]   ;;  %v5369_v23 = vld [vmem:[#allocation7 + $0x1ac] ss:$16 sps:$4 sm:$0xff]  }
  0xa6   :  { %1655 = vmatprep.subr.bf16.mxu1 %v5285_v24  ;;  %v5372_v24 = vld [vmem:[#allocation7 + $0x2ac] ss:$16 sps:$4 sm:$0xff]  }
  0xa8   :  { %1615 = vmatpush1.bf16.msra.mxu0 %v5280_v25  ;;  %v5367_v25 = vld [vmem:[#allocation7 + $0x1a8] ss:$16 sps:$4 sm:$0xff]  }
  0xa9   :  { %1656 = vmatpush1.bf16.msra.mxu1 %v5283_v26  ;;  %1616 = vmatprep.subr.bf16.mxu0 %v5288_v27  ;;  %v5370_v26 = vld [vmem:[#allocation7 + $0x2a8] ss:$16 sps:$4 sm:$0xff]   ;;  %v5375_v27 = vld [vmem:[#allocation7 + $0x18c] ss:$16 sps:$4 sm:$0xff]  }
  0xaa   :  { %1657 = vmatprep.subr.bf16.mxu1 %v5291_v28  ;;  %v5378_v28 = vld [vmem:[#allocation7 + $0x28c] ss:$16 sps:$4 sm:$0xff]  }
  0xac   :  { %1617 = vmatpush1.bf16.msra.mxu0 %v5286_v29  ;;  %v5373_v29 = vld [vmem:[#allocation7 + $0x188] ss:$16 sps:$4 sm:$0xff]  }
  0xad   :  { %1658 = vmatpush1.bf16.msra.mxu1 %v5289_v30  ;;  %1618 = vmatprep.subr.bf16.mxu0 %v5294_v31  ;;  %v5376_v30 = vld [vmem:[#allocation7 + $0x288] ss:$16 sps:$4 sm:$0xff]   ;;  %v5381_v31 = vld [vmem:[#allocation7 + $0x16c] ss:$16 sps:$4 sm:$0xff]  }
  0xae   :  { %1659 = vmatprep.subr.bf16.mxu1 %v5297_v32  ;;  %v5384_v32 = vld [vmem:[#allocation7 + $0x26c] ss:$16 sps:$4 sm:$0xff]  }
  0xb0   :  { %1619 = vmatpush1.bf16.msra.mxu0 %v5292_v34  ;;  %v5387_v34 = vld [vmem:[#allocation7 + $0x14c] ss:$16 sps:$4 sm:$0xff]  }
  0xb1   :  { %1660 = vmatpush1.bf16.msra.mxu1 %v5295_v36  ;;  %1620 = vmatprep.subr.bf16.mxu0 %v5300_v37  ;;  %v5390_v36 = vld [vmem:[#allocation7 + $0x24c] ss:$16 sps:$4 sm:$0xff]   ;;  %v5385_v37 = vld [vmem:[#allocation7 + $0x148] ss:$16 sps:$4 sm:$0xff]  }
  0xb2   :  { %1661 = vmatprep.subr.bf16.mxu1 %v5303_v38  ;;  %v5388_v38 = vld [vmem:[#allocation7 + $0x248] ss:$16 sps:$4 sm:$0xff]  }
  0xb4   :  { %1621 = vmatpush1.bf16.msra.mxu0 %v5298_v39  ;;  %v5393_v39 = vld [vmem:[#allocation7 + $0x12c] ss:$16 sps:$4 sm:$0xff]  }
  0xb5   :  { %1662 = vmatpush1.bf16.msra.mxu1 %v5301_v40  ;;  %1622 = vmatprep.subr.bf16.mxu0 %v5306_v41  ;;  %v5396_v40 = vld [vmem:[#allocation7 + $0x22c] ss:$16 sps:$4 sm:$0xff]   ;;  %v5391_v41 = vld [vmem:[#allocation7 + $0x128] ss:$16 sps:$4 sm:$0xff]  }
  0xb6   :  { %1688 = vmatprep.subr.bf16.mxu1 %v5310_v42  ;;  %v5394_v42 = vld [vmem:[#allocation7 + $0x228] ss:$16 sps:$4 sm:$0xff]  }
  0xb8   :  { %1680 = vmatmul.mubr.bf16.vlgmr.msra.gmra.mxu1 %v5307_v44  ;;  %1623 = vmatpush2.bf16.msra.mxu0 %v5304_v43  ;;  %v5399_v43 = vld [vmem:[#allocation7 + $0x10c] ss:$16 sps:$4 sm:$0xff]  }
  0xb9   :  { %1689 = vmatpush1.bf16.msra.mxu1 %v5308_v45  ;;  %1624 = vmatprep.subr.bf16.mxu0 %v5313_v46  ;;  %v5402_v44 = vld [vmem:[#allocation7 + $0x20c] ss:$16 sps:$4 sm:$0xff]   ;;  %v5397_v45 = vld [vmem:[#allocation7 + $0x108] ss:$16 sps:$4 sm:$0xff]  }
  0xba   :  { %1690 = vmatprep.subr.bf16.mxu1 %v5316_v48  ;;  %1720 = vmatprep.mubr.bf16.mxu1 %v6283_v47  ;;  %v5332_v47 = vld [vmem:[#allocation7 + $0x68] ss:$16 sps:$4 sm:$0xff]   ;;  %v5405_v48 = vld [vmem:[#allocation7 + $0x3ec] ss:$16 sps:$4 sm:$0xff]  }
  0xbb   :  { %v5400_v46 = vld [vmem:[#allocation7 + $0x208] ss:$16 sps:$4 sm:$0xff]  }
  0xbc   :  { %1625 = vmatpush2.bf16.msra.mxu0 %v5311_v49  ;;  %v5408_v49 = vld [vmem:[#allocation7 + $0x4ec] ss:$16 sps:$4 sm:$0xff]  }
  0xbd   :  { %1691 = vmatpush1.bf16.msra.mxu1 %v5314_v50  ;;  %1626 = vmatprep.subr.bf16.mxu0 %v5319_v52  ;;  %v5403_v50 = vld [vmem:[#allocation7 + $0x3e8] ss:$16 sps:$4 sm:$0xff]  }
  0xbe   :  { %1692 = vmatprep.subr.bf16.mxu1 %v5322_v53  ;;  %v5406_v52 = vld [vmem:[#allocation7 + $0x4e8] ss:$16 sps:$4 sm:$0xff]   ;;  %v5411_v53 = vld [vmem:[#allocation7 + $0x3cc] ss:$16 sps:$4 sm:$0xff]  }
  0xc0   :  { %1627 = vmatpush2.bf16.msra.mxu0 %v5317_v54  ;;  %v5414_v54 = vld [vmem:[#allocation7 + $0x4cc] ss:$16 sps:$4 sm:$0xff]  }
  0xc1   :  { %1693 = vmatpush1.bf16.msra.mxu1 %v5320_v55  ;;  %1628 = vmatprep.subr.bf16.mxu0 %v5325_v56  ;;  %v5409_v55 = vld [vmem:[#allocation7 + $0x3c8] ss:$16 sps:$4 sm:$0xff]  }
  0xc2   :  { %1694 = vmatprep.subr.bf16.mxu1 %v5328_v57  ;;  %v5412_v56 = vld [vmem:[#allocation7 + $0x4c8] ss:$16 sps:$4 sm:$0xff]   ;;  %v5417_v57 = vld [vmem:[#allocation7 + $0x3ac] ss:$16 sps:$4 sm:$0xff]  }
  0xc4   :  { %1629 = vmatpush2.bf16.msra.mxu0 %v5323_v58  ;;  %v5420_v58 = vld [vmem:[#allocation7 + $0x4ac] ss:$16 sps:$4 sm:$0xff]  }
  0xc5   :  { %1695 = vmatpush1.bf16.msra.mxu1 %v5326_v59  ;;  %1630 = vmatprep.subr.bf16.mxu0 %v5331_v60  ;;  %v5415_v59 = vld [vmem:[#allocation7 + $0x3a8] ss:$16 sps:$4 sm:$0xff]  }
  0xc6   :  { %1696 = vmatprep.subr.bf16.mxu1 %v5334_v61  ;;  %v5418_v60 = vld [vmem:[#allocation7 + $0x4a8] ss:$16 sps:$4 sm:$0xff]   ;;  %v5423_v61 = vld [vmem:[#allocation7 + $0x38c] ss:$16 sps:$4 sm:$0xff]  }
  0xc8   :  { %1631 = vmatpush2.bf16.msra.mxu0 %v5329_v62  ;;  %v5426_v62 = vld [vmem:[#allocation7 + $0x48c] ss:$16 sps:$4 sm:$0xff]  }
  0xc9   :  { %1697 = vmatpush1.bf16.msra.mxu1 %v5332_v47  ;;  %1632 = vmatprep.subr.bf16.mxu0 %v5337_v63  ;;  %v5421_v47 = vld [vmem:[#allocation7 + $0x388] ss:$16 sps:$4 sm:$0xff]   ;;  %v5429_v63 = vld [vmem:[#allocation7 + $0x36c] ss:$16 sps:$4 sm:$0xff]  }
  0xca   :  { %1698 = vmatprep.subr.bf16.mxu1 %v5340_v0  ;;  %v5432_v0 = vld [vmem:[#allocation7 + $0x46c] ss:$16 sps:$4 sm:$0xff]  }
  0xcc   :  { %1633 = vmatpush2.bf16.msra.mxu0 %v5335_v1  ;;  %v5427_v1 = vld [vmem:[#allocation7 + $0x368] ss:$16 sps:$4 sm:$0xff]  }
  0xcd   :  { %1699 = vmatpush1.bf16.msra.mxu1 %v5338_v2  ;;  %1634 = vmatprep.subr.bf16.mxu0 %v5343_v3  ;;  %v5430_v2 = vld [vmem:[#allocation7 + $0x468] ss:$16 sps:$4 sm:$0xff]   ;;  %v5435_v3 = vld [vmem:[#allocation7 + $0x34c] ss:$16 sps:$4 sm:$0xff]  }
  0xce   :  { %1700 = vmatprep.subr.bf16.mxu1 %v5346_v4  ;;  %v5438_v4 = vld [vmem:[#allocation7 + $0x44c] ss:$16 sps:$4 sm:$0xff]  }
  0xd0   :  { %1635 = vmatpush2.bf16.msra.mxu0 %v5341_v5  ;;  %v5436_v5 = vld [vmem:[#allocation7 + $0x448] ss:$16 sps:$4 sm:$0xff]  }
  0xd1   :  { %1701 = vmatpush1.bf16.msra.mxu1 %v5344_v8  ;;  %1636 = vmatprep.subr.bf16.mxu0 %v5349_v9  ;;  %v5441_v8 = vld [vmem:[#allocation7 + $0x32c] ss:$16 sps:$4 sm:$0xff]  }
  0xd2   :  { %1702 = vmatprep.subr.bf16.mxu1 %v5352_v10  ;;  %v5444_v9 = vld [vmem:[#allocation7 + $0x42c] ss:$16 sps:$4 sm:$0xff]   ;;  %v5439_v10 = vld [vmem:[#allocation7 + $0x328] ss:$16 sps:$4 sm:$0xff]  }
  0xd4   :  { %1637 = vmatpush2.bf16.msra.mxu0 %v5347_v11  ;;  %v5442_v11 = vld [vmem:[#allocation7 + $0x428] ss:$16 sps:$4 sm:$0xff]  }
  0xd5   :  { %1703 = vmatpush1.bf16.msra.mxu1 %v5350_v12  ;;  %1729 = vmatprep.subr.bf16.mxu0 %v5360_v14  ;;  %v5447_v12 = vld [vmem:[#allocation7 + $0x30c] ss:$16 sps:$4 sm:$0xff]   ;;  %v5445_v14 = vld [vmem:[#allocation7 + $0x308] ss:$16 sps:$4 sm:$0xff]  }
  0xd6   :  { %1704 = vmatprep.subr.bf16.mxu1 %v5357_v13  ;;  %v5450_v13 = vld [vmem:[#allocation7 + $0x40c] ss:$16 sps:$4 sm:$0xff]  }
  0xd7   :  { %1639 = vmatmul.mubr.bf16.vlgmr.msra.gmra.mxu0 %v6306_v15 }
  0xd8   :  { %1730 = vmatpush1.bf16.msra.mxu0 %v5358_v18  ;;  %1761 = vmatprep.mubr.bf16.mxu0 %v6285_v51  ;;  %v5382_v51 = vld [vmem:[#allocation7 + $0x268] ss:$16 sps:$4 sm:$0xff]   ;;  %v5453_v18 = vld [vmem:[#allocation7 + $0x5ec] ss:$16 sps:$4 sm:$0xff]  }
  0xd9   :  { %1705 = vmatpush2.bf16.msra.mxu1 %v5355_v17  ;;  %1731 = vmatprep.subr.bf16.mxu0 %v5366_v20  ;;  %v5448_v17 = vld [vmem:[#allocation7 + $0x408] ss:$16 sps:$4 sm:$0xff]  }
  0xda   :  { %1706 = vmatprep.subr.bf16.mxu1 %v5363_v19  ;;  %v5456_v19 = vld [vmem:[#allocation7 + $0x6ec] ss:$16 sps:$4 sm:$0xff]   ;;  %v5451_v20 = vld [vmem:[#allocation7 + $0x5e8] ss:$16 sps:$4 sm:$0xff]  }
  0xdc   :  { %1732 = vmatpush1.bf16.msra.mxu0 %v5364_v22  ;;  %v5459_v22 = vld [vmem:[#allocation7 + $0x5cc] ss:$16 sps:$4 sm:$0xff]  }
  0xdd   :  { %1707 = vmatpush2.bf16.msra.mxu1 %v5361_v21  ;;  %1733 = vmatprep.subr.bf16.mxu0 %v5372_v24  ;;  %v5454_v21 = vld [vmem:[#allocation7 + $0x6e8] ss:$16 sps:$4 sm:$0xff]  }
  0xde   :  { %1708 = vmatprep.subr.bf16.mxu1 %v5369_v23  ;;  %v5462_v23 = vld [vmem:[#allocation7 + $0x6cc] ss:$16 sps:$4 sm:$0xff]   ;;  %v5457_v24 = vld [vmem:[#allocation7 + $0x5c8] ss:$16 sps:$4 sm:$0xff]  }
  0xe0   :  { %1734 = vmatpush1.bf16.msra.mxu0 %v5370_v26  ;;  %v5465_v26 = vld [vmem:[#allocation7 + $0x5ac] ss:$16 sps:$4 sm:$0xff]  }
  0xe1   :  { %1709 = vmatpush2.bf16.msra.mxu1 %v5367_v25  ;;  %1735 = vmatprep.subr.bf16.mxu0 %v5378_v28  ;;  %v5460_v25 = vld [vmem:[#allocation7 + $0x6c8] ss:$16 sps:$4 sm:$0xff]  }
  0xe2   :  { %1710 = vmatprep.subr.bf16.mxu1 %v5375_v27  ;;  %v5468_v27 = vld [vmem:[#allocation7 + $0x6ac] ss:$16 sps:$4 sm:$0xff]   ;;  %v5463_v28 = vld [vmem:[#allocation7 + $0x5a8] ss:$16 sps:$4 sm:$0xff]  }
  0xe4   :  { %1736 = vmatpush1.bf16.msra.mxu0 %v5376_v30  ;;  %v5471_v30 = vld [vmem:[#allocation7 + $0x58c] ss:$16 sps:$4 sm:$0xff]  }
  0xe5   :  { %1711 = vmatpush2.bf16.msra.mxu1 %v5373_v29  ;;  %1737 = vmatprep.subr.bf16.mxu0 %v5384_v32  ;;  %v5466_v29 = vld [vmem:[#allocation7 + $0x6a8] ss:$16 sps:$4 sm:$0xff]  }
  0xe6   :  { %1712 = vmatprep.subr.bf16.mxu1 %v5381_v31  ;;  %v5474_v31 = vld [vmem:[#allocation7 + $0x68c] ss:$16 sps:$4 sm:$0xff]   ;;  %v5469_v32 = vld [vmem:[#allocation7 + $0x588] ss:$16 sps:$4 sm:$0xff]  }
  0xe8   :  { %1738 = vmatpush1.bf16.msra.mxu0 %v5382_v51  ;;  %v5477_v51 = vld [vmem:[#allocation7 + $0x56c] ss:$16 sps:$4 sm:$0xff]  }
  0xe9   :  { %1713 = vmatpush2.bf16.msra.mxu1 %v5379_v33  ;;  %1739 = vmatprep.subr.bf16.mxu0 %v5390_v36  ;;  %v5472_v33 = vld [vmem:[#allocation7 + $0x688] ss:$16 sps:$4 sm:$0xff]  }
  0xea   :  { %1714 = vmatprep.subr.bf16.mxu1 %v5387_v34  ;;  %v5475_v34 = vld [vmem:[#allocation7 + $0x568] ss:$16 sps:$4 sm:$0xff]  }
  0xeb   :  { %v5478_v36 = vld [vmem:[#allocation7 + $0x668] ss:$16 sps:$4 sm:$0xff]  }
  0xec   :  { %1740 = vmatpush1.bf16.msra.mxu0 %v5388_v38  ;;  %v5486_v38 = vld [vmem:[#allocation7 + $0x64c] ss:$16 sps:$4 sm:$0xff]  }
  0xed   :  { %1715 = vmatpush2.bf16.msra.mxu1 %v5385_v37  ;;  %1741 = vmatprep.subr.bf16.mxu0 %v5396_v40  ;;  %v5483_v37 = vld [vmem:[#allocation7 + $0x54c] ss:$16 sps:$4 sm:$0xff]   ;;  %v5484_v40 = vld [vmem:[#allocation7 + $0x648] ss:$16 sps:$4 sm:$0xff]  }
  0xee   :  { %1716 = vmatprep.subr.bf16.mxu1 %v5393_v39  ;;  %v5481_v39 = vld [vmem:[#allocation7 + $0x548] ss:$16 sps:$4 sm:$0xff]  }
  0xf0   :  { %1742 = vmatpush1.bf16.msra.mxu0 %v5394_v42  ;;  %v5492_v42 = vld [vmem:[#allocation7 + $0x62c] ss:$16 sps:$4 sm:$0xff]  }
  0xf1   :  { %1717 = vmatpush2.bf16.msra.mxu1 %v5391_v41  ;;  %1743 = vmatprep.subr.bf16.mxu0 %v5402_v44  ;;  %v5489_v41 = vld [vmem:[#allocation7 + $0x52c] ss:$16 sps:$4 sm:$0xff]   ;;  %v5490_v44 = vld [vmem:[#allocation7 + $0x628] ss:$16 sps:$4 sm:$0xff]  }
  0xf2   :  { %1718 = vmatprep.subr.bf16.mxu1 %v5399_v43  ;;  %v5487_v43 = vld [vmem:[#allocation7 + $0x528] ss:$16 sps:$4 sm:$0xff]  }
  0xf4   :  { %1744 = vmatpush1.bf16.msra.mxu0 %v5400_v46  ;;  %v5498_v46 = vld [vmem:[#allocation7 + $0x60c] ss:$16 sps:$4 sm:$0xff]  }
  0xf5   :  { %1719 = vmatpush2.bf16.msra.mxu1 %v5397_v45  ;;  %1745 = vmatprep.subr.bf16.mxu0 %v5405_v48  ;;  %v5495_v45 = vld [vmem:[#allocation7 + $0x50c] ss:$16 sps:$4 sm:$0xff]   ;;  %v5493_v48 = vld [vmem:[#allocation7 + $0x508] ss:$16 sps:$4 sm:$0xff]  }
  0xf6   :  { %1770 = vmatprep.subr.bf16.mxu1 %v5408_v49  ;;  %v5496_v49 = vld [vmem:[#allocation7 + $0x608] ss:$16 sps:$4 sm:$0xff]  }
  0xf8   :  { %1721 = vmatmul.mubr.bf16.vlgmr.msra.gmra.mxu1 %v6289_v6  ;;  %1746 = vmatpush2.bf16.msra.mxu0 %v5403_v50  ;;  %v5424_v6 = vld [vmem:[#allocation7 + $0x488] ss:$16 sps:$4 sm:$0xff]   ;;  %v5501_v50 = vld [vmem:[#allocation8 + $0x74] ss:$8 sps:$4 sm:$0xff]  }
  0xf9   :  { %1771 = vmatpush1.bf16.msra.mxu1 %v5406_v52  ;;  %1747 = vmatprep.subr.bf16.mxu0 %v5411_v53  ;;  %v5499_v52 = vld [vmem:[#allocation8 + $0x70] ss:$8 sps:$4 sm:$0xff]   ;;  %v5504_v53 = vld [vmem:[#allocation8 + $0x64] ss:$8 sps:$4 sm:$0xff]  }
  0xfa   :  { %1772 = vmatprep.subr.bf16.mxu1 %v5414_v54  ;;  %1802 = vmatprep.mubr.bf16.mxu1 %v6300_v35  ;;  %v5433_v35 = vld [vmem:[#allocation7 + $0x348] ss:$16 sps:$4 sm:$0xff]  }
  0xfb   :  { %v5502_v54 = vld [vmem:[#allocation8 + $0x60] ss:$8 sps:$4 sm:$0xff]  }
  0xfc   :  { %1748 = vmatpush2.bf16.msra.mxu0 %v5409_v55  ;;  %v5993_v55 = vld [vmem:[#allocation2 + $0x18] ss:$0 sps:$4 sm:$0xff]  }
  0xfd   :  { %1773 = vmatpush1.bf16.msra.mxu1 %v5412_v56  ;;  %1749 = vmatprep.subr.bf16.mxu0 %v5417_v57  ;;  %v5507_v56 = vld [vmem:[#allocation8 + $0x54] ss:$8 sps:$4 sm:$0xff]   ;;  %v5505_v57 = vld [vmem:[#allocation8 + $0x50] ss:$8 sps:$4 sm:$0xff]  }
  0xfe   :  { %1774 = vmatprep.subr.bf16.mxu1 %v5420_v58  ;;  %v5510_v58 = vld [vmem:[#allocation8 + $0x44] ss:$8 sps:$4 sm:$0xff]  }
 0x100   :  { %1750 = vmatpush2.bf16.msra.mxu0 %v5415_v59  ;;  %v5547_v59 = vld [vmem:[#allocation8 + $0x170] ss:$8 sps:$4 sm:$0xff]  }
 0x101   :  { %1775 = vmatpush1.bf16.msra.mxu1 %v5418_v60  ;;  %1751 = vmatprep.subr.bf16.mxu0 %v5423_v61  ;;  %v5549_v60 = vld [vmem:[#allocation8 + $0x174] ss:$8 sps:$4 sm:$0xff]   ;;  %v5552_v61 = vld [vmem:[#allocation8 + $0x164] ss:$8 sps:$4 sm:$0xff]  }
 0x102   :  { %1776 = vmatprep.subr.bf16.mxu1 %v5426_v62  ;;  %v5508_v62 = vld [vmem:[#allocation8 + $0x40] ss:$8 sps:$4 sm:$0xff]  }
 0x104   :  { %1752 = vmatpush2.bf16.msra.mxu0 %v5421_v47  ;;  %v5513_v47 = vld [vmem:[#allocation8 + $0x34] ss:$8 sps:$4 sm:$0xff]  }
 0x105   :  { %1777 = vmatpush1.bf16.msra.mxu1 %v5424_v6  ;;  %1753 = vmatprep.subr.bf16.mxu0 %v5429_v63  ;;  %v5550_v6 = vld [vmem:[#allocation8 + $0x160] ss:$8 sps:$4 sm:$0xff]   ;;  %v5555_v63 = vld [vmem:[#allocation8 + $0x154] ss:$8 sps:$4 sm:$0xff]  }
 0x106   :  { %1778 = vmatprep.subr.bf16.mxu1 %v5432_v0  ;;  %v5553_v0 = vld [vmem:[#allocation8 + $0x150] ss:$8 sps:$4 sm:$0xff]  }
 0x108   :  { %1754 = vmatpush2.bf16.msra.mxu0 %v5427_v1  ;;  %v5516_v1 = vld [vmem:[#allocation8 + $0x24] ss:$8 sps:$4 sm:$0xff]  }
 0x109   :  { %1779 = vmatpush1.bf16.msra.mxu1 %v5430_v2  ;;  %1755 = vmatprep.subr.bf16.mxu0 %v5435_v3  ;;  %v5558_v2 = vld [vmem:[#allocation8 + $0x144] ss:$8 sps:$4 sm:$0xff]   ;;  %v5514_v3 = vld [vmem:[#allocation8 + $0x20] ss:$8 sps:$4 sm:$0xff]  }
 0x10a   :  { %1780 = vmatprep.subr.bf16.mxu1 %v5438_v4  ;;  %v5556_v4 = vld [vmem:[#allocation8 + $0x140] ss:$8 sps:$4 sm:$0xff]  }
 0x10c   :  { %1756 = vmatpush2.bf16.msra.mxu0 %v5433_v35  ;;  %v5519_v35 = vld [vmem:[#allocation8 + $0x14] ss:$8 sps:$4 sm:$0xff]  }
 0x10d   :  { %1781 = vmatpush1.bf16.msra.mxu1 %v5436_v5  ;;  %1757 = vmatprep.subr.bf16.mxu0 %v5441_v8  ;;  %v5561_v5 = vld [vmem:[#allocation8 + $0x134] ss:$8 sps:$4 sm:$0xff]   ;;  %v5517_v8 = vld [vmem:[#allocation8 + $0x10] ss:$8 sps:$4 sm:$0xff]  }
 0x10e   :  { %1782 = vmatprep.subr.bf16.mxu1 %v5444_v9  ;;  %v5559_v9 = vld [vmem:[#allocation8 + $0x130] ss:$8 sps:$4 sm:$0xff]  }
 0x110   :  { %1758 = vmatpush2.bf16.msra.mxu0 %v5439_v10  ;;  %v5522_v10 = vld [vmem:[#allocation8 + $0x4] ss:$8 sps:$4 sm:$0xff]  }
 0x111   :  { %1783 = vmatpush1.bf16.msra.mxu1 %v5442_v11  ;;  %1759 = vmatprep.subr.bf16.mxu0 %v5447_v12  ;;  %v5520_v11 = vld [vmem:[#allocation8] ss:$8 sps:$4 sm:$0xff]   ;;  %v5525_v12 = vld [vmem:[#allocation8 + $0xf4] ss:$8 sps:$4 sm:$0xff]  }
 0x112   :  { %1784 = vmatprep.subr.bf16.mxu1 %v5450_v13  ;;  %v5523_v13 = vld [vmem:[#allocation8 + $0xf0] ss:$8 sps:$4 sm:$0xff]  }
 0x114   :  { %1760 = vmatpush2.bf16.msra.mxu0 %v5445_v14  ;;  %v5528_v14 = vld [vmem:[#allocation8 + $0xe4] ss:$8 sps:$4 sm:$0xff]  }
 0x115   :  { %1785 = vmatpush1.bf16.msra.mxu1 %v5448_v17  ;;  %1811 = vmatprep.subr.bf16.mxu0 %v5456_v19  ;;  %v5564_v17 = vld [vmem:[#allocation8 + $0x124] ss:$8 sps:$4 sm:$0xff]   ;;  %v5562_v19 = vld [vmem:[#allocation8 + $0x120] ss:$8 sps:$4 sm:$0xff]  }
 0x116   :  { %1786 = vmatprep.subr.bf16.mxu1 %v5453_v18  ;;  %v5526_v18 = vld [vmem:[#allocation8 + $0xe0] ss:$8 sps:$4 sm:$0xff]  }
 0x117   :  { %1762 = vmatmul.mubr.bf16.vlgmr.msra.gmra.mxu0 %v6291_v7  ;;  %v5480_v7 = vld [vmem:[#allocation7 + $0x66c] ss:$16 sps:$4 sm:$0xff]  }
 0x118   :  { %1812 = vmatpush1.bf16.msra.mxu0 %v5454_v21  ;;  %1843 = vmatprep.mubr.bf16.mxu0 %v6199_v16 }
 0x119   :  { %1787 = vmatpush2.bf16.msra.mxu1 %v5451_v20  ;;  %1813 = vmatprep.subr.bf16.mxu0 %v5462_v23 }
 0x11a   :  { %1788 = vmatprep.subr.bf16.mxu1 %v5459_v22  ;;  %v5531_v22 = vld [vmem:[#allocation8 + $0xd4] ss:$8 sps:$4 sm:$0xff]  }
 0x11c   :  { %1814 = vmatpush1.bf16.msra.mxu0 %v5460_v25  ;;  %v5567_v25 = vld [vmem:[#allocation8 + $0x114] ss:$8 sps:$4 sm:$0xff]  }
 0x11d   :  { %1789 = vmatpush2.bf16.msra.mxu1 %v5457_v24  ;;  %1815 = vmatprep.subr.bf16.mxu0 %v5468_v27  ;;  %v5565_v27 = vld [vmem:[#allocation8 + $0x110] ss:$8 sps:$4 sm:$0xff]  }
 0x11e   :  { %1790 = vmatprep.subr.bf16.mxu1 %v5465_v26  ;;  %v5529_v26 = vld [vmem:[#allocation8 + $0xd0] ss:$8 sps:$4 sm:$0xff]  }
 0x120   :  { %1816 = vmatpush1.bf16.msra.mxu0 %v5466_v29 }
 0x121   :  { %1791 = vmatpush2.bf16.msra.mxu1 %v5463_v28  ;;  %1817 = vmatprep.subr.bf16.mxu0 %v5474_v31 }
 0x122   :  { %1792 = vmatprep.subr.bf16.mxu1 %v5471_v30 }
 0x124   :  { %1818 = vmatpush1.bf16.msra.mxu0 %v5472_v33  ;;  %v5568_v33 = vld [vmem:[#allocation8 + $0x100] ss:$8 sps:$4 sm:$0xff]  }
 0x125   :  { %1793 = vmatpush2.bf16.msra.mxu1 %v5469_v32  ;;  %1819 = vmatprep.subr.bf16.mxu0 %v5480_v7  ;;  %v5534_v32 = vld [vmem:[#allocation8 + $0xc4] ss:$8 sps:$4 sm:$0xff]   ;;  %v5573_v7 = vld [vmem:[#allocation8 + $0x1f4] ss:$8 sps:$4 sm:$0xff]  }
 0x126   :  { %1794 = vmatprep.subr.bf16.mxu1 %v5477_v51  ;;  %v5570_v51 = vld [vmem:[#allocation8 + $0x104] ss:$8 sps:$4 sm:$0xff]  }
 0x128   :  { %1820 = vmatpush1.bf16.msra.mxu0 %v5478_v36  ;;  %v5537_v36 = vld [vmem:[#allocation8 + $0xb4] ss:$8 sps:$4 sm:$0xff]  }
 0x129   :  { %1795 = vmatpush2.bf16.msra.mxu1 %v5475_v34  ;;  %1821 = vmatprep.subr.bf16.mxu0 %v5486_v38  ;;  %v5532_v34 = vld [vmem:[#allocation8 + $0xc0] ss:$8 sps:$4 sm:$0xff]   ;;  %v5576_v38 = vld [vmem:[#allocation8 + $0x1e4] ss:$8 sps:$4 sm:$0xff]  }
 0x12a   :  { %1796 = vmatprep.subr.bf16.mxu1 %v5483_v37  ;;  %v5571_v37 = vld [vmem:[#allocation8 + $0x1f0] ss:$8 sps:$4 sm:$0xff]  }
 0x12c   :  { %1822 = vmatpush1.bf16.msra.mxu0 %v5484_v40  ;;  %v5574_v40 = vld [vmem:[#allocation8 + $0x1e0] ss:$8 sps:$4 sm:$0xff]  }
 0x12d   :  { %1797 = vmatpush2.bf16.msra.mxu1 %v5481_v39  ;;  %1823 = vmatprep.subr.bf16.mxu0 %v5492_v42  ;;  %v5535_v39 = vld [vmem:[#allocation8 + $0xb0] ss:$8 sps:$4 sm:$0xff]   ;;  %v5579_v42 = vld [vmem:[#allocation8 + $0x1d4] ss:$8 sps:$4 sm:$0xff]  }
 0x12e   :  { %1798 = vmatprep.subr.bf16.mxu1 %v5489_v41  ;;  %v5540_v41 = vld [vmem:[#allocation8 + $0xa4] ss:$8 sps:$4 sm:$0xff]  }
 0x130   :  { %1824 = vmatpush1.bf16.msra.mxu0 %v5490_v44  ;;  %v5577_v44 = vld [vmem:[#allocation8 + $0x1d0] ss:$8 sps:$4 sm:$0xff]  }
 0x131   :  { %1799 = vmatpush2.bf16.msra.mxu1 %v5487_v43  ;;  %1825 = vmatprep.subr.bf16.mxu0 %v5498_v46  ;;  %v5538_v43 = vld [vmem:[#allocation8 + $0xa0] ss:$8 sps:$4 sm:$0xff]   ;;  %v5582_v46 = vld [vmem:[#allocation8 + $0x1c4] ss:$8 sps:$4 sm:$0xff]  }
 0x132   :  { %1800 = vmatprep.subr.bf16.mxu1 %v5495_v45  ;;  %v5543_v45 = vld [vmem:[#allocation8 + $0x94] ss:$8 sps:$4 sm:$0xff]  }
 0x134   :  { %1826 = vmatpush1.bf16.msra.mxu0 %v5496_v49  ;;  %v5580_v49 = vld [vmem:[#allocation8 + $0x1c0] ss:$8 sps:$4 sm:$0xff]  }
 0x135   :  { %1801 = vmatpush2.bf16.msra.mxu1 %v5493_v48  ;;  %2256 = vmatprep.subr.bf16.mxu0 %v5501_v50  ;;  %v5541_v48 = vld [vmem:[#allocation8 + $0x90] ss:$8 sps:$4 sm:$0xff]   ;;  %v5546_v50 = vld [vmem:[#allocation8 + $0x84] ss:$8 sps:$4 sm:$0xff]  }
 0x136   :  { %2297 = vmatprep.subr.bf16.mxu1 %v5549_v60  ;;  %v5589_v60 = vld [vmem:[#allocation8 + $0x190] ss:$8 sps:$4 sm:$0xff]  }
 0x137   :  { %1844 = vmatmul.mubr.bf16.vlgmr.msra.gmra.mxu0 %v5993_v55  ;;  %v5588_v55 = vld [vmem:[#allocation8 + $0x1a4] ss:$8 sps:$4 sm:$0xff]  }
 0x138   :  { %1803 = vmatmul.mubr.bf16.vlgmr.msra.gmra.mxu1 %v6306_v15  ;;  %2257 = vmatpush1.bf16.msra.mxu0 %v5499_v52  ;;  %v5511_v15 = vld [vmem:[#allocation8 + $0x30] ss:$8 sps:$4 sm:$0xff]   ;;  %v5585_v52 = vld [vmem:[#allocation8 + $0x1b4] ss:$8 sps:$4 sm:$0xff]  }
 0x139   :  { %2258 = vmatprep.subr.bf16.mxu0 %v5504_v53  ;;  %2298 = vmatpush1.bf16.msra.mxu1 %v5547_v59  ;;  %v5544_v53 = vld [vmem:[#allocation8 + $0x80] ss:$8 sps:$4 sm:$0xff]   ;;  %v5591_v59 = vld [vmem:[#allocation8 + $0x194] ss:$8 sps:$4 sm:$0xff]  }
 0x13a   :  { %2299 = vmatprep.subr.bf16.mxu1 %v5552_v61 }
 0x13c   :  { %2259 = vmatpush1.bf16.msra.mxu0 %v5502_v54  ;;  %v5583_v54 = vld [vmem:[#allocation8 + $0x1b0] ss:$8 sps:$4 sm:$0xff]  }
 0x13d   :  { %2260 = vmatprep.subr.bf16.mxu0 %v5507_v56  ;;  %2300 = vmatpush1.bf16.msra.mxu1 %v5550_v6  ;;  %v5586_v56 = vld [vmem:[#allocation8 + $0x1a0] ss:$8 sps:$4 sm:$0xff]  }
 0x13e   :  { %2301 = vmatprep.subr.bf16.mxu1 %v5555_v63  ;;  %v5592_v6 = vld [vmem:[#allocation8 + $0x180] ss:$8 sps:$4 sm:$0xff]   ;;  %v359_v63 = vlaneseq }
 0x140   :  { %2261 = vmatpush1.bf16.msra.mxu0 %v5505_v57 }
 0x141   :  { %2262 = vmatprep.subr.bf16.mxu0 %v5510_v58  ;;  %2302 = vmatpush1.bf16.msra.mxu1 %v5553_v0 }
 0x142   :  { %2303 = vmatprep.subr.bf16.mxu1 %v5558_v2 }
 0x144   :  { %2263 = vmatpush1.bf16.msra.mxu0 %v5508_v62 }
 0x145   :  { %2264 = vmatprep.subr.bf16.mxu0 %v5513_v47  ;;  %2304 = vmatpush1.bf16.msra.mxu1 %v5556_v4  ;;  %v5594_v47 = vld [vmem:[#allocation8 + $0x184] ss:$8 sps:$4 sm:$0xff]  }
 0x146   :  { %2305 = vmatprep.subr.bf16.mxu1 %v5561_v5 }
 0x148   :  { %2265 = vmatpush1.bf16.msra.mxu0 %v5511_v15  ;;  %v6323_v15 = vshrl.u32 %v359_v63, 7  ;;  %v5609_v63 = vld [vmem:[#allocation10 + $0xa4] ss:$16 sps:$4 sm:$0xff]  }
 0x149   :  { %2266 = vmatprep.subr.bf16.mxu0 %v5516_v1  ;;  %2306 = vmatpush1.bf16.msra.mxu1 %v5559_v9  ;;  %v357_v1 = vld [vmem:[%s6411_s3] sm:$0xf] }
 0x14a   :  { %2307 = vmatprep.subr.bf16.mxu1 %v5564_v17  ;;  %v6326_v0 = vsub.s32 0, %v6323_v15  ;;  %v6332_v2 = vsub.s32 1, %v6323_v15 }
 0x14c   :  { %2267 = vmatpush1.bf16.msra.mxu0 %v5514_v3  ;;  %v362_v3 = vrot.slane %v357_v1, %v6326_v0  ;;  %v366_v4 = vrot.slane %v357_v1, %v6332_v2 }
 0x14d   :  { %2268 = vmatprep.subr.bf16.mxu0 %v5519_v35  ;;  %2308 = vmatpush1.bf16.msra.mxu1 %v5562_v19 }
 0x14e   :  { %2309 = vmatprep.subr.bf16.mxu1 %v5567_v25 }
 0x150   :  { %2269 = vmatpush1.bf16.msra.mxu0 %v5517_v8 }
 0x151   :  { %2270 = vmatprep.subr.bf16.mxu0 %v5522_v10  ;;  %2310 = vmatpush1.bf16.msra.mxu1 %v5565_v27 }
 0x152   :  { %2311 = vmatprep.subr.bf16.mxu1 %v5570_v51  ;;  %v5600_v51 = vld [vmem:[#allocation10 + $0xec] ss:$16 sps:$4 sm:$0xff]  }
 0x154   :  { %2271 = vmatpush1.bf16.msra.mxu0 %v5520_v11 }
 0x155   :  { %2272 = vmatprep.subr.bf16.mxu0 %v5525_v12  ;;  %2312 = vmatpush1.bf16.msra.mxu1 %v5568_v33  ;;  %v5597_v33 = vld [vmem:[#allocation10 + $0xe4] ss:$16 sps:$4 sm:$0xff]  }
 0x156   :  { %2313 = vmatprep.subr.bf16.mxu1 %v5573_v7  ;;  %v6342_v7 = vsub.s32 2, %v6323_v15 }
 0x157   :  { %v6315_v20 = vpop.f32.mrf.mxu0 }
 0x158   :  { %v6317_v21 = vpop.f32.mrf.mxu1  ;;  %2273 = vmatpush2.bf16.msra.mxu0 %v5523_v13  ;;  %v1559_v35 = vadd.f32 %v6315_v20, %v362_v3  ;;  %v5607_v3 = vld [vmem:[#allocation10 + $0xa0] ss:$16 sps:$4 sm:$0xff]  }
 0x159   :  { %v6319_v23 = vpop.f32.mrf.mxu0  ;;  %2274 = vmatprep.subr.bf16.mxu0 %v5528_v14  ;;  %2314 = vmatpush2.bf16.msra.mxu1 %v5571_v37 }
 0x15a   :  { %v6321_v24 = vpop.f32.mrf.mxu1  ;;  %2315 = vmatprep.subr.bf16.mxu1 %v5576_v38  ;;  %v1561_v5 = vadd.f32 %v6319_v23, %v366_v4  ;;  %v1600_v8 = vadd.f32 %v6317_v21, %v1559_v35  ;;  %v5610_v4 = vld [vmem:[#allocation10 + $0xa8] ss:$16 sps:$4 sm:$0xff]   ;;  %v5615_v35 = vld [vmem:[#allocation10 + $0x84] ss:$16 sps:$4 sm:$0xff]  }
 0x15b   :  { %v1562_v28 = vpop.f32.mrf.mxu0 }
 0x15c   :  { %v1603_v29 = vpop.f32.mrf.mxu1  ;;  %2275 = vmatpush2.bf16.msra.mxu0 %v5526_v18  ;;  %v1602_v10 = vadd.f32 %v6321_v24, %v1561_v5  ;;  %v5618_v5 = vld [vmem:[#allocation10 + $0x8c] ss:$16 sps:$4 sm:$0xff]  }
 0x15d   :  { %v1563_v30 = vpop.f32.mrf.mxu0  ;;  %2276 = vmatprep.subr.bf16.mxu0 %v5531_v22  ;;  %2316 = vmatpush2.bf16.msra.mxu1 %v5574_v40 }
 0x15e   :  { %v1604_v31 = vpop.f32.mrf.mxu1  ;;  %2317 = vmatprep.subr.bf16.mxu1 %v5579_v42 }
 0x160   :  { %2277 = vmatpush2.bf16.msra.mxu0 %v5529_v26 }
 0x161   :  { %2278 = vmatprep.subr.bf16.mxu0 %v5534_v32  ;;  %2318 = vmatpush2.bf16.msra.mxu1 %v5577_v44  ;;  %v5595_v32 = vld [vmem:[#allocation10 + $0xe0] ss:$16 sps:$4 sm:$0xff]  }
 0x162   :  { %2319 = vmatprep.subr.bf16.mxu1 %v5582_v46 }
 0x164   :  { %2279 = vmatpush2.bf16.msra.mxu0 %v5532_v34  ;;  %v6345_v34 = vsub.s32 3, %v6323_v15 }
 0x165   :  { %2280 = vmatprep.subr.bf16.mxu0 %v5537_v36  ;;  %2320 = vmatpush2.bf16.msra.mxu1 %v5580_v49  ;;  %v370_v36 = vrot.slane %v357_v1, %v6342_v7 }
 0x166   :  { %2321 = vmatprep.subr.bf16.mxu1 %v5585_v52  ;;  %v374_v37 = vrot.slane %v357_v1, %v6345_v34  ;;  %v5612_v1 = vld [vmem:[#allocation10 + $0xac] ss:$16 sps:$4 sm:$0xff]  }
 0x168   :  { %2281 = vmatpush2.bf16.msra.mxu0 %v5535_v39 }
 0x169   :  { %2282 = vmatprep.subr.bf16.mxu0 %v5540_v41  ;;  %2322 = vmatpush2.bf16.msra.mxu1 %v5583_v54 }
 0x16a   :  { %2323 = vmatprep.subr.bf16.mxu1 %v5588_v55 }
 0x16c   :  { %2283 = vmatpush2.bf16.msra.mxu0 %v5538_v43 }
 0x16d   :  { %2284 = vmatprep.subr.bf16.mxu0 %v5543_v45  ;;  %2324 = vmatpush2.bf16.msra.mxu1 %v5586_v56 }
 0x16e   :  { %2325 = vmatprep.subr.bf16.mxu1 %v5591_v59  ;;  %v5598_v59 = vld [vmem:[#allocation10 + $0xe8] ss:$16 sps:$4 sm:$0xff]  }
 0x170   :  { %2285 = vmatpush2.bf16.msra.mxu0 %v5541_v48 }
 0x171   :  { %2286 = vmatprep.subr.bf16.mxu0 %v5546_v50  ;;  %2326 = vmatpush2.bf16.msra.mxu1 %v5589_v60 }
 0x172   :  { %2327 = vmatprep.subr.bf16.mxu1 %v5594_v47  ;;  %v5601_v47 = vld [vmem:[#allocation10 + $0xc0] ss:$16 sps:$4 sm:$0xff]  }
 0x174   :  { %2287 = vmatpush2.bf16.msra.mxu0 %v5544_v53 }
 0x175   :  { %2328 = vmatpush2.bf16.msra.mxu1 %v5592_v6  ;;  %2562 = vmatprep.subr.bf16.mxu0 %v5597_v33  ;;  %v5604_v6 = vld [vmem:[#allocation10 + $0xc8] ss:$16 sps:$4 sm:$0xff]   ;;  %v1924_v33 = vld [vmem:[%s6413_s5] sm:$0x3] }
 0x176   :  { %2603 = vmatprep.subr.bf16.mxu1 %v5600_v51  ;;  %v1929_v51 = vrot.slane %v1924_v33, %v6326_v0 }
 0x178   :  { %v1681_v57 = vpop.f32.mrf.mxu1 }
 0x17a   :  { %v1683_v58 = vpop.f32.mrf.mxu1 }
 0x17c   :  { %v1685_v61 = vpop.f32.mrf.mxu1 }
 0x17d   :  { %v5603_v61 = vld [vmem:[#allocation10 + $0xc4] ss:$16 sps:$4 sm:$0xff]  }
 0x17e   :  { %v1686_v62 = vpop.f32.mrf.mxu1 }
 0x17f   :  { %v5606_v62 = vld [vmem:[#allocation10 + $0xcc] ss:$16 sps:$4 sm:$0xff]  }
 0x197   :  { %v1640_v9 = vpop.f32.mrf.mxu0 }
 0x198   :  { %v1641_v11 = vadd.f32 %v1640_v9, %v1600_v8  ;;  %v5613_v8 = vld [vmem:[#allocation10 + $0x80] ss:$16 sps:$4 sm:$0xff]   ;;  %v5621_v9 = vld [vmem:[#allocation10 + $0x64] ss:$16 sps:$4 sm:$0xff]  }
 0x199   :  { %v1642_v12 = vpop.f32.mrf.mxu0 }
 0x19a   :  { %v1682_v13 = vadd.f32 %v1681_v57, %v1641_v11  ;;  %v1643_v14 = vadd.f32 %v1642_v12, %v1602_v10  ;;  %v5619_v10 = vld [vmem:[#allocation10 + $0x60] ss:$16 sps:$4 sm:$0xff]   ;;  %v5622_v11 = vld [vmem:[#allocation10 + $0x68] ss:$16 sps:$4 sm:$0xff]   ;;  %v5624_v12 = vld [vmem:[#allocation10 + $0x6c] ss:$16 sps:$4 sm:$0xff]  }
 0x19b   :  { %v1644_v17 = vpop.f32.mrf.mxu0 }
 0x19c   :  { %v1684_v18 = vadd.f32 %v1683_v58, %v1643_v14  ;;  %v1852_v19 = vmax.f32 %v1682_v13, 0.0  ;;  %v5627_v13 = vld [vmem:[#allocation10 + $0x44] ss:$16 sps:$4 sm:$0xff]   ;;  %v5630_v14 = vld [vmem:[#allocation10 + $0x4c] ss:$16 sps:$4 sm:$0xff]  }
 0x19d   :  { %v1645_v22 = vpop.f32.mrf.mxu0  ;;  %v5625_v17 = vld [vmem:[#allocation10 + $0x40] ss:$16 sps:$4 sm:$0xff]  }
 0x19e   :  { %v1853_v25 = vmax.f32 %v1684_v18, 0.0  ;;  %v1856_v27 = vpack.c.bf16 %v1852_v19, %v1852_v19  ;;  %v5628_v18 = vld [vmem:[#allocation10 + $0x48] ss:$16 sps:$4 sm:$0xff]   ;;  %v5633_v19 = vld [vmem:[#allocation10 + $0x24] ss:$16 sps:$4 sm:$0xff]  }
 0x19f   :  { %v5636_v22 = vld [vmem:[#allocation10 + $0x2c] ss:$16 sps:$4 sm:$0xff]  }
 0x1a0   :  { %v1857_v26 = vpack.c.bf16 %v1853_v25, %v1853_v25  ;;  %v5631_v25 = vld [vmem:[#allocation10 + $0x20] ss:$16 sps:$4 sm:$0xff]  }
 0x1a2   :  { %2288 = vmatprep.mubr.bf16.mxu0 %v1857_v26  ;;  %v5634_v26 = vld [vmem:[#allocation10 + $0x28] ss:$16 sps:$4 sm:$0xff]  }
 0x1a3   :  { %2289 = vmatmul.mubr.bf16.vlgmr.msra.gmra.mxu0 %v1856_v27  ;;  %v5639_v27 = vld [vmem:[#allocation10 + $0x4] ss:$16 sps:$4 sm:$0xff]  }
 0x1a4   :  { %2594 = vmatprep.mubr.bf16.mxu0 %v6199_v16  ;;  %2563 = vmatpush1.bf16.msra.mxu0 %v5595_v32 }
 0x1a5   :  { %2564 = vmatprep.subr.bf16.mxu0 %v5603_v61  ;;  %v5657_v61 = vld [vmem:[#allocation13 + $0x11c] ss:$28 sps:$4 sm:$0xff]  }
 0x1a8   :  { %2565 = vmatpush1.bf16.msra.mxu0 %v5601_v47  ;;  %v5655_v47 = vld [vmem:[#allocation13 + $0x118] ss:$28 sps:$4 sm:$0xff]  }
 0x1a9   :  { %2566 = vmatprep.subr.bf16.mxu0 %v5609_v63  ;;  %v5663_v63 = vld [vmem:[#allocation13 + $0xe4] ss:$28 sps:$4 sm:$0xff]  }
 0x1ac   :  { %2567 = vmatpush1.bf16.msra.mxu0 %v5607_v3  ;;  %v5661_v3 = vld [vmem:[#allocation13 + $0xe0] ss:$28 sps:$4 sm:$0xff]  }
 0x1ad   :  { %2568 = vmatprep.subr.bf16.mxu0 %v5615_v35  ;;  %v5669_v35 = vld [vmem:[#allocation13 + $0xac] ss:$28 sps:$4 sm:$0xff]  }
 0x1b0   :  { %2569 = vmatpush1.bf16.msra.mxu0 %v5613_v8  ;;  %v5667_v8 = vld [vmem:[#allocation13 + $0xa8] ss:$28 sps:$4 sm:$0xff]  }
 0x1b1   :  { %2570 = vmatprep.subr.bf16.mxu0 %v5621_v9  ;;  %v5675_v9 = vld [vmem:[#allocation13 + $0x74] ss:$28 sps:$4 sm:$0xff]  }
 0x1b4   :  { %2571 = vmatpush1.bf16.msra.mxu0 %v5619_v10  ;;  %v5678_v10 = vld [vmem:[#allocation13 + $0x3f4] ss:$28 sps:$4 sm:$0xff]  }
 0x1b5   :  { %2572 = vmatprep.subr.bf16.mxu0 %v5627_v13  ;;  %v5681_v13 = vld [vmem:[#allocation13 + $0x3c] ss:$28 sps:$4 sm:$0xff]  }
 0x1b8   :  { %v1722_v20 = vpop.f32.mrf.mxu1  ;;  %2573 = vmatpush1.bf16.msra.mxu0 %v5625_v17  ;;  %v5679_v17 = vld [vmem:[#allocation13 + $0x38] ss:$28 sps:$4 sm:$0xff]  }
 0x1b9   :  { %v1723_v38 = vadd.f32 %v1722_v20, %v370_v36  ;;  %2574 = vmatprep.subr.bf16.mxu0 %v5633_v19  ;;  %v5642_v20 = vld [vmem:[#allocation10 + $0xc] ss:$16 sps:$4 sm:$0xff]   ;;  %v1933_v36 = vrot.slane %v1924_v33, %v6332_v2  ;;  %v5687_v19 = vld [vmem:[#allocation13 + $0x4] ss:$28 sps:$4 sm:$0xff]  }
 0x1ba   :  { %v1724_v21 = vpop.f32.mrf.mxu1  ;;  %v5703_v33 = vld [vmem:[#allocation13 + $0x2d8] ss:$28 sps:$4 sm:$0xff]  }
 0x1bb   :  { %v1725_v39 = vadd.f32 %v1724_v21, %v374_v37  ;;  %v5637_v21 = vld [vmem:[#allocation10] ss:$16 sps:$4 sm:$0xff]  }
 0x1bc   :  { %v1726_v23 = vpop.f32.mrf.mxu1  ;;  %2575 = vmatpush1.bf16.msra.mxu0 %v5631_v25  ;;  %v5685_v25 = vld [vmem:[#allocation13] ss:$28 sps:$4 sm:$0xff]  }
 0x1bd   :  { %v5640_v23 = vld [vmem:[#allocation10 + $0x8] ss:$16 sps:$4 sm:$0xff]   ;;  %2576 = vmatprep.subr.bf16.mxu0 %v5639_v27  ;;  %v5693_v27 = vld [vmem:[#allocation13 + $0x34c] ss:$28 sps:$4 sm:$0xff]  }
 0x1be   :  { %v1727_v28 = vpop.f32.mrf.mxu1 }
 0x1bf   :  { %v5645_v28 = vld [vmem:[#allocation13 + $0x18c] ss:$28 sps:$4 sm:$0xff]  }
 0x1c0   :  { %2577 = vmatpush1.bf16.msra.mxu0 %v5637_v21  ;;  %v5691_v21 = vld [vmem:[#allocation13 + $0x348] ss:$28 sps:$4 sm:$0xff]  }
 0x1c1   :  { %4097 = vmatprep.subr.bf16.mxu0 %v5645_v28  ;;  %v5699_v28 = vld [vmem:[#allocation13 + $0x314] ss:$28 sps:$4 sm:$0xff]  }
 0x1d7   :  { %v1763_v24 = vpop.f32.mrf.mxu0 }
 0x1d8   :  { %v1764_v40 = vadd.f32 %v1763_v24, %v1723_v38  ;;  %v5648_v24 = vld [vmem:[#allocation13 + $0x50c] ss:$28 sps:$4 sm:$0xff]  }
 0x1d9   :  { %v1765_v29 = vpop.f32.mrf.mxu0 }
 0x1da   :  { %v1766_v43 = vadd.f32 %v1765_v29, %v1725_v39 }
 0x1db   :  { %v1767_v30 = vpop.f32.mrf.mxu0 }
 0x1dd   :  { %v1768_v31 = vpop.f32.mrf.mxu0 }
 0x1f7   :  { %v1845_v42 = vpop.f32.mrf.mxu0 }
 0x1f8   :  { %v1804_v41 = vpop.f32.mrf.mxu1 }
 0x1f9   :  { %v1805_v44 = vadd.f32 %v1804_v41, %v1764_v40  ;;  %v1847_v46 = vpop.f32.mrf.mxu0 }
 0x1fa   :  { %v1806_v45 = vpop.f32.mrf.mxu1 }
 0x1fb   :  { %v1846_v48 = vadd.f32 %v1845_v42, %v1805_v44  ;;  %v1807_v49 = vadd.f32 %v1806_v45, %v1766_v43  ;;  %v1849_v52 = vpop.f32.mrf.mxu0 }
 0x1fc   :  { %v1808_v50 = vpop.f32.mrf.mxu1 }
 0x1fd   :  { %v1848_v53 = vadd.f32 %v1847_v46, %v1807_v49  ;;  %v1854_v54 = vmax.f32 %v1846_v48, 0.0  ;;  %v1850_v56 = vpop.f32.mrf.mxu0  ;;  %v2340_v48 = vld [vmem:[#allocation5] sm:$0xf] }
 0x1fe   :  { %v1809_v55 = vpop.f32.mrf.mxu1  ;;  %v2341_v49 = vunpack.c.l.bf16 %v2340_v48  ;;  %v5724_v48 = vld [vmem:[#allocation13 + $0x5b0] ss:$28 sps:$4 sm:$0xff]  }
 0x1ff   :  { %v1855_v57 = vmax.f32 %v1848_v53, 0.0  ;;  %v1858_v60 = vpack.c.bf16 %v1854_v54, %v1854_v54  ;;  %v5643_v54 = vld [vmem:[#allocation13 + $0x188] ss:$28 sps:$4 sm:$0xff]  }
 0x200   :  { %v5646_v55 = vld [vmem:[#allocation13 + $0x508] ss:$28 sps:$4 sm:$0xff]  }
 0x201   :  { %v1859_v58 = vpack.c.bf16 %v1855_v57, %v1855_v57  ;;  %v5651_v57 = vld [vmem:[#allocation13 + $0x154] ss:$28 sps:$4 sm:$0xff]  }
 0x203   :  { %2329 = vmatprep.mubr.bf16.mxu1 %v1859_v58  ;;  %v5654_v58 = vld [vmem:[#allocation13 + $0x4d4] ss:$28 sps:$4 sm:$0xff]  }
 0x204   :  { %2330 = vmatmul.mubr.bf16.vlgmr.msra.gmra.mxu1 %v1858_v60  ;;  %v5652_v60 = vld [vmem:[#allocation13 + $0x4d0] ss:$28 sps:$4 sm:$0xff]  }
 0x205   :  { %2604 = vmatpush1.bf16.msra.mxu1 %v5598_v59  ;;  %2635 = vmatprep.mubr.bf16.mxu1 %v6199_v16  ;;  %v5616_v16 = vld [vmem:[#allocation10 + $0x88] ss:$16 sps:$4 sm:$0xff]   ;;  %v5649_v59 = vld [vmem:[#allocation13 + $0x150] ss:$28 sps:$4 sm:$0xff]  }
 0x206   :  { %2605 = vmatprep.subr.bf16.mxu1 %v5606_v62  ;;  %v5660_v62 = vld [vmem:[#allocation13 + $0x49c] ss:$28 sps:$4 sm:$0xff]  }
 0x209   :  { %2606 = vmatpush1.bf16.msra.mxu1 %v5604_v6  ;;  %v5658_v6 = vld [vmem:[#allocation13 + $0x498] ss:$28 sps:$4 sm:$0xff]  }
 0x20a   :  { %2607 = vmatprep.subr.bf16.mxu1 %v5612_v1  ;;  %v5666_v1 = vld [vmem:[#allocation13 + $0x464] ss:$28 sps:$4 sm:$0xff]  }
 0x20d   :  { %2608 = vmatpush1.bf16.msra.mxu1 %v5610_v4  ;;  %v5664_v4 = vld [vmem:[#allocation13 + $0x460] ss:$28 sps:$4 sm:$0xff]  }
 0x20e   :  { %2609 = vmatprep.subr.bf16.mxu1 %v5618_v5  ;;  %v5672_v5 = vld [vmem:[#allocation13 + $0x42c] ss:$28 sps:$4 sm:$0xff]  }
 0x211   :  { %2610 = vmatpush1.bf16.msra.mxu1 %v5616_v16  ;;  %v5670_v16 = vld [vmem:[#allocation13 + $0x428] ss:$28 sps:$4 sm:$0xff]  }
 0x212   :  { %2611 = vmatprep.subr.bf16.mxu1 %v5624_v12  ;;  %v5676_v12 = vld [vmem:[#allocation13 + $0x3f0] ss:$28 sps:$4 sm:$0xff]  }
 0x215   :  { %2612 = vmatpush1.bf16.msra.mxu1 %v5622_v11  ;;  %v5673_v11 = vld [vmem:[#allocation13 + $0x70] ss:$28 sps:$4 sm:$0xff]  }
 0x216   :  { %2613 = vmatprep.subr.bf16.mxu1 %v5630_v14  ;;  %v5684_v14 = vld [vmem:[#allocation13 + $0x3bc] ss:$28 sps:$4 sm:$0xff]  }
 0x219   :  { %2614 = vmatpush1.bf16.msra.mxu1 %v5628_v18  ;;  %v5682_v18 = vld [vmem:[#allocation13 + $0x3b8] ss:$28 sps:$4 sm:$0xff]  }
 0x21a   :  { %2615 = vmatprep.subr.bf16.mxu1 %v5636_v22  ;;  %v5690_v22 = vld [vmem:[#allocation13 + $0x384] ss:$28 sps:$4 sm:$0xff]  }
 0x21d   :  { %2616 = vmatpush1.bf16.msra.mxu1 %v5634_v26  ;;  %v5688_v26 = vld [vmem:[#allocation13 + $0x380] ss:$28 sps:$4 sm:$0xff]  }
 0x21e   :  { %2617 = vmatprep.subr.bf16.mxu1 %v5642_v20  ;;  %v5696_v20 = vld [vmem:[#allocation13 + $0x6cc] ss:$28 sps:$4 sm:$0xff]  }
 0x221   :  { %2618 = vmatpush1.bf16.msra.mxu1 %v5640_v23  ;;  %v5694_v23 = vld [vmem:[#allocation13 + $0x6c8] ss:$28 sps:$4 sm:$0xff]  }
 0x222   :  { %4138 = vmatprep.subr.bf16.mxu1 %v5648_v24  ;;  %v5702_v24 = vld [vmem:[#allocation13 + $0x694] ss:$28 sps:$4 sm:$0xff]  }
 0x263   :  { %v2290_v29 = vpop.f32.mrf.mxu0 }
 0x264   :  { %v2291_v37 = vadd.f32 %v2290_v29, %v1929_v51  ;;  %v5697_v29 = vld [vmem:[#allocation13 + $0x310] ss:$28 sps:$4 sm:$0xff]   ;;  %v5706_v51 = vld [vmem:[#allocation13 + $0x658] ss:$28 sps:$4 sm:$0xff]  }
 0x265   :  { %v2292_v30 = vpop.f32.mrf.mxu0 }
 0x266   :  { %v2293_v39 = vadd.f32 %v2292_v30, %v1933_v36  ;;  %v5700_v30 = vld [vmem:[#allocation13 + $0x690] ss:$28 sps:$4 sm:$0xff]   ;;  %v5711_v36 = vld [vmem:[#allocation13 + $0x2a4] ss:$28 sps:$4 sm:$0xff]  }
 0x267   :  { %v2294_v31 = vpop.f32.mrf.mxu0 }
 0x268   :  { %v5705_v31 = vld [vmem:[#allocation13 + $0x2dc] ss:$28 sps:$4 sm:$0xff]  }
 0x269   :  { %v2295_v32 = vpop.f32.mrf.mxu0 }
 0x26a   :  { %v5708_v32 = vld [vmem:[#allocation13 + $0x65c] ss:$28 sps:$4 sm:$0xff]  }
 0x2c4   :  { %v2331_v38 = vpop.f32.mrf.mxu1 }
 0x2c5   :  { %v2332_v40 = vadd.f32 %v2331_v38, %v2291_v37  ;;  %v5714_v37 = vld [vmem:[#allocation13 + $0x624] ss:$28 sps:$4 sm:$0xff]  }
 0x2c6   :  { %v2333_v41 = vpop.f32.mrf.mxu1  ;;  %v5709_v38 = vld [vmem:[#allocation13 + $0x2a0] ss:$28 sps:$4 sm:$0xff]  }
 0x2c7   :  { %2338 = vst [vmem:[#allocation14] sm:$0xff] %v2332_v40  ;;  %v2334_v42 = vadd.f32 %v2333_v41, %v2293_v39  ;;  %v5712_v39 = vld [vmem:[#allocation13 + $0x620] ss:$28 sps:$4 sm:$0xff]   ;;  %v5720_v41 = vld [vmem:[#allocation13 + $0x5ec] ss:$28 sps:$4 sm:$0xff]  }
 0x2c8   :  { %v2335_v43 = vpop.f32.mrf.mxu1 }
 0x2c9   :  { %2339 = vst [vmem:[#allocation14 + $0x8] sm:$0xff] %v2334_v42  ;;  %v2342_v44 = vmul.f32 0.5, %v2334_v42  ;;  %v5715_v42 = vld [vmem:[#allocation13 + $0x268] ss:$28 sps:$4 sm:$0xff]  }
 0x2ca   :  { %v2336_v45 = vpop.f32.mrf.mxu1  ;;  %v5718_v43 = vld [vmem:[#allocation13 + $0x5e8] ss:$28 sps:$4 sm:$0xff]  }
 0x2cb   :  { %v2343_v46 = vmul.f32 1.442695, %v2342_v44  ;;  %v5723_v44 = vld [vmem:[#allocation13 + $0x234] ss:$28 sps:$4 sm:$0xff]  }
 0x2cc   :  { %v5726_v45 = vld [vmem:[#allocation13 + $0x5b4] ss:$28 sps:$4 sm:$0xff]  }
 0x2cd   :  { %5963 = vpow2.f32 %v2343_v46  ;;  %v5721_v46 = vld [vmem:[#allocation13 + $0x230] ss:$28 sps:$4 sm:$0xff]  }
 0x2da   :  { %v5964_v50 = vpop.eup %5963 }
 0x2db   :  { %v2345_v52 = vmul.f32 %v5964_v50, %v2341_v49  ;;  %v5729_v49 = vld [vmem:[#allocation13 + $0x1fc] ss:$28 sps:$4 sm:$0xff]  }
 0x2dc   :  { %v5732_v50 = vld [vmem:[#allocation13 + $0x57c] ss:$28 sps:$4 sm:$0xff]  }
 0x2dd   :  { %v2346_v53 = vadd.f32 %v2345_v52, %v2332_v40  ;;  %v5717_v40 = vld [vmem:[#allocation13 + $0x26c] ss:$28 sps:$4 sm:$0xff]   ;;  %v5727_v52 = vld [vmem:[#allocation13 + $0x1f8] ss:$28 sps:$4 sm:$0xff]  }
 0x2df   :  { %v2347_v56 = vpack.c.bf16 %v2346_v53, %v2346_v53  ;;  %v5730_v53 = vld [vmem:[#allocation13 + $0x578] ss:$28 sps:$4 sm:$0xff]  }
 0x2e1   :  { %2595 = vmatmul.mubr.bf16.vlgmr.msra.gmra.mxu0 %v2347_v56  ;;  %2636 = vmatmul.mubr.bf16.vlgmr.msra.gmra.mxu1 %v2347_v56  ;;  %v5733_v56 = vld [vmem:[#allocation13 + $0x1c0] ss:$28 sps:$4 sm:$0xff]  }
 0x2e2   :  { %4098 = vmatpush1.bf16.msra.mxu0 %v5643_v54  ;;  %4139 = vmatpush1.bf16.msra.mxu1 %v5646_v55  ;;  %v5735_v54 = vld [vmem:[#allocation13 + $0x1c4] ss:$28 sps:$4 sm:$0xff]  }
 0x2e3   :  { %4099 = vmatprep.subr.bf16.mxu0 %v5651_v57  ;;  %4140 = vmatprep.subr.bf16.mxu1 %v5654_v58  ;;  %v5738_v55 = vld [vmem:[#allocation13 + $0x544] ss:$28 sps:$4 sm:$0xff]   ;;  %v5741_v58 = vld [vmem:[#allocation13 + $0x194] ss:$28 sps:$4 sm:$0xff]  }
 0x2e4   :  { %v5736_v57 = vld [vmem:[#allocation13 + $0x540] ss:$28 sps:$4 sm:$0xff]  }
 0x2e6   :  { %4100 = vmatpush1.bf16.msra.mxu0 %v5649_v59  ;;  %4141 = vmatpush1.bf16.msra.mxu1 %v5652_v60  ;;  %v5744_v59 = vld [vmem:[#allocation13 + $0x514] ss:$28 sps:$4 sm:$0xff]   ;;  %v2380_v60 = vld [vmem:[#allocation11] sm:$0xf] }
 0x2e7   :  { %4101 = vmatprep.subr.bf16.mxu0 %v5657_v61  ;;  %4142 = vmatprep.subr.bf16.mxu1 %v5660_v62  ;;  %v2385_v61 = vrot.slane %v2380_v60, %v6326_v0  ;;  %v2393_v62 = vrot.slane %v2380_v60, %v6342_v7 }
 0x2ea   :  { %4102 = vmatpush1.bf16.msra.mxu0 %v5655_v47  ;;  %4143 = vmatpush1.bf16.msra.mxu1 %v5658_v6  ;;  %v2389_v47 = vrot.slane %v2380_v60, %v6332_v2  ;;  %v2397_v6 = vrot.slane %v2380_v60, %v6345_v34  ;;  %v5795_v60 = vld [vmem:[#allocation13 + $0x31c] ss:$28 sps:$4 sm:$0xff]  }
 0x2eb   :  { %4103 = vmatprep.subr.bf16.mxu0 %v5663_v63  ;;  %4144 = vmatprep.subr.bf16.mxu1 %v5666_v1 }
 0x2ee   :  { %4104 = vmatpush1.bf16.msra.mxu0 %v5661_v3  ;;  %4145 = vmatpush1.bf16.msra.mxu1 %v5664_v4 }
 0x2ef   :  { %4105 = vmatprep.subr.bf16.mxu0 %v5669_v35  ;;  %4146 = vmatprep.subr.bf16.mxu1 %v5672_v5 }
 0x2f2   :  { %4106 = vmatpush1.bf16.msra.mxu0 %v5667_v8  ;;  %4147 = vmatpush1.bf16.msra.mxu1 %v5670_v16 }
 0x2f3   :  { %4107 = vmatprep.subr.bf16.mxu0 %v5675_v9  ;;  %4148 = vmatprep.subr.bf16.mxu1 %v5678_v10 }
 0x2f6   :  { %4108 = vmatpush1.bf16.msra.mxu0 %v5673_v11  ;;  %4149 = vmatpush1.bf16.msra.mxu1 %v5676_v12 }
 0x2f7   :  { %4109 = vmatprep.subr.bf16.mxu0 %v5681_v13  ;;  %4150 = vmatprep.subr.bf16.mxu1 %v5684_v14 }
 0x2fa   :  { %4110 = vmatpush1.bf16.msra.mxu0 %v5679_v17  ;;  %4151 = vmatpush1.bf16.msra.mxu1 %v5682_v18 }
 0x2fb   :  { %4111 = vmatprep.subr.bf16.mxu0 %v5687_v19  ;;  %4152 = vmatprep.subr.bf16.mxu1 %v5690_v22 }
 0x2fe   :  { %4112 = vmatpush1.bf16.msra.mxu0 %v5685_v25  ;;  %4153 = vmatpush1.bf16.msra.mxu1 %v5688_v26  ;;  %v5739_v25 = vld [vmem:[#allocation13 + $0x190] ss:$28 sps:$4 sm:$0xff]  }
 0x2ff   :  { %4113 = vmatprep.subr.bf16.mxu0 %v5693_v27  ;;  %4154 = vmatprep.subr.bf16.mxu1 %v5696_v20  ;;  %v5742_v26 = vld [vmem:[#allocation13 + $0x510] ss:$28 sps:$4 sm:$0xff]  }
 0x302   :  { %4114 = vmatpush2.bf16.msra.mxu0 %v5691_v21  ;;  %4155 = vmatpush2.bf16.msra.mxu1 %v5694_v23  ;;  %v5747_v21 = vld [vmem:[#allocation13 + $0x15c] ss:$28 sps:$4 sm:$0xff]  }
 0x303   :  { %4115 = vmatprep.subr.bf16.mxu0 %v5699_v28  ;;  %4156 = vmatprep.subr.bf16.mxu1 %v5702_v24  ;;  %v5750_v23 = vld [vmem:[#allocation13 + $0x4dc] ss:$28 sps:$4 sm:$0xff]  }
 0x304   :  { %v5745_v28 = vld [vmem:[#allocation13 + $0x158] ss:$28 sps:$4 sm:$0xff]  }
 0x305   :  { %v5748_v24 = vld [vmem:[#allocation13 + $0x4d8] ss:$28 sps:$4 sm:$0xff]  }
 0x306   :  { %4116 = vmatpush2.bf16.msra.mxu0 %v5697_v29  ;;  %4157 = vmatpush2.bf16.msra.mxu1 %v5700_v30  ;;  %v5753_v29 = vld [vmem:[#allocation13 + $0x124] ss:$28 sps:$4 sm:$0xff]  }
 0x307   :  { %4117 = vmatprep.subr.bf16.mxu0 %v5705_v31  ;;  %4158 = vmatprep.subr.bf16.mxu1 %v5708_v32  ;;  %v5756_v30 = vld [vmem:[#allocation13 + $0x4a4] ss:$28 sps:$4 sm:$0xff]  }
 0x308   :  { %v5751_v31 = vld [vmem:[#allocation13 + $0x120] ss:$28 sps:$4 sm:$0xff]  }
 0x309   :  { %v5754_v32 = vld [vmem:[#allocation13 + $0x4a0] ss:$28 sps:$4 sm:$0xff]  }
 0x30a   :  { %4118 = vmatpush2.bf16.msra.mxu0 %v5703_v33  ;;  %4159 = vmatpush2.bf16.msra.mxu1 %v5706_v51  ;;  %v5759_v33 = vld [vmem:[#allocation13 + $0xec] ss:$28 sps:$4 sm:$0xff]  }
 0x30b   :  { %4119 = vmatprep.subr.bf16.mxu0 %v5711_v36  ;;  %4160 = vmatprep.subr.bf16.mxu1 %v5714_v37  ;;  %v5762_v51 = vld [vmem:[#allocation13 + $0x46c] ss:$28 sps:$4 sm:$0xff]  }
 0x30c   :  { %v5757_v36 = vld [vmem:[#allocation13 + $0xe8] ss:$28 sps:$4 sm:$0xff]  }
 0x30d   :  { %v5760_v37 = vld [vmem:[#allocation13 + $0x468] ss:$28 sps:$4 sm:$0xff]  }
 0x30e   :  { %4120 = vmatpush2.bf16.msra.mxu0 %v5709_v38  ;;  %4161 = vmatpush2.bf16.msra.mxu1 %v5712_v39  ;;  %v5765_v38 = vld [vmem:[#allocation13 + $0xb4] ss:$28 sps:$4 sm:$0xff]  }
 0x30f   :  { %4121 = vmatprep.subr.bf16.mxu0 %v5717_v40  ;;  %4162 = vmatprep.subr.bf16.mxu1 %v5720_v41  ;;  %v5768_v39 = vld [vmem:[#allocation13 + $0x434] ss:$28 sps:$4 sm:$0xff]  }
 0x310   :  { %v5763_v40 = vld [vmem:[#allocation13 + $0xb0] ss:$28 sps:$4 sm:$0xff]  }
 0x311   :  { %v5766_v41 = vld [vmem:[#allocation13 + $0x430] ss:$28 sps:$4 sm:$0xff]  }
 0x312   :  { %4122 = vmatpush2.bf16.msra.mxu0 %v5715_v42  ;;  %4163 = vmatpush2.bf16.msra.mxu1 %v5718_v43  ;;  %v5771_v42 = vld [vmem:[#allocation13 + $0x7c] ss:$28 sps:$4 sm:$0xff]  }
 0x313   :  { %4123 = vmatprep.subr.bf16.mxu0 %v5723_v44  ;;  %4164 = vmatprep.subr.bf16.mxu1 %v5726_v45  ;;  %v5774_v43 = vld [vmem:[#allocation13 + $0x3fc] ss:$28 sps:$4 sm:$0xff]  }
 0x314   :  { %v5769_v44 = vld [vmem:[#allocation13 + $0x78] ss:$28 sps:$4 sm:$0xff]  }
 0x315   :  { %v5772_v45 = vld [vmem:[#allocation13 + $0x3f8] ss:$28 sps:$4 sm:$0xff]  }
 0x316   :  { %4124 = vmatpush2.bf16.msra.mxu0 %v5721_v46  ;;  %4165 = vmatpush2.bf16.msra.mxu1 %v5724_v48  ;;  %v5777_v46 = vld [vmem:[#allocation13 + $0x44] ss:$28 sps:$4 sm:$0xff]  }
 0x317   :  { %4125 = vmatprep.subr.bf16.mxu0 %v5729_v49  ;;  %4166 = vmatprep.subr.bf16.mxu1 %v5732_v50  ;;  %v5780_v48 = vld [vmem:[#allocation13 + $0x3c4] ss:$28 sps:$4 sm:$0xff]  }
 0x318   :  { %v5775_v49 = vld [vmem:[#allocation13 + $0x40] ss:$28 sps:$4 sm:$0xff]  }
 0x319   :  { %v5778_v50 = vld [vmem:[#allocation13 + $0x3c0] ss:$28 sps:$4 sm:$0xff]  }
 0x31a   :  { %4126 = vmatpush2.bf16.msra.mxu0 %v5727_v52  ;;  %4167 = vmatpush2.bf16.msra.mxu1 %v5730_v53  ;;  %v5783_v52 = vld [vmem:[#allocation13 + $0xc] ss:$28 sps:$4 sm:$0xff]  }
 0x31b   :  { %4127 = vmatprep.subr.bf16.mxu0 %v5735_v54  ;;  %4168 = vmatprep.subr.bf16.mxu1 %v5738_v55  ;;  %v5786_v53 = vld [vmem:[#allocation13 + $0x38c] ss:$28 sps:$4 sm:$0xff]  }
 0x31c   :  { %v5781_v54 = vld [vmem:[#allocation13 + $0x8] ss:$28 sps:$4 sm:$0xff]  }
 0x31d   :  { %v5784_v55 = vld [vmem:[#allocation13 + $0x388] ss:$28 sps:$4 sm:$0xff]  }
 0x31e   :  { %4128 = vmatpush2.bf16.msra.mxu0 %v5733_v56  ;;  %4169 = vmatpush2.bf16.msra.mxu1 %v5736_v57  ;;  %v5789_v56 = vld [vmem:[#allocation13 + $0x354] ss:$28 sps:$4 sm:$0xff]  }
 0x31f   :  { %4179 = vmatprep.subr.bf16.mxu0 %v5741_v58  ;;  %4220 = vmatprep.subr.bf16.mxu1 %v5744_v59  ;;  %v5792_v57 = vld [vmem:[#allocation13 + $0x6d4] ss:$28 sps:$4 sm:$0xff]  }
 0x320   :  { %v5787_v58 = vld [vmem:[#allocation13 + $0x350] ss:$28 sps:$4 sm:$0xff]  }
 0x321   :  { %v5790_v59 = vld [vmem:[#allocation13 + $0x6d0] ss:$28 sps:$4 sm:$0xff]  }
 0x3a1   :  { %v2596_v63 = vpop.f32.mrf.mxu0  ;;  %v2637_v1 = vpop.f32.mrf.mxu1 }
 0x3a2   :  { %v2597_v3 = vadd.f32 %v2596_v63, %v2385_v61  ;;  %v2638_v4 = vadd.f32 %v2637_v1, %v2393_v62  ;;  %v5798_v61 = vld [vmem:[#allocation13 + $0x69c] ss:$28 sps:$4 sm:$0xff]   ;;  %v5804_v63 = vld [vmem:[#allocation13 + $0x664] ss:$28 sps:$4 sm:$0xff]  }
 0x3a3   :  { %v2598_v35 = vpop.f32.mrf.mxu0  ;;  %v2639_v5 = vpop.f32.mrf.mxu1  ;;  %v5793_v62 = vld [vmem:[#allocation13 + $0x318] ss:$28 sps:$4 sm:$0xff]   ;;  %v5799_v1 = vld [vmem:[#allocation13 + $0x2e0] ss:$28 sps:$4 sm:$0xff]  }
 0x3a4   :  { %v2599_v8 = vadd.f32 %v2598_v35, %v2389_v47  ;;  %v2640_v16 = vadd.f32 %v2639_v5, %v2397_v6  ;;  %v2644_v9 = vmax.f32 %v2597_v3, 0.0  ;;  %v2646_v10 = vmax.f32 %v2638_v4, 0.0  ;;  %v5796_v47 = vld [vmem:[#allocation13 + $0x698] ss:$28 sps:$4 sm:$0xff]   ;;  %v5801_v6 = vld [vmem:[#allocation13 + $0x2e4] ss:$28 sps:$4 sm:$0xff]  }
 0x3a5   :  { %v2600_v11 = vpop.f32.mrf.mxu0  ;;  %v2641_v12 = vpop.f32.mrf.mxu1  ;;  %v5802_v3 = vld [vmem:[#allocation13 + $0x660] ss:$28 sps:$4 sm:$0xff]   ;;  %v5807_v4 = vld [vmem:[#allocation13 + $0x2ac] ss:$28 sps:$4 sm:$0xff]  }
 0x3a6   :  { %v2645_v13 = vmax.f32 %v2599_v8, 0.0  ;;  %v2647_v14 = vmax.f32 %v2640_v16, 0.0  ;;  %v6363_v27 = vpack.c.bf16 %v2644_v9, %v2644_v9  ;;  %v6365_v20 = vpack.c.bf16 %v2646_v10, %v2646_v10  ;;  %v5810_v35 = vld [vmem:[#allocation13 + $0x62c] ss:$28 sps:$4 sm:$0xff]   ;;  %v5813_v16 = vld [vmem:[#allocation13 + $0x274] ss:$28 sps:$4 sm:$0xff]  }
 0x3a7   :  { %v2601_v17 = vpop.f32.mrf.mxu0  ;;  %v2642_v18 = vpop.f32.mrf.mxu1  ;;  %v5805_v5 = vld [vmem:[#allocation13 + $0x2a8] ss:$28 sps:$4 sm:$0xff]   ;;  %v5816_v9 = vld [vmem:[#allocation13 + $0x5f4] ss:$28 sps:$4 sm:$0xff]   ;;  %v5819_v12 = vld [vmem:[#allocation13 + $0x23c] ss:$28 sps:$4 sm:$0xff]  }
 0x3a8   :  { %v6359_v19 = vpack.c.bf16 %v2645_v13, %v2645_v13  ;;  %v6361_v22 = vpack.c.bf16 %v2647_v14, %v2647_v14  ;;  %v5808_v8 = vld [vmem:[#allocation13 + $0x628] ss:$28 sps:$4 sm:$0xff]   ;;  %v5811_v10 = vld [vmem:[#allocation13 + $0x270] ss:$28 sps:$4 sm:$0xff]   ;;  %v5822_v13 = vld [vmem:[#allocation13 + $0x5bc] ss:$28 sps:$4 sm:$0xff]  }
 0x3a9   :  { %v5814_v11 = vld [vmem:[#allocation13 + $0x5f0] ss:$28 sps:$4 sm:$0xff]   ;;  %v5817_v14 = vld [vmem:[#allocation13 + $0x238] ss:$28 sps:$4 sm:$0xff]   ;;  %v5825_v18 = vld [vmem:[#allocation13 + $0x204] ss:$28 sps:$4 sm:$0xff]  }
 0x3aa   :  { %4129 = vmatprep.mubr.bf16.mxu0 %v6359_v19  ;;  %4170 = vmatprep.mubr.bf16.mxu1 %v6361_v22  ;;  %v5820_v17 = vld [vmem:[#allocation13 + $0x5b8] ss:$28 sps:$4 sm:$0xff]  }
 0x3ab   :  { %4130 = vmatmul.mubr.bf16.vlgmr.msra.gmra.mxu0 %v6363_v27  ;;  %4171 = vmatmul.mubr.bf16.vlgmr.msra.gmra.mxu1 %v6365_v20 }
 0x3ac   :  { %4180 = vmatpush1.bf16.msra.mxu0 %v5739_v25  ;;  %4221 = vmatpush1.bf16.msra.mxu1 %v5742_v26  ;;  %v5828_v25 = vld [vmem:[#allocation13 + $0x584] ss:$28 sps:$4 sm:$0xff]  }
 0x3ad   :  { %4211 = vmatprep.mubr.bf16.mxu0 %v6359_v19  ;;  %4252 = vmatprep.mubr.bf16.mxu1 %v6361_v22  ;;  %v5823_v26 = vld [vmem:[#allocation13 + $0x200] ss:$28 sps:$4 sm:$0xff]  }
 0x3ae   :  { %4181 = vmatprep.subr.bf16.mxu0 %v5747_v21  ;;  %4222 = vmatprep.subr.bf16.mxu1 %v5750_v23  ;;  %v5826_v21 = vld [vmem:[#allocation13 + $0x580] ss:$28 sps:$4 sm:$0xff]   ;;  %v5831_v23 = vld [vmem:[#allocation13 + $0x1cc] ss:$28 sps:$4 sm:$0xff]  }
 0x3b0   :  { %4182 = vmatpush1.bf16.msra.mxu0 %v5745_v28  ;;  %4223 = vmatpush1.bf16.msra.mxu1 %v5748_v24  ;;  %v5834_v28 = vld [vmem:[#allocation13 + $0x54c] ss:$28 sps:$4 sm:$0xff]  }
 0x3b1   :  { %4183 = vmatprep.subr.bf16.mxu0 %v5753_v29  ;;  %4224 = vmatprep.subr.bf16.mxu1 %v5756_v30  ;;  %v5829_v24 = vld [vmem:[#allocation13 + $0x1c8] ss:$28 sps:$4 sm:$0xff]   ;;  %v5837_v30 = vld [vmem:[#allocation13 + $0x19c] ss:$28 sps:$4 sm:$0xff]  }
 0x3b2   :  { %v5832_v29 = vld [vmem:[#allocation13 + $0x548] ss:$28 sps:$4 sm:$0xff]  }
 0x3b4   :  { %4184 = vmatpush1.bf16.msra.mxu0 %v5751_v31  ;;  %4225 = vmatpush1.bf16.msra.mxu1 %v5754_v32  ;;  %v5840_v31 = vld [vmem:[#allocation13 + $0x51c] ss:$28 sps:$4 sm:$0xff]  }
 0x3b5   :  { %4185 = vmatprep.subr.bf16.mxu0 %v5759_v33  ;;  %4226 = vmatprep.subr.bf16.mxu1 %v5762_v51  ;;  %v5835_v32 = vld [vmem:[#allocation13 + $0x198] ss:$28 sps:$4 sm:$0xff]   ;;  %v5843_v51 = vld [vmem:[#allocation13 + $0x164] ss:$28 sps:$4 sm:$0xff]  }
 0x3b6   :  { %v5838_v33 = vld [vmem:[#allocation13 + $0x518] ss:$28 sps:$4 sm:$0xff]  }
 0x3b8   :  { %4186 = vmatpush1.bf16.msra.mxu0 %v5757_v36  ;;  %4227 = vmatpush1.bf16.msra.mxu1 %v5760_v37  ;;  %v5846_v36 = vld [vmem:[#allocation13 + $0x4e4] ss:$28 sps:$4 sm:$0xff]  }
 0x3b9   :  { %4187 = vmatprep.subr.bf16.mxu0 %v5765_v38  ;;  %4228 = vmatprep.subr.bf16.mxu1 %v5768_v39  ;;  %v5841_v37 = vld [vmem:[#allocation13 + $0x160] ss:$28 sps:$4 sm:$0xff]   ;;  %v5849_v39 = vld [vmem:[#allocation13 + $0x12c] ss:$28 sps:$4 sm:$0xff]  }
 0x3ba   :  { %v5844_v38 = vld [vmem:[#allocation13 + $0x4e0] ss:$28 sps:$4 sm:$0xff]  }
 0x3bc   :  { %4188 = vmatpush1.bf16.msra.mxu0 %v5763_v40  ;;  %4229 = vmatpush1.bf16.msra.mxu1 %v5766_v41  ;;  %v5852_v40 = vld [vmem:[#allocation13 + $0x4ac] ss:$28 sps:$4 sm:$0xff]  }
 0x3bd   :  { %4189 = vmatprep.subr.bf16.mxu0 %v5771_v42  ;;  %4230 = vmatprep.subr.bf16.mxu1 %v5774_v43  ;;  %v5847_v41 = vld [vmem:[#allocation13 + $0x128] ss:$28 sps:$4 sm:$0xff]   ;;  %v5855_v43 = vld [vmem:[#allocation13 + $0xf4] ss:$28 sps:$4 sm:$0xff]  }
 0x3be   :  { %v5850_v42 = vld [vmem:[#allocation13 + $0x4a8] ss:$28 sps:$4 sm:$0xff]  }
 0x3c0   :  { %4190 = vmatpush1.bf16.msra.mxu0 %v5769_v44  ;;  %4231 = vmatpush1.bf16.msra.mxu1 %v5772_v45  ;;  %v5858_v44 = vld [vmem:[#allocation13 + $0x474] ss:$28 sps:$4 sm:$0xff]  }
 0x3c1   :  { %4191 = vmatprep.subr.bf16.mxu0 %v5777_v46  ;;  %4232 = vmatprep.subr.bf16.mxu1 %v5780_v48  ;;  %v5853_v45 = vld [vmem:[#allocation13 + $0xf0] ss:$28 sps:$4 sm:$0xff]   ;;  %v5861_v48 = vld [vmem:[#allocation13 + $0xbc] ss:$28 sps:$4 sm:$0xff]  }
 0x3c2   :  { %v5856_v46 = vld [vmem:[#allocation13 + $0x470] ss:$28 sps:$4 sm:$0xff]  }
 0x3c4   :  { %4192 = vmatpush1.bf16.msra.mxu0 %v5775_v49  ;;  %4233 = vmatpush1.bf16.msra.mxu1 %v5778_v50  ;;  %v5864_v49 = vld [vmem:[#allocation13 + $0x43c] ss:$28 sps:$4 sm:$0xff]  }
 0x3c5   :  { %4193 = vmatprep.subr.bf16.mxu0 %v5783_v52  ;;  %4234 = vmatprep.subr.bf16.mxu1 %v5786_v53  ;;  %v5859_v50 = vld [vmem:[#allocation13 + $0xb8] ss:$28 sps:$4 sm:$0xff]   ;;  %v5867_v53 = vld [vmem:[#allocation13 + $0x84] ss:$28 sps:$4 sm:$0xff]  }
 0x3c6   :  { %v5862_v52 = vld [vmem:[#allocation13 + $0x438] ss:$28 sps:$4 sm:$0xff]  }
 0x3c8   :  { %4194 = vmatpush1.bf16.msra.mxu0 %v5781_v54  ;;  %4235 = vmatpush1.bf16.msra.mxu1 %v5784_v55  ;;  %v5870_v54 = vld [vmem:[#allocation13 + $0x404] ss:$28 sps:$4 sm:$0xff]  }
 0x3c9   :  { %4195 = vmatprep.subr.bf16.mxu0 %v5789_v56  ;;  %4236 = vmatprep.subr.bf16.mxu1 %v5792_v57  ;;  %v5865_v55 = vld [vmem:[#allocation13 + $0x80] ss:$28 sps:$4 sm:$0xff]   ;;  %v5873_v57 = vld [vmem:[#allocation13 + $0x4c] ss:$28 sps:$4 sm:$0xff]  }
 0x3ca   :  { %v5868_v56 = vld [vmem:[#allocation13 + $0x400] ss:$28 sps:$4 sm:$0xff]  }
 0x3cc   :  { %4196 = vmatpush2.bf16.msra.mxu0 %v5787_v58  ;;  %4237 = vmatpush2.bf16.msra.mxu1 %v5790_v59  ;;  %v5876_v58 = vld [vmem:[#allocation13 + $0x3cc] ss:$28 sps:$4 sm:$0xff]  }
 0x3cd   :  { %4197 = vmatprep.subr.bf16.mxu0 %v5795_v60  ;;  %4238 = vmatprep.subr.bf16.mxu1 %v5798_v61  ;;  %v5871_v59 = vld [vmem:[#allocation13 + $0x48] ss:$28 sps:$4 sm:$0xff]   ;;  %v5879_v61 = vld [vmem:[#allocation13 + $0x14] ss:$28 sps:$4 sm:$0xff]  }
 0x3ce   :  { %v5874_v60 = vld [vmem:[#allocation13 + $0x3c8] ss:$28 sps:$4 sm:$0xff]  }
 0x3d0   :  { %4198 = vmatpush2.bf16.msra.mxu0 %v5793_v62  ;;  %4239 = vmatpush2.bf16.msra.mxu1 %v5796_v47  ;;  %v5882_v62 = vld [vmem:[#allocation13 + $0x394] ss:$28 sps:$4 sm:$0xff]  }
 0x3d1   :  { %4199 = vmatprep.subr.bf16.mxu0 %v5801_v6  ;;  %4240 = vmatprep.subr.bf16.mxu1 %v5804_v63  ;;  %v5877_v47 = vld [vmem:[#allocation13 + $0x10] ss:$28 sps:$4 sm:$0xff]   ;;  %v5885_v63 = vld [vmem:[#allocation13 + $0x35c] ss:$28 sps:$4 sm:$0xff]  }
 0x3d2   :  { %v5880_v6 = vld [vmem:[#allocation13 + $0x390] ss:$28 sps:$4 sm:$0xff]  }
 0x3d4   :  { %4200 = vmatpush2.bf16.msra.mxu0 %v5799_v1  ;;  %4241 = vmatpush2.bf16.msra.mxu1 %v5802_v3  ;;  %v5888_v1 = vld [vmem:[#allocation13 + $0x6dc] ss:$28 sps:$4 sm:$0xff]  }
 0x3d5   :  { %4201 = vmatprep.subr.bf16.mxu0 %v5807_v4  ;;  %4242 = vmatprep.subr.bf16.mxu1 %v5810_v35  ;;  %v5883_v3 = vld [vmem:[#allocation13 + $0x358] ss:$28 sps:$4 sm:$0xff]   ;;  %v5891_v35 = vld [vmem:[#allocation13 + $0x324] ss:$28 sps:$4 sm:$0xff]  }
 0x3d6   :  { %v5886_v4 = vld [vmem:[#allocation13 + $0x6d8] ss:$28 sps:$4 sm:$0xff]  }
 0x3d8   :  { %4202 = vmatpush2.bf16.msra.mxu0 %v5805_v5  ;;  %4243 = vmatpush2.bf16.msra.mxu1 %v5808_v8  ;;  %v5894_v5 = vld [vmem:[#allocation13 + $0x6a4] ss:$28 sps:$4 sm:$0xff]  }
 0x3d9   :  { %4203 = vmatprep.subr.bf16.mxu0 %v5813_v16  ;;  %4244 = vmatprep.subr.bf16.mxu1 %v5816_v9  ;;  %v5889_v8 = vld [vmem:[#allocation13 + $0x320] ss:$28 sps:$4 sm:$0xff]   ;;  %v5897_v9 = vld [vmem:[#allocation13 + $0x2ec] ss:$28 sps:$4 sm:$0xff]  }
 0x3da   :  { %v5892_v16 = vld [vmem:[#allocation13 + $0x6a0] ss:$28 sps:$4 sm:$0xff]  }
 0x3dc   :  { %4204 = vmatpush2.bf16.msra.mxu0 %v5811_v10  ;;  %4245 = vmatpush2.bf16.msra.mxu1 %v5814_v11  ;;  %v5900_v10 = vld [vmem:[#allocation13 + $0x66c] ss:$28 sps:$4 sm:$0xff]  }
 0x3dd   :  { %4205 = vmatprep.subr.bf16.mxu0 %v5819_v12  ;;  %4246 = vmatprep.subr.bf16.mxu1 %v5822_v13  ;;  %v5895_v11 = vld [vmem:[#allocation13 + $0x2e8] ss:$28 sps:$4 sm:$0xff]   ;;  %v5903_v13 = vld [vmem:[#allocation13 + $0x2b4] ss:$28 sps:$4 sm:$0xff]  }
 0x3de   :  { %v5898_v12 = vld [vmem:[#allocation13 + $0x668] ss:$28 sps:$4 sm:$0xff]  }
 0x3e0   :  { %4206 = vmatpush2.bf16.msra.mxu0 %v5817_v14  ;;  %4247 = vmatpush2.bf16.msra.mxu1 %v5820_v17  ;;  %v5906_v14 = vld [vmem:[#allocation13 + $0x634] ss:$28 sps:$4 sm:$0xff]  }
 0x3e1   :  { %4207 = vmatprep.subr.bf16.mxu0 %v5825_v18  ;;  %4248 = vmatprep.subr.bf16.mxu1 %v5828_v25  ;;  %v5901_v17 = vld [vmem:[#allocation13 + $0x2b0] ss:$28 sps:$4 sm:$0xff]   ;;  %v5909_v25 = vld [vmem:[#allocation13 + $0x27c] ss:$28 sps:$4 sm:$0xff]  }
 0x3e2   :  { %v5904_v18 = vld [vmem:[#allocation13 + $0x630] ss:$28 sps:$4 sm:$0xff]  }
 0x3e4   :  { %4208 = vmatpush2.bf16.msra.mxu0 %v5823_v26  ;;  %4249 = vmatpush2.bf16.msra.mxu1 %v5826_v21  ;;  %v5912_v26 = vld [vmem:[#allocation13 + $0x5fc] ss:$28 sps:$4 sm:$0xff]  }
 0x3e5   :  { %4209 = vmatprep.subr.bf16.mxu0 %v5831_v23  ;;  %4250 = vmatprep.subr.bf16.mxu1 %v5834_v28  ;;  %v5907_v21 = vld [vmem:[#allocation13 + $0x278] ss:$28 sps:$4 sm:$0xff]   ;;  %v5915_v28 = vld [vmem:[#allocation13 + $0x244] ss:$28 sps:$4 sm:$0xff]  }
 0x3e6   :  { %v5910_v23 = vld [vmem:[#allocation13 + $0x5f8] ss:$28 sps:$4 sm:$0xff]  }
 0x3e8   :  { %4210 = vmatpush2.bf16.msra.mxu0 %v5829_v24  ;;  %4251 = vmatpush2.bf16.msra.mxu1 %v5832_v29  ;;  %v5918_v24 = vld [vmem:[#allocation13 + $0x5c4] ss:$28 sps:$4 sm:$0xff]  }
 0x3e9   :  { %4261 = vmatprep.subr.bf16.mxu0 %v5837_v30  ;;  %4302 = vmatprep.subr.bf16.mxu1 %v5840_v31  ;;  %v5913_v29 = vld [vmem:[#allocation13 + $0x240] ss:$28 sps:$4 sm:$0xff]   ;;  %v5921_v31 = vld [vmem:[#allocation13 + $0x20c] ss:$28 sps:$4 sm:$0xff]  }
 0x3ea   :  { %v5916_v30 = vld [vmem:[#allocation13 + $0x5c0] ss:$28 sps:$4 sm:$0xff]  }
 0x3eb   :  { %4212 = vmatmul.mubr.bf16.vlgmr.msra.gmra.mxu0 %v6363_v27  ;;  %4253 = vmatmul.mubr.bf16.vlgmr.msra.gmra.mxu1 %v6365_v20 }
 0x3ec   :  { %4262 = vmatpush1.bf16.msra.mxu0 %v5835_v32  ;;  %4293 = vmatprep.mubr.bf16.mxu0 %v6359_v19  ;;  %v5924_v32 = vld [vmem:[#allocation13 + $0x58c] ss:$28 sps:$4 sm:$0xff]  }
 0x3ed   :  { %4303 = vmatpush1.bf16.msra.mxu1 %v5838_v33  ;;  %4334 = vmatprep.mubr.bf16.mxu1 %v6361_v22  ;;  %v5919_v33 = vld [vmem:[#allocation13 + $0x208] ss:$28 sps:$4 sm:$0xff]  }
 0x3ee   :  { %4263 = vmatprep.subr.bf16.mxu0 %v5843_v51  ;;  %4304 = vmatprep.subr.bf16.mxu1 %v5846_v36  ;;  %v5922_v51 = vld [vmem:[#allocation13 + $0x588] ss:$28 sps:$4 sm:$0xff]   ;;  %v5927_v36 = vld [vmem:[#allocation13 + $0x1d4] ss:$28 sps:$4 sm:$0xff]  }
 0x3f0   :  { %4264 = vmatpush1.bf16.msra.mxu0 %v5841_v37  ;;  %v5930_v37 = vld [vmem:[#allocation13 + $0x554] ss:$28 sps:$4 sm:$0xff]  }
 0x3f1   :  { %4305 = vmatpush1.bf16.msra.mxu1 %v5844_v38  ;;  %4265 = vmatprep.subr.bf16.mxu0 %v5849_v39  ;;  %v5925_v38 = vld [vmem:[#allocation13 + $0x1d0] ss:$28 sps:$4 sm:$0xff]  }
 0x3f2   :  { %4306 = vmatprep.subr.bf16.mxu1 %v5852_v40  ;;  %v5928_v39 = vld [vmem:[#allocation13 + $0x550] ss:$28 sps:$4 sm:$0xff]   ;;  %v5931_v40 = vld [vmem:[#allocation13 + $0x360] ss:$28 sps:$4 sm:$0xff]  }
 0x3f4   :  { %4266 = vmatpush1.bf16.msra.mxu0 %v5847_v41  ;;  %v5932_v41 = vld [vmem:[#allocation13 + $0x6e0] ss:$28 sps:$4 sm:$0xff]  }
 0x3f5   :  { %4307 = vmatpush1.bf16.msra.mxu1 %v5850_v42  ;;  %4267 = vmatprep.subr.bf16.mxu0 %v5855_v43  ;;  %v5933_v42 = vld [vmem:[#allocation13 + $0x1a0] ss:$28 sps:$4 sm:$0xff]  }
 0x3f6   :  { %4308 = vmatprep.subr.bf16.mxu1 %v5858_v44  ;;  %v5934_v43 = vld [vmem:[#allocation13 + $0x520] ss:$28 sps:$4 sm:$0xff]   ;;  %v5935_v44 = vld [vmem:[#allocation13 + $0x328] ss:$28 sps:$4 sm:$0xff]  }
 0x3f8   :  { %4268 = vmatpush1.bf16.msra.mxu0 %v5853_v45  ;;  %v5936_v45 = vld [vmem:[#allocation13 + $0x6a8] ss:$28 sps:$4 sm:$0xff]  }
 0x3f9   :  { %4309 = vmatpush1.bf16.msra.mxu1 %v5856_v46  ;;  %4269 = vmatprep.subr.bf16.mxu0 %v5861_v48  ;;  %v5937_v46 = vld [vmem:[#allocation13 + $0x168] ss:$28 sps:$4 sm:$0xff]  }
 0x3fa   :  { %4310 = vmatprep.subr.bf16.mxu1 %v5864_v49  ;;  %v5938_v48 = vld [vmem:[#allocation13 + $0x4e8] ss:$28 sps:$4 sm:$0xff]   ;;  %v5939_v49 = vld [vmem:[#allocation13 + $0x2f0] ss:$28 sps:$4 sm:$0xff]  }
 0x3fc   :  { %4270 = vmatpush1.bf16.msra.mxu0 %v5859_v50  ;;  %v5940_v50 = vld [vmem:[#allocation13 + $0x670] ss:$28 sps:$4 sm:$0xff]  }
 0x3fd   :  { %4311 = vmatpush1.bf16.msra.mxu1 %v5862_v52  ;;  %4271 = vmatprep.subr.bf16.mxu0 %v5867_v53  ;;  %v5941_v52 = vld [vmem:[#allocation13 + $0x130] ss:$28 sps:$4 sm:$0xff]  }
 0x3fe   :  { %4312 = vmatprep.subr.bf16.mxu1 %v5870_v54  ;;  %v5942_v53 = vld [vmem:[#allocation13 + $0x4b0] ss:$28 sps:$4 sm:$0xff]   ;;  %v5943_v54 = vld [vmem:[#allocation13 + $0x2b8] ss:$28 sps:$4 sm:$0xff]  }
 0x400   :  { %4272 = vmatpush1.bf16.msra.mxu0 %v5865_v55  ;;  %v5944_v55 = vld [vmem:[#allocation13 + $0x638] ss:$28 sps:$4 sm:$0xff]  }
 0x401   :  { %4313 = vmatpush1.bf16.msra.mxu1 %v5868_v56  ;;  %4273 = vmatprep.subr.bf16.mxu0 %v5873_v57  ;;  %v5945_v56 = vld [vmem:[#allocation13 + $0xf8] ss:$28 sps:$4 sm:$0xff]   ;;  %v5947_v57 = vld [vmem:[#allocation13 + $0x280] ss:$28 sps:$4 sm:$0xff]  }
 0x402   :  { %4314 = vmatprep.subr.bf16.mxu1 %v5876_v58  ;;  %v5948_v58 = vld [vmem:[#allocation13 + $0x600] ss:$28 sps:$4 sm:$0xff]  }
 0x404   :  { %4274 = vmatpush1.bf16.msra.mxu0 %v5871_v59  ;;  %v5950_v59 = vld [vmem:[#allocation13 + $0x440] ss:$28 sps:$4 sm:$0xff]  }
 0x405   :  { %4315 = vmatpush1.bf16.msra.mxu1 %v5874_v60  ;;  %4275 = vmatprep.subr.bf16.mxu0 %v5879_v61  ;;  %v5951_v60 = vld [vmem:[#allocation13 + $0x248] ss:$28 sps:$4 sm:$0xff]  }
 0x406   :  { %4316 = vmatprep.subr.bf16.mxu1 %v5882_v62  ;;  %v5952_v61 = vld [vmem:[#allocation13 + $0x5c8] ss:$28 sps:$4 sm:$0xff]  }
 0x407   :  { %v5953_v62 = vld [vmem:[#allocation13 + $0x88] ss:$28 sps:$4 sm:$0xff]  }
 0x408   :  { %4276 = vmatpush1.bf16.msra.mxu0 %v5877_v47  ;;  %v5954_v47 = vld [vmem:[#allocation13 + $0x408] ss:$28 sps:$4 sm:$0xff]  }
 0x409   :  { %4317 = vmatpush1.bf16.msra.mxu1 %v5880_v6  ;;  %4277 = vmatprep.subr.bf16.mxu0 %v5885_v63  ;;  %v5955_v6 = vld [vmem:[#allocation13 + $0x210] ss:$28 sps:$4 sm:$0xff]  }
 0x40a   :  { %4318 = vmatprep.subr.bf16.mxu1 %v5888_v1  ;;  %v5956_v63 = vld [vmem:[#allocation13 + $0x590] ss:$28 sps:$4 sm:$0xff]  }
 0x40b   :  { %v5957_v1 = vld [vmem:[#allocation13 + $0x50] ss:$28 sps:$4 sm:$0xff]  }
 0x40c   :  { %4278 = vmatpush2.bf16.msra.mxu0 %v5883_v3  ;;  %v5958_v3 = vld [vmem:[#allocation13 + $0x3d0] ss:$28 sps:$4 sm:$0xff]  }
 0x40d   :  { %4319 = vmatpush2.bf16.msra.mxu1 %v5886_v4  ;;  %4279 = vmatprep.subr.bf16.mxu0 %v5891_v35  ;;  %v5959_v4 = vld [vmem:[#allocation13 + $0x1d8] ss:$28 sps:$4 sm:$0xff]  }
 0x40e   :  { %4320 = vmatprep.subr.bf16.mxu1 %v5894_v5  ;;  %v5960_v35 = vld [vmem:[#allocation13 + $0x558] ss:$28 sps:$4 sm:$0xff]  }
 0x40f   :  { %v5961_v5 = vld [vmem:[#allocation13 + $0x18] ss:$28 sps:$4 sm:$0xff]  }
 0x410   :  { %4280 = vmatpush2.bf16.msra.mxu0 %v5889_v8  ;;  %v5962_v8 = vld [vmem:[#allocation13 + $0x398] ss:$28 sps:$4 sm:$0xff]  }
 0x411   :  { %4321 = vmatpush2.bf16.msra.mxu1 %v5892_v16  ;;  %4281 = vmatprep.subr.bf16.mxu0 %v5897_v9  ;;  %v6386_v16 = vld [vmem:[%s6417_s9] sm:$0xff]  ;;  %s6200_s9 = smov [#allocation14]  }
 0x412   :  { %4322 = vmatprep.subr.bf16.mxu1 %v5900_v10  ;;  %v2913_v9 = vrot.slane %v6386_v16, %v6326_v0  ;;  %v2917_v10 = vrot.slane %v6386_v16, %v6332_v2  ;;  %s4504_s16 = sshll.u32 %s6200_s9, 4  ;;  %s4505_s16 = int_to_ptr.vmem [resolvable:$true] %s4504_s16 }
 0x413   :  { %s6134_s4 = scalar_lea.vmem %s4505_s16, 256  ;;  %p6139_p8 = scmp.lt.s32.totalorder %s4505_s16, %s4505_s16 }
 0x414   :  { %4282 = vmatpush2.bf16.msra.mxu0 %v5895_v11  ;;  %p6135_p7 = scmp.ne.s32.totalorder %s4505_s16, %s6134_s4  ;;  %p6140_p9 = scmp.lt.s32.totalorder %s6134_s4, %s6134_s4 }
 0x415   :  { %4323 = vmatpush2.bf16.msra.mxu1 %v5898_v12  ;;  %4283 = vmatprep.subr.bf16.mxu0 %v5903_v13 }
 0x416   :  { %4324 = vmatprep.subr.bf16.mxu1 %v5906_v14  ;;  %p6141_p10 = por %p6140_p9, %p6139_p8 }
 0x418   :  { %4284 = vmatpush2.bf16.msra.mxu0 %v5901_v17  ;;  %p6142_p11 = pnand %p6141_p10, %p6135_p7 }
 0x419   :  { %4325 = vmatpush2.bf16.msra.mxu1 %v5904_v18  ;;  %4285 = vmatprep.subr.bf16.mxu0 %v5909_v25 }
 0x41a   :  { %4326 = vmatprep.subr.bf16.mxu1 %v5912_v26 }
 0x41c   :  { %4286 = vmatpush2.bf16.msra.mxu0 %v5907_v21 }
 0x41d   :  { %4327 = vmatpush2.bf16.msra.mxu1 %v5910_v23  ;;  %4287 = vmatprep.subr.bf16.mxu0 %v5915_v28 }
 0x41e   :  { %4328 = vmatprep.subr.bf16.mxu1 %v5918_v24 }
 0x420   :  { %4288 = vmatpush2.bf16.msra.mxu0 %v5913_v29 }
 0x421   :  { %4329 = vmatpush2.bf16.msra.mxu1 %v5916_v30  ;;  %4289 = vmatprep.subr.bf16.mxu0 %v5921_v31 }
 0x422   :  { %4330 = vmatprep.subr.bf16.mxu1 %v5924_v32 }
 0x424   :  { %4290 = vmatpush2.bf16.msra.mxu0 %v5919_v33 }
 0x425   :  { %4331 = vmatpush2.bf16.msra.mxu1 %v5922_v51  ;;  %4291 = vmatprep.subr.bf16.mxu0 %v5927_v36  ;;  %v2921_v51 = vrot.slane %v6386_v16, %v6342_v7 }
 0x426   :  { %4332 = vmatprep.subr.bf16.mxu1 %v5930_v37 }
 0x428   :  { %4292 = vmatpush2.bf16.msra.mxu0 %v5925_v38 }
 0x429   :  { %4333 = vmatpush2.bf16.msra.mxu1 %v5928_v39  ;;  %5096 = vmatprep.subr.bf16.mxu0 %v5931_v40 }
 0x42a   :  { %5118 = vmatprep.subr.bf16.mxu1 %v5932_v41 }
 0x42b   :  { %4294 = vmatmul.mubr.bf16.vlgmr.msra.gmra.mxu0 %v6363_v27 }
 0x42c   :  { %4335 = vmatmul.mubr.bf16.vlgmr.msra.gmra.mxu1 %v6365_v20  ;;  %5097 = vmatpush3.bf16.msra.mxu0 %v5933_v42 }
 0x42d   :  { %4375 = vmatprep.mubr.bf16.mxu0 %v6359_v19  ;;  %5119 = vmatpush3.bf16.msra.mxu1 %v5934_v43  ;;  %v5946_v19 = vld [vmem:[#allocation13 + $0x478] ss:$28 sps:$4 sm:$0xff]  }
 0x42e   :  { %4415 = vmatprep.mubr.bf16.mxu1 %v6361_v22  ;;  %5098 = vmatprep.subr.bf16.mxu0 %v5935_v44  ;;  %v5949_v22 = vld [vmem:[#allocation13 + $0xc0] ss:$28 sps:$4 sm:$0xff]  }
 0x42f   :  { %5120 = vmatprep.subr.bf16.mxu1 %v5936_v45 }
 0x430   :  { %5099 = vmatpush3.bf16.msra.mxu0 %v5937_v46 }
 0x431   :  { %5121 = vmatpush3.bf16.msra.mxu1 %v5938_v48  ;;  %5100 = vmatprep.subr.bf16.mxu0 %v5939_v49 }
 0x432   :  { %5122 = vmatprep.subr.bf16.mxu1 %v5940_v50 }
 0x434   :  { %5101 = vmatpush3.bf16.msra.mxu0 %v5941_v52 }
 0x435   :  { %5123 = vmatpush3.bf16.msra.mxu1 %v5942_v53  ;;  %5102 = vmatprep.subr.bf16.mxu0 %v5943_v54 }
 0x436   :  { %5124 = vmatprep.subr.bf16.mxu1 %v5944_v55 }
 0x438   :  { %5103 = vmatpush3.bf16.msra.mxu0 %v5945_v56 }
 0x439   :  { %5125 = vmatpush3.bf16.msra.mxu1 %v5946_v19  ;;  %5104 = vmatprep.subr.bf16.mxu0 %v5947_v57 }
 0x43a   :  { %5126 = vmatprep.subr.bf16.mxu1 %v5948_v58 }
 0x43c   :  { %5105 = vmatpush3.bf16.msra.mxu0 %v5949_v22 }
 0x43d   :  { %5127 = vmatpush3.bf16.msra.mxu1 %v5950_v59  ;;  %5106 = vmatprep.subr.bf16.mxu0 %v5951_v60 }
 0x43e   :  { %5128 = vmatprep.subr.bf16.mxu1 %v5952_v61 }
 0x440   :  { %5107 = vmatpush3.bf16.msra.mxu0 %v5953_v62 }
 0x441   :  { %5129 = vmatpush3.bf16.msra.mxu1 %v5954_v47  ;;  %5108 = vmatprep.subr.bf16.mxu0 %v5955_v6 }
 0x442   :  { %5130 = vmatprep.subr.bf16.mxu1 %v5956_v63 }
 0x444   :  { %5109 = vmatpush3.bf16.msra.mxu0 %v5957_v1 }
 0x445   :  { %5131 = vmatpush3.bf16.msra.mxu1 %v5958_v3  ;;  %5110 = vmatprep.subr.bf16.mxu0 %v5959_v4 }
 0x446   :  { %5132 = vmatprep.subr.bf16.mxu1 %v5960_v35 }
 0x448   :  { %5111 = vmatpush3.bf16.msra.mxu0 %v5961_v5 }
 0x449   :  { %5133 = vmatpush3.bf16.msra.mxu1 %v5962_v8 }
 0x44b   :  { %4376 = vmatmul.mubr.bf16.vlgmr.msra.gmra.mxu0 %v6363_v27 }
 0x44c   :  { %4416 = vmatmul.mubr.bf16.vlgmr.msra.gmra.mxu1 %v6365_v20 }
 0x46b   :  { %v4131_v11 = vpop.f32.mrf.mxu0  ;;  %v4172_v12 = vpop.f32.mrf.mxu1 }
 0x46c   :  { %v4132_v13 = vadd.f32 %v4131_v11, %v2913_v9 }
 0x46d   :  { %v4133_v14 = vpop.f32.mrf.mxu0  ;;  %v4174_v17 = vpop.f32.mrf.mxu1 }
 0x46e   :  { %v4173_v18 = vadd.f32 %v4172_v12, %v4132_v13  ;;  %v4134_v27 = vadd.f32 %v4133_v14, %v2917_v10 }
 0x46f   :  { %v4135_v25 = vpop.f32.mrf.mxu0  ;;  %v4176_v20 = vpop.f32.mrf.mxu1 }
 0x470   :  { %v5081_v26 = vmul.f32 -1.442695, %v4173_v18  ;;  %v4175_v21 = vadd.f32 %v4174_v17, %v4134_v27 }
 0x471   :  { %v4136_v23 = vpop.f32.mrf.mxu0  ;;  %v4177_v28 = vpop.f32.mrf.mxu1 }
 0x472   :  { %5965 = vpow2.f32 %v5081_v26  ;;  %v5082_v24 = vmul.f32 -1.442695, %v4175_v21 }
 0x474   :  { %5967 = vpow2.f32 %v5082_v24 }
 0x47f   :  { %v5966_v0 = vpop.eup %5965 }
 0x480   :  { %v4444_v29 = vadd.f32 1.0, %v5966_v0 }
 0x481   :  { %v5968_v30 = vpop.eup %5967 }
 0x482   :  { %v4445_v2 = vadd.f32 1.0, %v5968_v30  ;;  %5969 = vrcp.f32 %v4444_v29 }
 0x484   :  { %5971 = vrcp.f32 %v4445_v2 }
 0x48f   :  { %v5970_v31 = vpop.eup %5969 }
 0x491   :  { %v5972_v32 = vpop.eup %5971 }
 0x492   :  { %v5092_v33 = vpack.c.bf16 %v5972_v32, %v5970_v31 }
 0x494   :  { %4494 = vst [vmem:[#allocation15] sm:$0xff] %v5092_v33 }
 0x495   :  { %6145 = shalt.err (!%p6142_p11)
}
 0x496   :  { %4507 = dma.vmem_to_hbm [thread:$0]  %s4505_s16, 256, %s6418_s10, [#allocation4]   ;;  %v2925_v36 = vrot.slane %v6386_v16, %v6345_v34  ;;  %v2928_v57 = vsub.s32 4, %v6323_v15  ;;  %v2932_v58 = vsub.s32 5, %v6323_v15  ;;  %v2936_v17 = vsub.s32 6, %v6323_v15 }
 0x497   :  { %s6201_s10 = smov [#allocation15]  }
 0x498   :  { %v2929_v22 = vrot.slane %v6386_v16, %v2928_v57  ;;  %v2933_v59 = vrot.slane %v6386_v16, %v2932_v58  ;;  %v2937_v25 = vrot.slane %v6386_v16, %v2936_v17  ;;  %s4514_s19 = sshll.u32 %s6201_s10, 4  ;;  %s4515_s19 = int_to_ptr.vmem [resolvable:$true] %s4514_s19 }
 0x499   :  { %s6154_s20 = scalar_lea.vmem %s4515_s19, 448  ;;  %p6159_p13 = scmp.lt.s32.totalorder %s4515_s19, %s4515_s19 }
 0x49a   :  { %p6155_p12 = scmp.ne.s32.totalorder %s4515_s19, %s6154_s20  ;;  %p6160_p0 = scmp.lt.s32.totalorder %s6154_s20, %s6154_s20 }
 0x49c   :  { %p6161_p1 = por %p6160_p0, %p6159_p13 }
 0x49e   :  { %p6162_p2 = pnand %p6161_p1, %p6155_p12 }
 0x4ab   :  { %v4213_v37 = vpop.f32.mrf.mxu0  ;;  %v4254_v38 = vpop.f32.mrf.mxu1 }
 0x4ac   :  { %v4214_v39 = vadd.f32 %v4213_v37, %v2921_v51 }
 0x4ad   :  { %v4215_v40 = vpop.f32.mrf.mxu0  ;;  %v4256_v7 = vpop.f32.mrf.mxu1 }
 0x4ae   :  { %v4255_v41 = vadd.f32 %v4254_v38, %v4214_v39  ;;  %v4216_v42 = vadd.f32 %v4215_v40, %v2925_v36 }
 0x4af   :  { %v4217_v43 = vpop.f32.mrf.mxu0  ;;  %v4258_v44 = vpop.f32.mrf.mxu1 }
 0x4b0   :  { %v5083_v45 = vmul.f32 -1.442695, %v4255_v41  ;;  %v4257_v46 = vadd.f32 %v4256_v7, %v4216_v42 }
 0x4b1   :  { %v4218_v48 = vpop.f32.mrf.mxu0  ;;  %v4259_v49 = vpop.f32.mrf.mxu1 }
 0x4b2   :  { %5973 = vpow2.f32 %v5083_v45  ;;  %v5084_v50 = vmul.f32 -1.442695, %v4257_v46 }
 0x4b4   :  { %5975 = vpow2.f32 %v5084_v50 }
 0x4bf   :  { %v5974_v52 = vpop.eup %5973 }
 0x4c0   :  { %v4446_v53 = vadd.f32 1.0, %v5974_v52 }
 0x4c1   :  { %v5976_v54 = vpop.eup %5975 }
 0x4c2   :  { %v4447_v34 = vadd.f32 1.0, %v5976_v54  ;;  %5977 = vrcp.f32 %v4446_v53 }
 0x4c4   :  { %5979 = vrcp.f32 %v4447_v34 }
 0x4cf   :  { %v5978_v55 = vpop.eup %5977 }
 0x4d1   :  { %v5980_v56 = vpop.eup %5979 }
 0x4d2   :  { %v5093_v19 = vpack.c.bf16 %v5980_v56, %v5978_v55 }
 0x4d4   :  { %4495 = vst [vmem:[#allocation15 + $0x8] sm:$0xff] %v5093_v19 }
 0x4eb   :  { %v4295_v60 = vpop.f32.mrf.mxu0 }
 0x4ec   :  { %v4296_v61 = vadd.f32 %v4295_v60, %v2929_v22  ;;  %v4336_v62 = vpop.f32.mrf.mxu1 }
 0x4ed   :  { %v4297_v47 = vpop.f32.mrf.mxu0 }
 0x4ee   :  { %v4337_v6 = vadd.f32 %v4336_v62, %v4296_v61  ;;  %v4298_v63 = vadd.f32 %v4297_v47, %v2933_v59  ;;  %v4338_v1 = vpop.f32.mrf.mxu1 }
 0x4ef   :  { %v4299_v3 = vpop.f32.mrf.mxu0 }
 0x4f0   :  { %v5085_v4 = vmul.f32 -1.442695, %v4337_v6  ;;  %v4339_v35 = vadd.f32 %v4338_v1, %v4298_v63  ;;  %v4340_v5 = vpop.f32.mrf.mxu1 }
 0x4f1   :  { %v4300_v8 = vpop.f32.mrf.mxu0 }
 0x4f2   :  { %5981 = vpow2.f32 %v5085_v4  ;;  %v5086_v9 = vmul.f32 -1.442695, %v4339_v35  ;;  %v4341_v10 = vpop.f32.mrf.mxu1 }
 0x4f4   :  { %5983 = vpow2.f32 %v5086_v9 }
 0x4ff   :  { %v5982_v11 = vpop.eup %5981 }
 0x500   :  { %v4448_v12 = vadd.f32 1.0, %v5982_v11 }
 0x501   :  { %v5984_v13 = vpop.eup %5983 }
 0x502   :  { %v4449_v14 = vadd.f32 1.0, %v5984_v13  ;;  %5985 = vrcp.f32 %v4448_v12 }
 0x504   :  { %5987 = vrcp.f32 %v4449_v14 }
 0x50b   :  { %v5112_v18 = vpop.f32.mrf.mxu0 }
 0x50c   :  { %v5134_v27 = vpop.f32.mrf.mxu1 }
 0x50d   :  { %v5113_v20 = vpop.f32.mrf.mxu0 }
 0x50e   :  { %v5114_v26 = vadd.f32 %v5113_v20, %v5112_v18  ;;  %v5135_v21 = vpop.f32.mrf.mxu1 }
 0x50f   :  { %v5115_v23 = vpop.f32.mrf.mxu0  ;;  %v5986_v28 = vpop.eup %5985  ;;  %v5136_v0 = vadd.f32 %v5135_v21, %v5134_v27 }
 0x510   :  { %v4378_v24 = vadd.f32 %v5114_v26, %v2937_v25  ;;  %v5137_v29 = vpop.f32.mrf.mxu1 }
 0x511   :  { %v5988_v30 = vpop.eup %5987  ;;  %v5116_v2 = vpop.f32.mrf.mxu0 }
 0x512   :  { %v4418_v31 = vadd.f32 %v5136_v0, %v4378_v24  ;;  %v5138_v32 = vpop.f32.mrf.mxu1  ;;  %v5094_v33 = vpack.c.bf16 %v5988_v30, %v5986_v28 }
 0x514   :  { %v5087_v51 = vmul.f32 -1.442695, %v4418_v31  ;;  %4496 = vst [vmem:[#allocation15 + $0x10] sm:$0xff] %v5094_v33 }
 0x516   :  { %5989 = vpow2.f32 %v5087_v51 }
 0x523   :  { %v5990_v15 = vpop.eup %5989 }
 0x524   :  { %v4450_v36 = vadd.f32 1.0, %v5990_v15 }
 0x526   :  { %5991 = vrcp.f32 %v4450_v36 }
 0x533   :  { %v5992_v16 = vpop.eup %5991 }
 0x534   :  { %v5095_v37 = vpack.c.bf16 %v5992_v16, %v5992_v16 }
 0x536   :  { %4497 = vst [vmem:[#allocation15 + $0x18] sm:$0xf] %v5095_v37 }
 0x537   :  { %6165 = shalt.err (!%p6162_p2)
}
 0x538   :  { %4517 = dma.vmem_to_hbm [thread:$0]  %s4515_s19, 448, %s6419_s11, [#allocation16]  }
 0x539   :  { %6182 = dma.done.wait [#allocation4], 256  }
 0x53a   :  { %6183 = vsyncadd [#allocation4], 4294967040 }
 0x53b   :  { %6184 = dma.done.wait [#allocation16], 448  }
 0x53c   :  { %6185 = vsyncadd [#allocation16], 4294966848 }
 0x53d   :  { %4524 = vsyncpa [#allocation3], 1 }
 0x53e   :  { %4525 = vsyncpa [#allocation6], 1 }
 0x53f   :  { %4526 = vsyncpa [#allocation9], 1 }
 0x540   :  { %4527 = vsyncpa [#allocation12], 1 }
 0x541   :  { %4528 = vsyncpa [#allocation4], 1 }
 0x542   :  { %4529 = vsyncpa [#allocation16], 1 }

// kernel: tpu_custom_call.1
= control target key start
LH: loop header
LB: loop body
LE: loop exit
PB: predicated region body
PF: predicated region fallthrough
CT: control target
= control target key end

     0   :  { %17 = vsyncpa [#allocation3], 0  ;;  %s6408_s0 = inlined_call_operand.hbm [shape: bf16[8,896], index: 0, kind: input, shape index: {}]   ;;  %s6409_s1 = inlined_call_operand.hbm [shape: bf16[8,128], index: 1, kind: input, shape index: {}]   ;;  %s6410_s2 = inlined_call_operand.hbm [shape: bf16[896,512], index: 2, kind: input, shape index: {}]   ;;  %s6411_s3 = inlined_call_operand.vmem [shape: f32[1,512], index: 3, kind: input, shape index: {}]   ;;  %s6412_s4 = inlined_call_operand.hbm [shape: bf16[512,256], index: 4, kind: input, shape index: {}]   ;;  %s6413_s5 = inlined_call_operand.vmem [shape: f32[1,256], index: 5, kind: input, shape index: {}]   ;;  %s6414_s6 = inlined_call_operand.hbm [shape: bf16[128,512], index: 6, kind: input, shape index: {}]   ;;  %s6415_s7 = inlined_call_operand.hbm [shape: f32[1,512], index: 7, kind: input, shape index: {}]   ;;  %s6416_s8 = inlined_call_operand.hbm [shape: bf16[512,896], index: 8, kind: input, shape index: {}]   ;;  %s6417_s9 = inlined_call_operand.vmem [shape: f32[1,896], index: 9, kind: input, shape index: {}]   ;;  %s6418_s10 = inlined_call_operand.hbm [shape: f32[8,256], index: 10, kind: output, shape index: {0}]   ;;  %s6419_s11 = inlined_call_operand.hbm [shape: bf16[8,896], index: 11, kind: output, shape index: {1}]  }
   0x1   :  { %18 = vsyncpa [#allocation6], 0 }
   0x2   :  { %19 = vsyncpa [#allocation9], 0 }
   0x3   :  { %20 = vsyncpa [#allocation12], 0 }
   0x4   :  { %21 = vsyncpa [#allocation4], 0 }
   0x5   :  { %22 = vsyncpa [#allocation16], 0  ;;  %s6186_s17 = smov [#allocation5]   ;;  %s6187_s19 = smov [#allocation8]  }
   0x6   :  { %s39_s18 = sshll.u32 %s6186_s17, 4  ;;  %s62_s20 = sshll.u32 %s6187_s19, 4  ;;  %s40_s18 = int_to_ptr.vmem [resolvable:$true] %s39_s18  ;;  %s63_s20 = int_to_ptr.vmem [resolvable:$true] %s62_s20 }
   0x7   :  { %s6002_s21 = scalar_lea.vmem %s40_s18, 64  ;;  %p6007_p1 = scmp.lt.s32.totalorder %s40_s18, %s40_s18 }
   0x8   :  { %p6003_p0 = scmp.ne.s32.totalorder %s40_s18, %s6002_s21  ;;  %p6008_p2 = scmp.lt.s32.totalorder %s6002_s21, %s6002_s21 }
   0xa   :  { %p6009_p3 = por %p6008_p2, %p6007_p1 }
   0xc   :  { %p6010_p4 = pnand %p6009_p3, %p6003_p0 }
   0xe   :  { %6013 = shalt.err (!%p6010_p4)
}
   0xf   :  { %42 = dma.hbm_to_vmem [thread:$0]  %s6409_s1, 64, %s40_s18, [#allocation6]  }
  0x10   :  { %s6022_s24 = scalar_lea.vmem %s63_s20, 8192  ;;  %p6027_p6 = scmp.lt.s32.totalorder %s63_s20, %s63_s20 }
  0x11   :  { %p6023_p5 = scmp.ne.s32.totalorder %s63_s20, %s6022_s24  ;;  %p6028_p7 = scmp.lt.s32.totalorder %s6022_s24, %s6022_s24 }
  0x13   :  { %p6029_p8 = por %p6028_p7, %p6027_p6 }
  0x15   :  { %p6030_p9 = pnand %p6029_p8, %p6023_p5 }
  0x17   :  { %6033 = shalt.err (!%p6030_p9)
}
  0x18   :  { %s6188_s25 = smov 128   ;;  %s6189_s26 = smov 8  }
  0x19   :  { %68 = dma.hbm_to_vmem [thread:$0]  %s6412_s4, 8192, %s63_s20, [#allocation9], %s6188_s25, %s6188_s25, %s6189_s26  }
  0x1a   :  { %s6190_s29 = smov [#allocation11]   ;;  %s6191_s12 = smov [#allocation2]  }
  0x1b   :  { %s89_s30 = sshll.u32 %s6190_s29, 4  ;;  %s29_s13 = sshll.u32 %s6191_s12, 4  ;;  %s90_s30 = int_to_ptr.vmem [resolvable:$true] %s89_s30  ;;  %s30_s13 = int_to_ptr.vmem [resolvable:$true] %s29_s13 }
  0x1c   :  { %s6042_s1 = scalar_lea.vmem %s90_s30, 64  ;;  %p6047_p11 = scmp.lt.s32.totalorder %s90_s30, %s90_s30 }
  0x1d   :  { %p6043_p10 = scmp.ne.s32.totalorder %s90_s30, %s6042_s1  ;;  %p6048_p12 = scmp.lt.s32.totalorder %s6042_s1, %s6042_s1 }
  0x1f   :  { %p6049_p13 = por %p6048_p12, %p6047_p11 }
  0x21   :  { %p6050_p0 = pnand %p6049_p13, %p6043_p10 }
  0x23   :  { %6053 = shalt.err (!%p6050_p0)
}
  0x24   :  { %92 = dma.hbm_to_vmem [thread:$0]  %s6415_s7, 64, %s90_s30, [#allocation12]  }
  0x25   :  { %s6062_s16 = scalar_lea.vmem %s30_s13, 448  ;;  %p6067_p2 = scmp.lt.s32.totalorder %s30_s13, %s30_s13 }
  0x26   :  { %p6063_p1 = scmp.ne.s32.totalorder %s30_s13, %s6062_s16  ;;  %p6068_p3 = scmp.lt.s32.totalorder %s6062_s16, %s6062_s16 }
  0x28   :  { %p6069_p4 = por %p6068_p3, %p6067_p2 }
  0x2a   :  { %p6070_p5 = pnand %p6069_p4, %p6063_p1 }
  0x2c   :  { %6073 = shalt.err (!%p6070_p5)
}
  0x2d   :  { %32 = dma.hbm_to_vmem [thread:$0]  %s6408_s0, 448, %s30_s13, [#allocation3]  }
  0x2e   :  { %s6192_s18 = smov [#allocation7]  }
  0x2f   :  { %s48_s19 = sshll.u32 %s6192_s18, 4  ;;  %s49_s19 = int_to_ptr.vmem [resolvable:$true] %s48_s19 }
  0x30   :  { %s6082_s20 = scalar_lea.vmem %s49_s19, 28672  ;;  %p6087_p7 = scmp.lt.s32.totalorder %s49_s19, %s49_s19 }
  0x31   :  { %p6083_p6 = scmp.ne.s32.totalorder %s49_s19, %s6082_s20  ;;  %p6088_p8 = scmp.lt.s32.totalorder %s6082_s20, %s6082_s20 }
  0x33   :  { %p6089_p9 = por %p6088_p8, %p6087_p7 }
  0x35   :  { %p6090_p10 = pnand %p6089_p9, %p6083_p6 }
  0x37   :  { %6093 = shalt.err (!%p6090_p10)
}
  0x38   :  { %s6193_s7 = smov 256   ;;  %s6194_s21 = smov 16  }
  0x39   :  { %54 = dma.hbm_to_vmem [thread:$0]  %s6410_s2, 28672, %s49_s19, [#allocation6], %s6193_s7, %s6193_s7, %s6194_s21  }
  0x3a   :  { %s6195_s24 = smov [#allocation10]   ;;  %s6196_s0 = smov [#allocation13]  }
  0x3b   :  { %s76_s25 = sshll.u32 %s6195_s24, 4  ;;  %s98_s26 = sshll.u32 %s6196_s0, 4  ;;  %s77_s25 = int_to_ptr.vmem [resolvable:$true] %s76_s25  ;;  %s99_s26 = int_to_ptr.vmem [resolvable:$true] %s98_s26 }
  0x3c   :  { %s6102_s27 = scalar_lea.vmem %s77_s25, 4096  ;;  %p6107_p12 = scmp.lt.s32.totalorder %s77_s25, %s77_s25 }
  0x3d   :  { %p6103_p11 = scmp.ne.s32.totalorder %s77_s25, %s6102_s27  ;;  %p6108_p13 = scmp.lt.s32.totalorder %s6102_s27, %s6102_s27 }
  0x3f   :  { %p6109_p0 = por %p6108_p13, %p6107_p12 }
  0x41   :  { %p6110_p1 = pnand %p6109_p0, %p6103_p11 }
  0x43   :  { %6113 = shalt.err (!%p6110_p1)
}
  0x44   :  { %82 = dma.hbm_to_vmem [thread:$0]  %s6414_s6, 4096, %s77_s25, [#allocation9], %s6193_s7, %s6193_s7, %s6194_s21  }
  0x45   :  { %s6122_s30 = scalar_lea.vmem %s99_s26, 28672  ;;  %p6127_p3 = scmp.lt.s32.totalorder %s99_s26, %s99_s26 }
  0x46   :  { %p6123_p2 = scmp.ne.s32.totalorder %s99_s26, %s6122_s30  ;;  %p6128_p4 = scmp.lt.s32.totalorder %s6122_s30, %s6122_s30 }
  0x48   :  { %p6129_p5 = por %p6128_p4, %p6127_p3 }
  0x4a   :  { %p6130_p6 = pnand %p6129_p5, %p6123_p2 }
  0x4c   :  { %6133 = shalt.err (!%p6130_p6)
}
  0x4d   :  { %s6197_s2 = smov 448   ;;  %s6198_s12 = smov 28  }
  0x4e   :  { %104 = dma.hbm_to_vmem [thread:$0]  %s6416_s8, 28672, %s99_s26, [#allocation12], %s6197_s2, %s6197_s2, %s6198_s12  }
  0x4f   :  { %6174 = dma.done.wait [#allocation3], 448  }
  0x50   :  { %6175 = vsyncadd [#allocation3], 4294966848 }
  0x51   :  { %6176 = dma.done.wait [#allocation6], 28736  }
  0x52   :  { %6177 = vsyncadd [#allocation6], 4294938560 }
  0x53   :  { %6178 = dma.done.wait [#allocation9], 12288  }
  0x54   :  { %6179 = vsyncadd [#allocation9], 4294955008 }
  0x55   :  { %6180 = dma.done.wait [#allocation12], 28736  }
  0x56   :  { %6181 = vsyncadd [#allocation12], 4294938560  ;;  %v5156_v0 = vld [vmem:[#allocation7 + $0xe4] ss:$16 sps:$4 sm:$0xff]   ;;  %v5160_v2 = vld [vmem:[#allocation7 + $0xe0] ss:$16 sps:$4 sm:$0xff]  }
  0x57   :  { %v5158_v1 = vld [vmem:[#allocation7 + $0x2e4] ss:$16 sps:$4 sm:$0xff]   ;;  %1524 = vmatprep.subr.bf16.mxu0 %v5156_v0  ;;  %v5161_v3 = vld [vmem:[#allocation7 + $0x2e0] ss:$16 sps:$4 sm:$0xff]   ;;  %v130_v48 = vld [vmem:[#allocation2 + $0x8] sm:$0xff] }
  0x58   :  { %1565 = vmatprep.subr.bf16.mxu1 %v5158_v1  ;;  %v5162_v4 = vld [vmem:[#allocation7 + $0xc4] ss:$16 sps:$4 sm:$0xff]   ;;  %1525 = vmatpush1.bf16.msra.mxu0 %v5160_v2  ;;  %v5166_v6 = vld [vmem:[#allocation7 + $0xc0] ss:$16 sps:$4 sm:$0xff]   ;;  %v6285_v51 = vcombine.high %v130_v48, %v130_v48 }
  0x59   :  { %1566 = vmatpush1.bf16.msra.mxu1 %v5161_v3  ;;  %v5164_v5 = vld [vmem:[#allocation7 + $0x2c4] ss:$16 sps:$4 sm:$0xff]   ;;  %1526 = vmatprep.subr.bf16.mxu0 %v5162_v4  ;;  %v5167_v7 = vld [vmem:[#allocation7 + $0x2c0] ss:$16 sps:$4 sm:$0xff]  }
  0x5a   :  { %1567 = vmatprep.subr.bf16.mxu1 %v5164_v5  ;;  %v5168_v8 = vld [vmem:[#allocation7 + $0xa4] ss:$16 sps:$4 sm:$0xff]   ;;  %v5172_v10 = vld [vmem:[#allocation7 + $0xa0] ss:$16 sps:$4 sm:$0xff]   ;;  %1597 = vmatprep.mubr.bf16.mxu1 %v6285_v51 }
  0x5b   :  { %v5170_v9 = vld [vmem:[#allocation7 + $0x2a4] ss:$16 sps:$4 sm:$0xff]   ;;  %v5173_v11 = vld [vmem:[#allocation7 + $0x2a0] ss:$16 sps:$4 sm:$0xff]  }
  0x5c   :  { %1527 = vmatpush1.bf16.msra.mxu0 %v5166_v6  ;;  %v5174_v12 = vld [vmem:[#allocation7 + $0x84] ss:$16 sps:$4 sm:$0xff]   ;;  %v5178_v14 = vld [vmem:[#allocation7 + $0x80] ss:$16 sps:$4 sm:$0xff]  }
  0x5d   :  { %1568 = vmatpush1.bf16.msra.mxu1 %v5167_v7  ;;  %1528 = vmatprep.subr.bf16.mxu0 %v5168_v8  ;;  %v5176_v13 = vld [vmem:[#allocation7 + $0x284] ss:$16 sps:$4 sm:$0xff]   ;;  %v5179_v15 = vld [vmem:[#allocation7 + $0x280] ss:$16 sps:$4 sm:$0xff]   ;;  %v6291_v7 = vcombine.low %v130_v48, %v130_v48  ;;  %v5316_v48 = vld [vmem:[#allocation7 + $0xcc] ss:$16 sps:$4 sm:$0xff]  }
  0x5e   :  { %1569 = vmatprep.subr.bf16.mxu1 %v5170_v9  ;;  %v5180_v16 = vld [vmem:[#allocation7 + $0x64] ss:$16 sps:$4 sm:$0xff]   ;;  %v5184_v18 = vld [vmem:[#allocation7 + $0x60] ss:$16 sps:$4 sm:$0xff]  }
  0x5f   :  { %v5182_v17 = vld [vmem:[#allocation7 + $0x264] ss:$16 sps:$4 sm:$0xff]   ;;  %v5185_v19 = vld [vmem:[#allocation7 + $0x260] ss:$16 sps:$4 sm:$0xff]  }
  0x60   :  { %1529 = vmatpush1.bf16.msra.mxu0 %v5172_v10  ;;  %v5186_v20 = vld [vmem:[#allocation7 + $0x44] ss:$16 sps:$4 sm:$0xff]   ;;  %v5190_v22 = vld [vmem:[#allocation7 + $0x40] ss:$16 sps:$4 sm:$0xff]  }
  0x61   :  { %1570 = vmatpush1.bf16.msra.mxu1 %v5173_v11  ;;  %1530 = vmatprep.subr.bf16.mxu0 %v5174_v12  ;;  %v5188_v21 = vld [vmem:[#allocation7 + $0x244] ss:$16 sps:$4 sm:$0xff]   ;;  %v5191_v23 = vld [vmem:[#allocation7 + $0x240] ss:$16 sps:$4 sm:$0xff]  }
  0x62   :  { %1571 = vmatprep.subr.bf16.mxu1 %v5176_v13  ;;  %v5192_v24 = vld [vmem:[#allocation7 + $0x24] ss:$16 sps:$4 sm:$0xff]   ;;  %v5196_v26 = vld [vmem:[#allocation7 + $0x20] ss:$16 sps:$4 sm:$0xff]  }
  0x63   :  { %v5194_v25 = vld [vmem:[#allocation7 + $0x224] ss:$16 sps:$4 sm:$0xff]   ;;  %v5197_v27 = vld [vmem:[#allocation7 + $0x220] ss:$16 sps:$4 sm:$0xff]  }
  0x64   :  { %1531 = vmatpush1.bf16.msra.mxu0 %v5178_v14  ;;  %v5198_v28 = vld [vmem:[#allocation7 + $0x4] ss:$16 sps:$4 sm:$0xff]   ;;  %v5202_v30 = vld [vmem:[#allocation7] ss:$16 sps:$4 sm:$0xff]  }
  0x65   :  { %1572 = vmatpush1.bf16.msra.mxu1 %v5179_v15  ;;  %1532 = vmatprep.subr.bf16.mxu0 %v5180_v16  ;;  %v5200_v29 = vld [vmem:[#allocation7 + $0x204] ss:$16 sps:$4 sm:$0xff]   ;;  %v5203_v31 = vld [vmem:[#allocation7 + $0x200] ss:$16 sps:$4 sm:$0xff]   ;;  %v6199_v16 = vmov 0  }
  0x66   :  { %1573 = vmatprep.subr.bf16.mxu1 %v5182_v17  ;;  %v5204_v32 = vld [vmem:[#allocation7 + $0x1e4] ss:$16 sps:$4 sm:$0xff]   ;;  %v5208_v34 = vld [vmem:[#allocation7 + $0x1e0] ss:$16 sps:$4 sm:$0xff]  }
  0x67   :  { %v5206_v33 = vld [vmem:[#allocation7 + $0x3e4] ss:$16 sps:$4 sm:$0xff]   ;;  %v5209_v35 = vld [vmem:[#allocation7 + $0x3e0] ss:$16 sps:$4 sm:$0xff]  }
  0x68   :  { %1533 = vmatpush1.bf16.msra.mxu0 %v5184_v18  ;;  %v5210_v36 = vld [vmem:[#allocation7 + $0x1c4] ss:$16 sps:$4 sm:$0xff]   ;;  %v5214_v38 = vld [vmem:[#allocation7 + $0x1c0] ss:$16 sps:$4 sm:$0xff]  }
  0x69   :  { %1574 = vmatpush1.bf16.msra.mxu1 %v5185_v19  ;;  %1534 = vmatprep.subr.bf16.mxu0 %v5186_v20  ;;  %v5212_v37 = vld [vmem:[#allocation7 + $0x3c4] ss:$16 sps:$4 sm:$0xff]   ;;  %v5215_v39 = vld [vmem:[#allocation7 + $0x3c0] ss:$16 sps:$4 sm:$0xff]  }
  0x6a   :  { %1575 = vmatprep.subr.bf16.mxu1 %v5188_v21  ;;  %v5216_v40 = vld [vmem:[#allocation7 + $0x1a4] ss:$16 sps:$4 sm:$0xff]   ;;  %v5220_v42 = vld [vmem:[#allocation7 + $0x1a0] ss:$16 sps:$4 sm:$0xff]  }
  0x6b   :  { %v5218_v41 = vld [vmem:[#allocation7 + $0x3a4] ss:$16 sps:$4 sm:$0xff]   ;;  %v5221_v43 = vld [vmem:[#allocation7 + $0x3a0] ss:$16 sps:$4 sm:$0xff]  }
  0x6c   :  { %1535 = vmatpush1.bf16.msra.mxu0 %v5190_v22  ;;  %v5222_v44 = vld [vmem:[#allocation7 + $0x184] ss:$16 sps:$4 sm:$0xff]   ;;  %v5226_v49 = vld [vmem:[#allocation7 + $0x180] ss:$16 sps:$4 sm:$0xff]  }
  0x6d   :  { %1576 = vmatpush1.bf16.msra.mxu1 %v5191_v23  ;;  %1536 = vmatprep.subr.bf16.mxu0 %v5192_v24  ;;  %v5224_v45 = vld [vmem:[#allocation7 + $0x384] ss:$16 sps:$4 sm:$0xff]   ;;  %v5227_v50 = vld [vmem:[#allocation7 + $0x380] ss:$16 sps:$4 sm:$0xff]  }
  0x6e   :  { %1577 = vmatprep.subr.bf16.mxu1 %v5194_v25  ;;  %v129_v46 = vld [vmem:[#allocation2] sm:$0xff] }
  0x6f   :  { %v6283_v47 = vcombine.high %v129_v46, %v129_v46  ;;  %v5228_v52 = vld [vmem:[#allocation7 + $0x164] ss:$16 sps:$4 sm:$0xff]   ;;  %v5232_v54 = vld [vmem:[#allocation7 + $0x160] ss:$16 sps:$4 sm:$0xff]   ;;  %v6289_v6 = vcombine.low %v129_v46, %v129_v46 }
  0x70   :  { %1537 = vmatpush1.bf16.msra.mxu0 %v5196_v26  ;;  %v5230_v53 = vld [vmem:[#allocation7 + $0x364] ss:$16 sps:$4 sm:$0xff]   ;;  %v5233_v55 = vld [vmem:[#allocation7 + $0x360] ss:$16 sps:$4 sm:$0xff]  }
  0x71   :  { %1578 = vmatpush1.bf16.msra.mxu1 %v5197_v27  ;;  %1538 = vmatprep.subr.bf16.mxu0 %v5198_v28  ;;  %v5234_v56 = vld [vmem:[#allocation7 + $0x144] ss:$16 sps:$4 sm:$0xff]   ;;  %v5238_v58 = vld [vmem:[#allocation7 + $0x140] ss:$16 sps:$4 sm:$0xff]  }
  0x72   :  { %1579 = vmatprep.subr.bf16.mxu1 %v5200_v29  ;;  %1556 = vmatprep.mubr.bf16.mxu0 %v6283_v47  ;;  %v5236_v57 = vld [vmem:[#allocation7 + $0x344] ss:$16 sps:$4 sm:$0xff]   ;;  %v5239_v59 = vld [vmem:[#allocation7 + $0x340] ss:$16 sps:$4 sm:$0xff]  }
  0x73   :  { %v5240_v60 = vld [vmem:[#allocation7 + $0x124] ss:$16 sps:$4 sm:$0xff]   ;;  %v5244_v62 = vld [vmem:[#allocation7 + $0x120] ss:$16 sps:$4 sm:$0xff]  }
  0x74   :  { %1539 = vmatpush1.bf16.msra.mxu0 %v5202_v30  ;;  %v5242_v61 = vld [vmem:[#allocation7 + $0x324] ss:$16 sps:$4 sm:$0xff]   ;;  %v5245_v63 = vld [vmem:[#allocation7 + $0x320] ss:$16 sps:$4 sm:$0xff]  }
  0x75   :  { %1580 = vmatpush1.bf16.msra.mxu1 %v5203_v31  ;;  %1540 = vmatprep.subr.bf16.mxu0 %v5204_v32  ;;  %v5246_v0 = vld [vmem:[#allocation7 + $0x104] ss:$16 sps:$4 sm:$0xff]   ;;  %v5250_v2 = vld [vmem:[#allocation7 + $0x100] ss:$16 sps:$4 sm:$0xff]  }
  0x76   :  { %1581 = vmatprep.subr.bf16.mxu1 %v5206_v33  ;;  %v5248_v1 = vld [vmem:[#allocation7 + $0x304] ss:$16 sps:$4 sm:$0xff]   ;;  %v5251_v3 = vld [vmem:[#allocation7 + $0x300] ss:$16 sps:$4 sm:$0xff]  }
  0x77   :  { %v5258_v4 = vld [vmem:[#allocation7 + $0x4e4] ss:$16 sps:$4 sm:$0xff]   ;;  %v5256_v8 = vld [vmem:[#allocation7 + $0x4e0] ss:$16 sps:$4 sm:$0xff]  }
  0x78   :  { %1541 = vmatpush2.bf16.msra.mxu0 %v5208_v34  ;;  %v5261_v5 = vld [vmem:[#allocation7 + $0x6e4] ss:$16 sps:$4 sm:$0xff]   ;;  %v5259_v9 = vld [vmem:[#allocation7 + $0x6e0] ss:$16 sps:$4 sm:$0xff]  }
  0x79   :  { %1582 = vmatpush2.bf16.msra.mxu1 %v5209_v35  ;;  %1542 = vmatprep.subr.bf16.mxu0 %v5210_v36  ;;  %v5264_v10 = vld [vmem:[#allocation7 + $0x4c4] ss:$16 sps:$4 sm:$0xff]   ;;  %v5262_v12 = vld [vmem:[#allocation7 + $0x4c0] ss:$16 sps:$4 sm:$0xff]  }
  0x7a   :  { %1583 = vmatprep.subr.bf16.mxu1 %v5212_v37  ;;  %v5267_v11 = vld [vmem:[#allocation7 + $0x6c4] ss:$16 sps:$4 sm:$0xff]   ;;  %v5265_v13 = vld [vmem:[#allocation7 + $0x6c0] ss:$16 sps:$4 sm:$0xff]  }
  0x7b   :  { %v5270_v14 = vld [vmem:[#allocation7 + $0x4a4] ss:$16 sps:$4 sm:$0xff]   ;;  %v5268_v17 = vld [vmem:[#allocation7 + $0x4a0] ss:$16 sps:$4 sm:$0xff]  }
  0x7c   :  { %1543 = vmatpush2.bf16.msra.mxu0 %v5214_v38  ;;  %v5273_v15 = vld [vmem:[#allocation7 + $0x6a4] ss:$16 sps:$4 sm:$0xff]   ;;  %v5271_v18 = vld [vmem:[#allocation7 + $0x6a0] ss:$16 sps:$4 sm:$0xff]  }
  0x7d   :  { %1584 = vmatpush2.bf16.msra.mxu1 %v5215_v39  ;;  %1544 = vmatprep.subr.bf16.mxu0 %v5216_v40  ;;  %v5276_v19 = vld [vmem:[#allocation7 + $0x484] ss:$16 sps:$4 sm:$0xff]   ;;  %v5274_v21 = vld [vmem:[#allocation7 + $0x480] ss:$16 sps:$4 sm:$0xff]  }
  0x7e   :  { %1585 = vmatprep.subr.bf16.mxu1 %v5218_v41  ;;  %v5279_v20 = vld [vmem:[#allocation7 + $0x684] ss:$16 sps:$4 sm:$0xff]   ;;  %v5277_v22 = vld [vmem:[#allocation7 + $0x680] ss:$16 sps:$4 sm:$0xff]  }
  0x7f   :  { %v5282_v23 = vld [vmem:[#allocation7 + $0x464] ss:$16 sps:$4 sm:$0xff]   ;;  %v5280_v25 = vld [vmem:[#allocation7 + $0x460] ss:$16 sps:$4 sm:$0xff]  }
  0x80   :  { %1545 = vmatpush2.bf16.msra.mxu0 %v5220_v42  ;;  %v5285_v24 = vld [vmem:[#allocation7 + $0x664] ss:$16 sps:$4 sm:$0xff]   ;;  %v5283_v26 = vld [vmem:[#allocation7 + $0x660] ss:$16 sps:$4 sm:$0xff]   ;;  %v5310_v42 = vld [vmem:[#allocation7 + $0xec] ss:$16 sps:$4 sm:$0xff]  }
  0x81   :  { %1586 = vmatpush2.bf16.msra.mxu1 %v5221_v43  ;;  %1546 = vmatprep.subr.bf16.mxu0 %v5222_v44  ;;  %v5288_v27 = vld [vmem:[#allocation7 + $0x444] ss:$16 sps:$4 sm:$0xff]   ;;  %v5286_v29 = vld [vmem:[#allocation7 + $0x440] ss:$16 sps:$4 sm:$0xff]   ;;  %v5307_v44 = vld [vmem:[#allocation2 + $0x18] ss:$0 sps:$4 sm:$0xff]  }
  0x82   :  { %1587 = vmatprep.subr.bf16.mxu1 %v5224_v45  ;;  %v5291_v28 = vld [vmem:[#allocation7 + $0x644] ss:$16 sps:$4 sm:$0xff]   ;;  %v5289_v30 = vld [vmem:[#allocation7 + $0x640] ss:$16 sps:$4 sm:$0xff]   ;;  %v5308_v45 = vld [vmem:[#allocation7 + $0xe8] ss:$16 sps:$4 sm:$0xff]  }
  0x83   :  { %v5294_v31 = vld [vmem:[#allocation7 + $0x424] ss:$16 sps:$4 sm:$0xff]   ;;  %v5292_v34 = vld [vmem:[#allocation7 + $0x420] ss:$16 sps:$4 sm:$0xff]  }
  0x84   :  { %1547 = vmatpush2.bf16.msra.mxu0 %v5226_v49  ;;  %v5297_v32 = vld [vmem:[#allocation7 + $0x624] ss:$16 sps:$4 sm:$0xff]   ;;  %v5295_v36 = vld [vmem:[#allocation7 + $0x620] ss:$16 sps:$4 sm:$0xff]  }
  0x85   :  { %1588 = vmatpush2.bf16.msra.mxu1 %v5227_v50  ;;  %1548 = vmatprep.subr.bf16.mxu0 %v5228_v52  ;;  %v6296_v33 = vld [vmem:[#allocation2 + $0x10] sm:$0xff]  ;;  %v5314_v50 = vld [vmem:[#allocation7 + $0xc8] ss:$16 sps:$4 sm:$0xff]  }
  0x86   :  { %1589 = vmatprep.subr.bf16.mxu1 %v5230_v53  ;;  %v6300_v35 = vcombine.high %v6296_v33, %v6296_v33  ;;  %v5300_v37 = vld [vmem:[#allocation7 + $0x404] ss:$16 sps:$4 sm:$0xff]   ;;  %v5298_v39 = vld [vmem:[#allocation7 + $0x400] ss:$16 sps:$4 sm:$0xff]   ;;  %v5322_v53 = vld [vmem:[#allocation7 + $0xac] ss:$16 sps:$4 sm:$0xff]  }
  0x87   :  { %v5303_v38 = vld [vmem:[#allocation7 + $0x604] ss:$16 sps:$4 sm:$0xff]   ;;  %v5301_v40 = vld [vmem:[#allocation7 + $0x600] ss:$16 sps:$4 sm:$0xff]  }
  0x88   :  { %1549 = vmatpush2.bf16.msra.mxu0 %v5232_v54  ;;  %v5306_v41 = vld [vmem:[#allocation7 + $0x5e4] ss:$16 sps:$4 sm:$0xff]   ;;  %v5304_v43 = vld [vmem:[#allocation7 + $0x5e0] ss:$16 sps:$4 sm:$0xff]  }
  0x89   :  { %1590 = vmatpush2.bf16.msra.mxu1 %v5233_v55  ;;  %1550 = vmatprep.subr.bf16.mxu0 %v5234_v56  ;;  %v5313_v46 = vld [vmem:[#allocation7 + $0x5c4] ss:$16 sps:$4 sm:$0xff]   ;;  %v5311_v49 = vld [vmem:[#allocation7 + $0x5c0] ss:$16 sps:$4 sm:$0xff]   ;;  %v5320_v55 = vld [vmem:[#allocation7 + $0xa8] ss:$16 sps:$4 sm:$0xff]  }
  0x8a   :  { %1591 = vmatprep.subr.bf16.mxu1 %v5236_v57  ;;  %v5319_v52 = vld [vmem:[#allocation7 + $0x5a4] ss:$16 sps:$4 sm:$0xff]   ;;  %v5317_v54 = vld [vmem:[#allocation7 + $0x5a0] ss:$16 sps:$4 sm:$0xff]   ;;  %v5328_v57 = vld [vmem:[#allocation7 + $0x8c] ss:$16 sps:$4 sm:$0xff]  }
  0x8b   :  { %v5325_v56 = vld [vmem:[#allocation7 + $0x584] ss:$16 sps:$4 sm:$0xff]  }
  0x8c   :  { %1551 = vmatpush2.bf16.msra.mxu0 %v5238_v58  ;;  %v5323_v58 = vld [vmem:[#allocation7 + $0x580] ss:$16 sps:$4 sm:$0xff]  }
  0x8d   :  { %1592 = vmatpush2.bf16.msra.mxu1 %v5239_v59  ;;  %1552 = vmatprep.subr.bf16.mxu0 %v5240_v60  ;;  %v5326_v59 = vld [vmem:[#allocation7 + $0x88] ss:$16 sps:$4 sm:$0xff]   ;;  %v5331_v60 = vld [vmem:[#allocation7 + $0x564] ss:$16 sps:$4 sm:$0xff]  }
  0x8e   :  { %1593 = vmatprep.subr.bf16.mxu1 %v5242_v61  ;;  %v5334_v61 = vld [vmem:[#allocation7 + $0x6c] ss:$16 sps:$4 sm:$0xff]  }
  0x90   :  { %1553 = vmatpush2.bf16.msra.mxu0 %v5244_v62  ;;  %v5329_v62 = vld [vmem:[#allocation7 + $0x560] ss:$16 sps:$4 sm:$0xff]  }
  0x91   :  { %1594 = vmatpush2.bf16.msra.mxu1 %v5245_v63  ;;  %1554 = vmatprep.subr.bf16.mxu0 %v5246_v0  ;;  %v5337_v63 = vld [vmem:[#allocation7 + $0x544] ss:$16 sps:$4 sm:$0xff]   ;;  %v5340_v0 = vld [vmem:[#allocation7 + $0x4c] ss:$16 sps:$4 sm:$0xff]  }
  0x92   :  { %1595 = vmatprep.subr.bf16.mxu1 %v5248_v1  ;;  %v5335_v1 = vld [vmem:[#allocation7 + $0x540] ss:$16 sps:$4 sm:$0xff]  }
  0x94   :  { %1555 = vmatpush2.bf16.msra.mxu0 %v5250_v2  ;;  %v5338_v2 = vld [vmem:[#allocation7 + $0x48] ss:$16 sps:$4 sm:$0xff]  }
  0x95   :  { %1596 = vmatpush2.bf16.msra.mxu1 %v5251_v3  ;;  %1606 = vmatprep.subr.bf16.mxu0 %v5258_v4  ;;  %v5343_v3 = vld [vmem:[#allocation7 + $0x524] ss:$16 sps:$4 sm:$0xff]   ;;  %v5346_v4 = vld [vmem:[#allocation7 + $0x2c] ss:$16 sps:$4 sm:$0xff]  }
  0x96   :  { %1647 = vmatprep.subr.bf16.mxu1 %v5261_v5  ;;  %v5341_v5 = vld [vmem:[#allocation7 + $0x520] ss:$16 sps:$4 sm:$0xff]  }
  0x97   :  { %1557 = vmatmul.mubr.bf16.vlgmr.msra.gmra.mxu0 %v6289_v6 }
  0x98   :  { %1598 = vmatmul.mubr.bf16.vlgmr.msra.gmra.mxu1 %v6291_v7  ;;  %1607 = vmatpush1.bf16.msra.mxu0 %v5256_v8  ;;  %v5344_v8 = vld [vmem:[#allocation7 + $0x28] ss:$16 sps:$4 sm:$0xff]  }
  0x99   :  { %1648 = vmatpush1.bf16.msra.mxu1 %v5259_v9  ;;  %1608 = vmatprep.subr.bf16.mxu0 %v5264_v10  ;;  %v5349_v9 = vld [vmem:[#allocation7 + $0x504] ss:$16 sps:$4 sm:$0xff]   ;;  %v5352_v10 = vld [vmem:[#allocation7 + $0xc] ss:$16 sps:$4 sm:$0xff]  }
  0x9a   :  { %1649 = vmatprep.subr.bf16.mxu1 %v5267_v11  ;;  %1679 = vmatprep.mubr.bf16.mxu1 %v6199_v16  ;;  %v5347_v11 = vld [vmem:[#allocation7 + $0x500] ss:$16 sps:$4 sm:$0xff]  }
  0x9b   :  { %1638 = vmatprep.mubr.bf16.mxu0 %v6300_v35 }
  0x9c   :  { %1609 = vmatpush1.bf16.msra.mxu0 %v5262_v12  ;;  %v5350_v12 = vld [vmem:[#allocation7 + $0x8] ss:$16 sps:$4 sm:$0xff]  }
  0x9d   :  { %1650 = vmatpush1.bf16.msra.mxu1 %v5265_v13  ;;  %1610 = vmatprep.subr.bf16.mxu0 %v5270_v14  ;;  %v5357_v13 = vld [vmem:[#allocation7 + $0x1ec] ss:$16 sps:$4 sm:$0xff]  }
  0x9e   :  { %1651 = vmatprep.subr.bf16.mxu1 %v5273_v15  ;;  %v5360_v14 = vld [vmem:[#allocation7 + $0x2ec] ss:$16 sps:$4 sm:$0xff]   ;;  %v6306_v15 = vcombine.low %v6296_v33, %v6296_v33  ;;  %v5379_v33 = vld [vmem:[#allocation7 + $0x168] ss:$16 sps:$4 sm:$0xff]  }
  0xa0   :  { %1611 = vmatpush1.bf16.msra.mxu0 %v5268_v17  ;;  %v5355_v17 = vld [vmem:[#allocation7 + $0x1e8] ss:$16 sps:$4 sm:$0xff]  }
  0xa1   :  { %1652 = vmatpush1.bf16.msra.mxu1 %v5271_v18  ;;  %1612 = vmatprep.subr.bf16.mxu0 %v5276_v19  ;;  %v5358_v18 = vld [vmem:[#allocation7 + $0x2e8] ss:$16 sps:$4 sm:$0xff]   ;;  %v5363_v19 = vld [vmem:[#allocation7 + $0x1cc] ss:$16 sps:$4 sm:$0xff]  }
  0xa2   :  { %1653 = vmatprep.subr.bf16.mxu1 %v5279_v20  ;;  %v5366_v20 = vld [vmem:[#allocation7 + $0x2cc] ss:$16 sps:$4 sm:$0xff]  }
  0xa4   :  { %1613 = vmatpush1.bf16.msra.mxu0 %v5274_v21  ;;  %v5361_v21 = vld [vmem:[#allocation7 + $0x1c8] ss:$16 sps:$4 sm:$0xff]  }
  0xa5   :  { %1654 = vmatpush1.bf16.msra.mxu1 %v5277_v22  ;;  %1614 = vmatprep.subr.bf16.mxu0 %v5282_v23  ;;  %v5364_v22 = vld [vmem:[#allocation7 + $0x2c8] ss:$16 sps:$4 sm:$0xff]   ;;  %v5369_v23 = vld [vmem:[#allocation7 + $0x1ac] ss:$16 sps:$4 sm:$0xff]  }
  0xa6   :  { %1655 = vmatprep.subr.bf16.mxu1 %v5285_v24  ;;  %v5372_v24 = vld [vmem:[#allocation7 + $0x2ac] ss:$16 sps:$4 sm:$0xff]  }
  0xa8   :  { %1615 = vmatpush1.bf16.msra.mxu0 %v5280_v25  ;;  %v5367_v25 = vld [vmem:[#allocation7 + $0x1a8] ss:$16 sps:$4 sm:$0xff]  }
  0xa9   :  { %1656 = vmatpush1.bf16.msra.mxu1 %v5283_v26  ;;  %1616 = vmatprep.subr.bf16.mxu0 %v5288_v27  ;;  %v5370_v26 = vld [vmem:[#allocation7 + $0x2a8] ss:$16 sps:$4 sm:$0xff]   ;;  %v5375_v27 = vld [vmem:[#allocation7 + $0x18c] ss:$16 sps:$4 sm:$0xff]  }
  0xaa   :  { %1657 = vmatprep.subr.bf16.mxu1 %v5291_v28  ;;  %v5378_v28 = vld [vmem:[#allocation7 + $0x28c] ss:$16 sps:$4 sm:$0xff]  }
  0xac   :  { %1617 = vmatpush1.bf16.msra.mxu0 %v5286_v29  ;;  %v5373_v29 = vld [vmem:[#allocation7 + $0x188] ss:$16 sps:$4 sm:$0xff]  }
  0xad   :  { %1658 = vmatpush1.bf16.msra.mxu1 %v5289_v30  ;;  %1618 = vmatprep.subr.bf16.mxu0 %v5294_v31  ;;  %v5376_v30 = vld [vmem:[#allocation7 + $0x288] ss:$16 sps:$4 sm:$0xff]   ;;  %v5381_v31 = vld [vmem:[#allocation7 + $0x16c] ss:$16 sps:$4 sm:$0xff]  }
  0xae   :  { %1659 = vmatprep.subr.bf16.mxu1 %v5297_v32  ;;  %v5384_v32 = vld [vmem:[#allocation7 + $0x26c] ss:$16 sps:$4 sm:$0xff]  }
  0xb0   :  { %1619 = vmatpush1.bf16.msra.mxu0 %v5292_v34  ;;  %v5387_v34 = vld [vmem:[#allocation7 + $0x14c] ss:$16 sps:$4 sm:$0xff]  }
  0xb1   :  { %1660 = vmatpush1.bf16.msra.mxu1 %v5295_v36  ;;  %1620 = vmatprep.subr.bf16.mxu0 %v5300_v37  ;;  %v5390_v36 = vld [vmem:[#allocation7 + $0x24c] ss:$16 sps:$4 sm:$0xff]   ;;  %v5385_v37 = vld [vmem:[#allocation7 + $0x148] ss:$16 sps:$4 sm:$0xff]  }
  0xb2   :  { %1661 = vmatprep.subr.bf16.mxu1 %v5303_v38  ;;  %v5388_v38 = vld [vmem:[#allocation7 + $0x248] ss:$16 sps:$4 sm:$0xff]  }
  0xb4   :  { %1621 = vmatpush1.bf16.msra.mxu0 %v5298_v39  ;;  %v5393_v39 = vld [vmem:[#allocation7 + $0x12c] ss:$16 sps:$4 sm:$0xff]  }
  0xb5   :  { %1662 = vmatpush1.bf16.msra.mxu1 %v5301_v40  ;;  %1622 = vmatprep.subr.bf16.mxu0 %v5306_v41  ;;  %v5396_v40 = vld [vmem:[#allocation7 + $0x22c] ss:$16 sps:$4 sm:$0xff]   ;;  %v5391_v41 = vld [vmem:[#allocation7 + $0x128] ss:$16 sps:$4 sm:$0xff]  }
  0xb6   :  { %1688 = vmatprep.subr.bf16.mxu1 %v5310_v42  ;;  %v5394_v42 = vld [vmem:[#allocation7 + $0x228] ss:$16 sps:$4 sm:$0xff]  }
  0xb8   :  { %1680 = vmatmul.mubr.bf16.vlgmr.msra.gmra.mxu1 %v5307_v44  ;;  %1623 = vmatpush2.bf16.msra.mxu0 %v5304_v43  ;;  %v5399_v43 = vld [vmem:[#allocation7 + $0x10c] ss:$16 sps:$4 sm:$0xff]  }
  0xb9   :  { %1689 = vmatpush1.bf16.msra.mxu1 %v5308_v45  ;;  %1624 = vmatprep.subr.bf16.mxu0 %v5313_v46  ;;  %v5402_v44 = vld [vmem:[#allocation7 + $0x20c] ss:$16 sps:$4 sm:$0xff]   ;;  %v5397_v45 = vld [vmem:[#allocation7 + $0x108] ss:$16 sps:$4 sm:$0xff]  }
  0xba   :  { %1690 = vmatprep.subr.bf16.mxu1 %v5316_v48  ;;  %1720 = vmatprep.mubr.bf16.mxu1 %v6283_v47  ;;  %v5332_v47 = vld [vmem:[#allocation7 + $0x68] ss:$16 sps:$4 sm:$0xff]   ;;  %v5405_v48 = vld [vmem:[#allocation7 + $0x3ec] ss:$16 sps:$4 sm:$0xff]  }
  0xbb   :  { %v5400_v46 = vld [vmem:[#allocation7 + $0x208] ss:$16 sps:$4 sm:$0xff]  }
  0xbc   :  { %1625 = vmatpush2.bf16.msra.mxu0 %v5311_v49  ;;  %v5408_v49 = vld [vmem:[#allocation7 + $0x4ec] ss:$16 sps:$4 sm:$0xff]  }
  0xbd   :  { %1691 = vmatpush1.bf16.msra.mxu1 %v5314_v50  ;;  %1626 = vmatprep.subr.bf16.mxu0 %v5319_v52  ;;  %v5403_v50 = vld [vmem:[#allocation7 + $0x3e8] ss:$16 sps:$4 sm:$0xff]  }
  0xbe   :  { %1692 = vmatprep.subr.bf16.mxu1 %v5322_v53  ;;  %v5406_v52 = vld [vmem:[#allocation7 + $0x4e8] ss:$16 sps:$4 sm:$0xff]   ;;  %v5411_v53 = vld [vmem:[#allocation7 + $0x3cc] ss:$16 sps:$4 sm:$0xff]  }
  0xc0   :  { %1627 = vmatpush2.bf16.msra.mxu0 %v5317_v54  ;;  %v5414_v54 = vld [vmem:[#allocation7 + $0x4cc] ss:$16 sps:$4 sm:$0xff]  }
  0xc1   :  { %1693 = vmatpush1.bf16.msra.mxu1 %v5320_v55  ;;  %1628 = vmatprep.subr.bf16.mxu0 %v5325_v56  ;;  %v5409_v55 = vld [vmem:[#allocation7 + $0x3c8] ss:$16 sps:$4 sm:$0xff]  }
  0xc2   :  { %1694 = vmatprep.subr.bf16.mxu1 %v5328_v57  ;;  %v5412_v56 = vld [vmem:[#allocation7 + $0x4c8] ss:$16 sps:$4 sm:$0xff]   ;;  %v5417_v57 = vld [vmem:[#allocation7 + $0x3ac] ss:$16 sps:$4 sm:$0xff]  }
  0xc4   :  { %1629 = vmatpush2.bf16.msra.mxu0 %v5323_v58  ;;  %v5420_v58 = vld [vmem:[#allocation7 + $0x4ac] ss:$16 sps:$4 sm:$0xff]  }
  0xc5   :  { %1695 = vmatpush1.bf16.msra.mxu1 %v5326_v59  ;;  %1630 = vmatprep.subr.bf16.mxu0 %v5331_v60  ;;  %v5415_v59 = vld [vmem:[#allocation7 + $0x3a8] ss:$16 sps:$4 sm:$0xff]  }
  0xc6   :  { %1696 = vmatprep.subr.bf16.mxu1 %v5334_v61  ;;  %v5418_v60 = vld [vmem:[#allocation7 + $0x4a8] ss:$16 sps:$4 sm:$0xff]   ;;  %v5423_v61 = vld [vmem:[#allocation7 + $0x38c] ss:$16 sps:$4 sm:$0xff]  }
  0xc8   :  { %1631 = vmatpush2.bf16.msra.mxu0 %v5329_v62  ;;  %v5426_v62 = vld [vmem:[#allocation7 + $0x48c] ss:$16 sps:$4 sm:$0xff]  }
  0xc9   :  { %1697 = vmatpush1.bf16.msra.mxu1 %v5332_v47  ;;  %1632 = vmatprep.subr.bf16.mxu0 %v5337_v63  ;;  %v5421_v47 = vld [vmem:[#allocation7 + $0x388] ss:$16 sps:$4 sm:$0xff]   ;;  %v5429_v63 = vld [vmem:[#allocation7 + $0x36c] ss:$16 sps:$4 sm:$0xff]  }
  0xca   :  { %1698 = vmatprep.subr.bf16.mxu1 %v5340_v0  ;;  %v5432_v0 = vld [vmem:[#allocation7 + $0x46c] ss:$16 sps:$4 sm:$0xff]  }
  0xcc   :  { %1633 = vmatpush2.bf16.msra.mxu0 %v5335_v1  ;;  %v5427_v1 = vld [vmem:[#allocation7 + $0x368] ss:$16 sps:$4 sm:$0xff]  }
  0xcd   :  { %1699 = vmatpush1.bf16.msra.mxu1 %v5338_v2  ;;  %1634 = vmatprep.subr.bf16.mxu0 %v5343_v3  ;;  %v5430_v2 = vld [vmem:[#allocation7 + $0x468] ss:$16 sps:$4 sm:$0xff]   ;;  %v5435_v3 = vld [vmem:[#allocation7 + $0x34c] ss:$16 sps:$4 sm:$0xff]  }
  0xce   :  { %1700 = vmatprep.subr.bf16.mxu1 %v5346_v4  ;;  %v5438_v4 = vld [vmem:[#allocation7 + $0x44c] ss:$16 sps:$4 sm:$0xff]  }
  0xd0   :  { %1635 = vmatpush2.bf16.msra.mxu0 %v5341_v5  ;;  %v5436_v5 = vld [vmem:[#allocation7 + $0x448] ss:$16 sps:$4 sm:$0xff]  }
  0xd1   :  { %1701 = vmatpush1.bf16.msra.mxu1 %v5344_v8  ;;  %1636 = vmatprep.subr.bf16.mxu0 %v5349_v9  ;;  %v5441_v8 = vld [vmem:[#allocation7 + $0x32c] ss:$16 sps:$4 sm:$0xff]  }
  0xd2   :  { %1702 = vmatprep.subr.bf16.mxu1 %v5352_v10  ;;  %v5444_v9 = vld [vmem:[#allocation7 + $0x42c] ss:$16 sps:$4 sm:$0xff]   ;;  %v5439_v10 = vld [vmem:[#allocation7 + $0x328] ss:$16 sps:$4 sm:$0xff]  }
  0xd4   :  { %1637 = vmatpush2.bf16.msra.mxu0 %v5347_v11  ;;  %v5442_v11 = vld [vmem:[#allocation7 + $0x428] ss:$16 sps:$4 sm:$0xff]  }
  0xd5   :  { %1703 = vmatpush1.bf16.msra.mxu1 %v5350_v12  ;;  %1729 = vmatprep.subr.bf16.mxu0 %v5360_v14  ;;  %v5447_v12 = vld [vmem:[#allocation7 + $0x30c] ss:$16 sps:$4 sm:$0xff]   ;;  %v5445_v14 = vld [vmem:[#allocation7 + $0x308] ss:$16 sps:$4 sm:$0xff]  }
  0xd6   :  { %1704 = vmatprep.subr.bf16.mxu1 %v5357_v13  ;;  %v5450_v13 = vld [vmem:[#allocation7 + $0x40c] ss:$16 sps:$4 sm:$0xff]  }
  0xd7   :  { %1639 = vmatmul.mubr.bf16.vlgmr.msra.gmra.mxu0 %v6306_v15 }
  0xd8   :  { %1730 = vmatpush1.bf16.msra.mxu0 %v5358_v18  ;;  %1761 = vmatprep.mubr.bf16.mxu0 %v6285_v51  ;;  %v5382_v51 = vld [vmem:[#allocation7 + $0x268] ss:$16 sps:$4 sm:$0xff]   ;;  %v5453_v18 = vld [vmem:[#allocation7 + $0x5ec] ss:$16 sps:$4 sm:$0xff]  }
  0xd9   :  { %1705 = vmatpush2.bf16.msra.mxu1 %v5355_v17  ;;  %1731 = vmatprep.subr.bf16.mxu0 %v5366_v20  ;;  %v5448_v17 = vld [vmem:[#allocation7 + $0x408] ss:$16 sps:$4 sm:$0xff]  }
  0xda   :  { %1706 = vmatprep.subr.bf16.mxu1 %v5363_v19  ;;  %v5456_v19 = vld [vmem:[#allocation7 + $0x6ec] ss:$16 sps:$4 sm:$0xff]   ;;  %v5451_v20 = vld [vmem:[#allocation7 + $0x5e8] ss:$16 sps:$4 sm:$0xff]  }
  0xdc   :  { %1732 = vmatpush1.bf16.msra.mxu0 %v5364_v22  ;;  %v5459_v22 = vld [vmem:[#allocation7 + $0x5cc] ss:$16 sps:$4 sm:$0xff]  }
  0xdd   :  { %1707 = vmatpush2.bf16.msra.mxu1 %v5361_v21  ;;  %1733 = vmatprep.subr.bf16.mxu0 %v5372_v24  ;;  %v5454_v21 = vld [vmem:[#allocation7 + $0x6e8] ss:$16 sps:$4 sm:$0xff]  }
  0xde   :  { %1708 = vmatprep.subr.bf16.mxu1 %v5369_v23  ;;  %v5462_v23 = vld [vmem:[#allocation7 + $0x6cc] ss:$16 sps:$4 sm:$0xff]   ;;  %v5457_v24 = vld [vmem:[#allocation7 + $0x5c8] ss:$16 sps:$4 sm:$0xff]  }
  0xe0   :  { %1734 = vmatpush1.bf16.msra.mxu0 %v5370_v26  ;;  %v5465_v26 = vld [vmem:[#allocation7 + $0x5ac] ss:$16 sps:$4 sm:$0xff]  }
  0xe1   :  { %1709 = vmatpush2.bf16.msra.mxu1 %v5367_v25  ;;  %1735 = vmatprep.subr.bf16.mxu0 %v5378_v28  ;;  %v5460_v25 = vld [vmem:[#allocation7 + $0x6c8] ss:$16 sps:$4 sm:$0xff]  }
  0xe2   :  { %1710 = vmatprep.subr.bf16.mxu1 %v5375_v27  ;;  %v5468_v27 = vld [vmem:[#allocation7 + $0x6ac] ss:$16 sps:$4 sm:$0xff]   ;;  %v5463_v28 = vld [vmem:[#allocation7 + $0x5a8] ss:$16 sps:$4 sm:$0xff]  }
  0xe4   :  { %1736 = vmatpush1.bf16.msra.mxu0 %v5376_v30  ;;  %v5471_v30 = vld [vmem:[#allocation7 + $0x58c] ss:$16 sps:$4 sm:$0xff]  }
  0xe5   :  { %1711 = vmatpush2.bf16.msra.mxu1 %v5373_v29  ;;  %1737 = vmatprep.subr.bf16.mxu0 %v5384_v32  ;;  %v5466_v29 = vld [vmem:[#allocation7 + $0x6a8] ss:$16 sps:$4 sm:$0xff]  }
  0xe6   :  { %1712 = vmatprep.subr.bf16.mxu1 %v5381_v31  ;;  %v5474_v31 = vld [vmem:[#allocation7 + $0x68c] ss:$16 sps:$4 sm:$0xff]   ;;  %v5469_v32 = vld [vmem:[#allocation7 + $0x588] ss:$16 sps:$4 sm:$0xff]  }
  0xe8   :  { %1738 = vmatpush1.bf16.msra.mxu0 %v5382_v51  ;;  %v5477_v51 = vld [vmem:[#allocation7 + $0x56c] ss:$16 sps:$4 sm:$0xff]  }
  0xe9   :  { %1713 = vmatpush2.bf16.msra.mxu1 %v5379_v33  ;;  %1739 = vmatprep.subr.bf16.mxu0 %v5390_v36  ;;  %v5472_v33 = vld [vmem:[#allocation7 + $0x688] ss:$16 sps:$4 sm:$0xff]  }
  0xea   :  { %1714 = vmatprep.subr.bf16.mxu1 %v5387_v34  ;;  %v5475_v34 = vld [vmem:[#allocation7 + $0x568] ss:$16 sps:$4 sm:$0xff]  }
  0xeb   :  { %v5478_v36 = vld [vmem:[#allocation7 + $0x668] ss:$16 sps:$4 sm:$0xff]  }
  0xec   :  { %1740 = vmatpush1.bf16.msra.mxu0 %v5388_v38  ;;  %v5486_v38 = vld [vmem:[#allocation7 + $0x64c] ss:$16 sps:$4 sm:$0xff]  }
  0xed   :  { %1715 = vmatpush2.bf16.msra.mxu1 %v5385_v37  ;;  %1741 = vmatprep.subr.bf16.mxu0 %v5396_v40  ;;  %v5483_v37 = vld [vmem:[#allocation7 + $0x54c] ss:$16 sps:$4 sm:$0xff]   ;;  %v5484_v40 = vld [vmem:[#allocation7 + $0x648] ss:$16 sps:$4 sm:$0xff]  }
  0xee   :  { %1716 = vmatprep.subr.bf16.mxu1 %v5393_v39  ;;  %v5481_v39 = vld [vmem:[#allocation7 + $0x548] ss:$16 sps:$4 sm:$0xff]  }
  0xf0   :  { %1742 = vmatpush1.bf16.msra.mxu0 %v5394_v42  ;;  %v5492_v42 = vld [vmem:[#allocation7 + $0x62c] ss:$16 sps:$4 sm:$0xff]  }
  0xf1   :  { %1717 = vmatpush2.bf16.msra.mxu1 %v5391_v41  ;;  %1743 = vmatprep.subr.bf16.mxu0 %v5402_v44  ;;  %v5489_v41 = vld [vmem:[#allocation7 + $0x52c] ss:$16 sps:$4 sm:$0xff]   ;;  %v5490_v44 = vld [vmem:[#allocation7 + $0x628] ss:$16 sps:$4 sm:$0xff]  }
  0xf2   :  { %1718 = vmatprep.subr.bf16.mxu1 %v5399_v43  ;;  %v5487_v43 = vld [vmem:[#allocation7 + $0x528] ss:$16 sps:$4 sm:$0xff]  }
  0xf4   :  { %1744 = vmatpush1.bf16.msra.mxu0 %v5400_v46  ;;  %v5498_v46 = vld [vmem:[#allocation7 + $0x60c] ss:$16 sps:$4 sm:$0xff]  }
  0xf5   :  { %1719 = vmatpush2.bf16.msra.mxu1 %v5397_v45  ;;  %1745 = vmatprep.subr.bf16.mxu0 %v5405_v48  ;;  %v5495_v45 = vld [vmem:[#allocation7 + $0x50c] ss:$16 sps:$4 sm:$0xff]   ;;  %v5493_v48 = vld [vmem:[#allocation7 + $0x508] ss:$16 sps:$4 sm:$0xff]  }
  0xf6   :  { %1770 = vmatprep.subr.bf16.mxu1 %v5408_v49  ;;  %v5496_v49 = vld [vmem:[#allocation7 + $0x608] ss:$16 sps:$4 sm:$0xff]  }
  0xf8   :  { %1721 = vmatmul.mubr.bf16.vlgmr.msra.gmra.mxu1 %v6289_v6  ;;  %1746 = vmatpush2.bf16.msra.mxu0 %v5403_v50  ;;  %v5424_v6 = vld [vmem:[#allocation7 + $0x488] ss:$16 sps:$4 sm:$0xff]   ;;  %v5501_v50 = vld [vmem:[#allocation8 + $0x74] ss:$8 sps:$4 sm:$0xff]  }
  0xf9   :  { %1771 = vmatpush1.bf16.msra.mxu1 %v5406_v52  ;;  %1747 = vmatprep.subr.bf16.mxu0 %v5411_v53  ;;  %v5499_v52 = vld [vmem:[#allocation8 + $0x70] ss:$8 sps:$4 sm:$0xff]   ;;  %v5504_v53 = vld [vmem:[#allocation8 + $0x64] ss:$8 sps:$4 sm:$0xff]  }
  0xfa   :  { %1772 = vmatprep.subr.bf16.mxu1 %v5414_v54  ;;  %1802 = vmatprep.mubr.bf16.mxu1 %v6300_v35  ;;  %v5433_v35 = vld [vmem:[#allocation7 + $0x348] ss:$16 sps:$4 sm:$0xff]  }
  0xfb   :  { %v5502_v54 = vld [vmem:[#allocation8 + $0x60] ss:$8 sps:$4 sm:$0xff]  }
  0xfc   :  { %1748 = vmatpush2.bf16.msra.mxu0 %v5409_v55  ;;  %v5993_v55 = vld [vmem:[#allocation2 + $0x18] ss:$0 sps:$4 sm:$0xff]  }
  0xfd   :  { %1773 = vmatpush1.bf16.msra.mxu1 %v5412_v56  ;;  %1749 = vmatprep.subr.bf16.mxu0 %v5417_v57  ;;  %v5507_v56 = vld [vmem:[#allocation8 + $0x54] ss:$8 sps:$4 sm:$0xff]   ;;  %v5505_v57 = vld [vmem:[#allocation8 + $0x50] ss:$8 sps:$4 sm:$0xff]  }
  0xfe   :  { %1774 = vmatprep.subr.bf16.mxu1 %v5420_v58  ;;  %v5510_v58 = vld [vmem:[#allocation8 + $0x44] ss:$8 sps:$4 sm:$0xff]  }
 0x100   :  { %1750 = vmatpush2.bf16.msra.mxu0 %v5415_v59  ;;  %v5547_v59 = vld [vmem:[#allocation8 + $0x170] ss:$8 sps:$4 sm:$0xff]  }
 0x101   :  { %1775 = vmatpush1.bf16.msra.mxu1 %v5418_v60  ;;  %1751 = vmatprep.subr.bf16.mxu0 %v5423_v61  ;;  %v5549_v60 = vld [vmem:[#allocation8 + $0x174] ss:$8 sps:$4 sm:$0xff]   ;;  %v5552_v61 = vld [vmem:[#allocation8 + $0x164] ss:$8 sps:$4 sm:$0xff]  }
 0x102   :  { %1776 = vmatprep.subr.bf16.mxu1 %v5426_v62  ;;  %v5508_v62 = vld [vmem:[#allocation8 + $0x40] ss:$8 sps:$4 sm:$0xff]  }
 0x104   :  { %1752 = vmatpush2.bf16.msra.mxu0 %v5421_v47  ;;  %v5513_v47 = vld [vmem:[#allocation8 + $0x34] ss:$8 sps:$4 sm:$0xff]  }
 0x105   :  { %1777 = vmatpush1.bf16.msra.mxu1 %v5424_v6  ;;  %1753 = vmatprep.subr.bf16.mxu0 %v5429_v63  ;;  %v5550_v6 = vld [vmem:[#allocation8 + $0x160] ss:$8 sps:$4 sm:$0xff]   ;;  %v5555_v63 = vld [vmem:[#allocation8 + $0x154] ss:$8 sps:$4 sm:$0xff]  }
 0x106   :  { %1778 = vmatprep.subr.bf16.mxu1 %v5432_v0  ;;  %v5553_v0 = vld [vmem:[#allocation8 + $0x150] ss:$8 sps:$4 sm:$0xff]  }
 0x108   :  { %1754 = vmatpush2.bf16.msra.mxu0 %v5427_v1  ;;  %v5516_v1 = vld [vmem:[#allocation8 + $0x24] ss:$8 sps:$4 sm:$0xff]  }
 0x109   :  { %1779 = vmatpush1.bf16.msra.mxu1 %v5430_v2  ;;  %1755 = vmatprep.subr.bf16.mxu0 %v5435_v3  ;;  %v5558_v2 = vld [vmem:[#allocation8 + $0x144] ss:$8 sps:$4 sm:$0xff]   ;;  %v5514_v3 = vld [vmem:[#allocation8 + $0x20] ss:$8 sps:$4 sm:$0xff]  }
 0x10a   :  { %1780 = vmatprep.subr.bf16.mxu1 %v5438_v4  ;;  %v5556_v4 = vld [vmem:[#allocation8 + $0x140] ss:$8 sps:$4 sm:$0xff]  }
 0x10c   :  { %1756 = vmatpush2.bf16.msra.mxu0 %v5433_v35  ;;  %v5519_v35 = vld [vmem:[#allocation8 + $0x14] ss:$8 sps:$4 sm:$0xff]  }
 0x10d   :  { %1781 = vmatpush1.bf16.msra.mxu1 %v5436_v5  ;;  %1757 = vmatprep.subr.bf16.mxu0 %v5441_v8  ;;  %v5561_v5 = vld [vmem:[#allocation8 + $0x134] ss:$8 sps:$4 sm:$0xff]   ;;  %v5517_v8 = vld [vmem:[#allocation8 + $0x10] ss:$8 sps:$4 sm:$0xff]  }
 0x10e   :  { %1782 = vmatprep.subr.bf16.mxu1 %v5444_v9  ;;  %v5559_v9 = vld [vmem:[#allocation8 + $0x130] ss:$8 sps:$4 sm:$0xff]  }
 0x110   :  { %1758 = vmatpush2.bf16.msra.mxu0 %v5439_v10  ;;  %v5522_v10 = vld [vmem:[#allocation8 + $0x4] ss:$8 sps:$4 sm:$0xff]  }
 0x111   :  { %1783 = vmatpush1.bf16.msra.mxu1 %v5442_v11  ;;  %1759 = vmatprep.subr.bf16.mxu0 %v5447_v12  ;;  %v5520_v11 = vld [vmem:[#allocation8] ss:$8 sps:$4 sm:$0xff]   ;;  %v5525_v12 = vld [vmem:[#allocation8 + $0xf4] ss:$8 sps:$4 sm:$0xff]  }
 0x112   :  { %1784 = vmatprep.subr.bf16.mxu1 %v5450_v13  ;;  %v5523_v13 = vld [vmem:[#allocation8 + $0xf0] ss:$8 sps:$4 sm:$0xff]  }
 0x114   :  { %1760 = vmatpush2.bf16.msra.mxu0 %v5445_v14  ;;  %v5528_v14 = vld [vmem:[#allocation8 + $0xe4] ss:$8 sps:$4 sm:$0xff]  }
 0x115   :  { %1785 = vmatpush1.bf16.msra.mxu1 %v5448_v17  ;;  %1811 = vmatprep.subr.bf16.mxu0 %v5456_v19  ;;  %v5564_v17 = vld [vmem:[#allocation8 + $0x124] ss:$8 sps:$4 sm:$0xff]   ;;  %v5562_v19 = vld [vmem:[#allocation8 + $0x120] ss:$8 sps:$4 sm:$0xff]  }
 0x116   :  { %1786 = vmatprep.subr.bf16.mxu1 %v5453_v18  ;;  %v5526_v18 = vld [vmem:[#allocation8 + $0xe0] ss:$8 sps:$4 sm:$0xff]  }
 0x117   :  { %1762 = vmatmul.mubr.bf16.vlgmr.msra.gmra.mxu0 %v6291_v7  ;;  %v5480_v7 = vld [vmem:[#allocation7 + $0x66c] ss:$16 sps:$4 sm:$0xff]  }
 0x118   :  { %1812 = vmatpush1.bf16.msra.mxu0 %v5454_v21  ;;  %1843 = vmatprep.mubr.bf16.mxu0 %v6199_v16 }
 0x119   :  { %1787 = vmatpush2.bf16.msra.mxu1 %v5451_v20  ;;  %1813 = vmatprep.subr.bf16.mxu0 %v5462_v23 }
 0x11a   :  { %1788 = vmatprep.subr.bf16.mxu1 %v5459_v22  ;;  %v5531_v22 = vld [vmem:[#allocation8 + $0xd4] ss:$8 sps:$4 sm:$0xff]  }
 0x11c   :  { %1814 = vmatpush1.bf16.msra.mxu0 %v5460_v25  ;;  %v5567_v25 = vld [vmem:[#allocation8 + $0x114] ss:$8 sps:$4 sm:$0xff]  }
 0x11d   :  { %1789 = vmatpush2.bf16.msra.mxu1 %v5457_v24  ;;  %1815 = vmatprep.subr.bf16.mxu0 %v5468_v27  ;;  %v5565_v27 = vld [vmem:[#allocation8 + $0x110] ss:$8 sps:$4 sm:$0xff]  }
 0x11e   :  { %1790 = vmatprep.subr.bf16.mxu1 %v5465_v26  ;;  %v5529_v26 = vld [vmem:[#allocation8 + $0xd0] ss:$8 sps:$4 sm:$0xff]  }
 0x120   :  { %1816 = vmatpush1.bf16.msra.mxu0 %v5466_v29 }
 0x121   :  { %1791 = vmatpush2.bf16.msra.mxu1 %v5463_v28  ;;  %1817 = vmatprep.subr.bf16.mxu0 %v5474_v31 }
 0x122   :  { %1792 = vmatprep.subr.bf16.mxu1 %v5471_v30 }
 0x124   :  { %1818 = vmatpush1.bf16.msra.mxu0 %v5472_v33  ;;  %v5568_v33 = vld [vmem:[#allocation8 + $0x100] ss:$8 sps:$4 sm:$0xff]  }
 0x125   :  { %1793 = vmatpush2.bf16.msra.mxu1 %v5469_v32  ;;  %1819 = vmatprep.subr.bf16.mxu0 %v5480_v7  ;;  %v5534_v32 = vld [vmem:[#allocation8 + $0xc4] ss:$8 sps:$4 sm:$0xff]   ;;  %v5573_v7 = vld [vmem:[#allocation8 + $0x1f4] ss:$8 sps:$4 sm:$0xff]  }
 0x126   :  { %1794 = vmatprep.subr.bf16.mxu1 %v5477_v51  ;;  %v5570_v51 = vld [vmem:[#allocation8 + $0x104] ss:$8 sps:$4 sm:$0xff]  }
 0x128   :  { %1820 = vmatpush1.bf16.msra.mxu0 %v5478_v36  ;;  %v5537_v36 = vld [vmem:[#allocation8 + $0xb4] ss:$8 sps:$4 sm:$0xff]  }
 0x129   :  { %1795 = vmatpush2.bf16.msra.mxu1 %v5475_v34  ;;  %1821 = vmatprep.subr.bf16.mxu0 %v5486_v38  ;;  %v5532_v34 = vld [vmem:[#allocation8 + $0xc0] ss:$8 sps:$4 sm:$0xff]   ;;  %v5576_v38 = vld [vmem:[#allocation8 + $0x1e4] ss:$8 sps:$4 sm:$0xff]  }
 0x12a   :  { %1796 = vmatprep.subr.bf16.mxu1 %v5483_v37  ;;  %v5571_v37 = vld [vmem:[#allocation8 + $0x1f0] ss:$8 sps:$4 sm:$0xff]  }
 0x12c   :  { %1822 = vmatpush1.bf16.msra.mxu0 %v5484_v40  ;;  %v5574_v40 = vld [vmem:[#allocation8 + $0x1e0] ss:$8 sps:$4 sm:$0xff]  }
 0x12d   :  { %1797 = vmatpush2.bf16.msra.mxu1 %v5481_v39  ;;  %1823 = vmatprep.subr.bf16.mxu0 %v5492_v42  ;;  %v5535_v39 = vld [vmem:[#allocation8 + $0xb0] ss:$8 sps:$4 sm:$0xff]   ;;  %v5579_v42 = vld [vmem:[#allocation8 + $0x1d4] ss:$8 sps:$4 sm:$0xff]  }
 0x12e   :  { %1798 = vmatprep.subr.bf16.mxu1 %v5489_v41  ;;  %v5540_v41 = vld [vmem:[#allocation8 + $0xa4] ss:$8 sps:$4 sm:$0xff]  }
 0x130   :  { %1824 = vmatpush1.bf16.msra.mxu0 %v5490_v44  ;;  %v5577_v44 = vld [vmem:[#allocation8 + $0x1d0] ss:$8 sps:$4 sm:$0xff]  }
 0x131   :  { %1799 = vmatpush2.bf16.msra.mxu1 %v5487_v43  ;;  %1825 = vmatprep.subr.bf16.mxu0 %v5498_v46  ;;  %v5538_v43 = vld [vmem:[#allocation8 + $0xa0] ss:$8 sps:$4 sm:$0xff]   ;;  %v5582_v46 = vld [vmem:[#allocation8 + $0x1c4] ss:$8 sps:$4 sm:$0xff]  }
 0x132   :  { %1800 = vmatprep.subr.bf16.mxu1 %v5495_v45  ;;  %v5543_v45 = vld [vmem:[#allocation8 + $0x94] ss:$8 sps:$4 sm:$0xff]  }
 0x134   :  { %1826 = vmatpush1.bf16.msra.mxu0 %v5496_v49  ;;  %v5580_v49 = vld [vmem:[#allocation8 + $0x1c0] ss:$8 sps:$4 sm:$0xff]  }
 0x135   :  { %1801 = vmatpush2.bf16.msra.mxu1 %v5493_v48  ;;  %2256 = vmatprep.subr.bf16.mxu0 %v5501_v50  ;;  %v5541_v48 = vld [vmem:[#allocation8 + $0x90] ss:$8 sps:$4 sm:$0xff]   ;;  %v5546_v50 = vld [vmem:[#allocation8 + $0x84] ss:$8 sps:$4 sm:$0xff]  }
 0x136   :  { %2297 = vmatprep.subr.bf16.mxu1 %v5549_v60  ;;  %v5589_v60 = vld [vmem:[#allocation8 + $0x190] ss:$8 sps:$4 sm:$0xff]  }
 0x137   :  { %1844 = vmatmul.mubr.bf16.vlgmr.msra.gmra.mxu0 %v5993_v55  ;;  %v5588_v55 = vld [vmem:[#allocation8 + $0x1a4] ss:$8 sps:$4 sm:$0xff]  }
 0x138   :  { %1803 = vmatmul.mubr.bf16.vlgmr.msra.gmra.mxu1 %v6306_v15  ;;  %2257 = vmatpush1.bf16.msra.mxu0 %v5499_v52  ;;  %v5511_v15 = vld [vmem:[#allocation8 + $0x30] ss:$8 sps:$4 sm:$0xff]   ;;  %v5585_v52 = vld [vmem:[#allocation8 + $0x1b4] ss:$8 sps:$4 sm:$0xff]  }
 0x139   :  { %2258 = vmatprep.subr.bf16.mxu0 %v5504_v53  ;;  %2298 = vmatpush1.bf16.msra.mxu1 %v5547_v59  ;;  %v5544_v53 = vld [vmem:[#allocation8 + $0x80] ss:$8 sps:$4 sm:$0xff]   ;;  %v5591_v59 = vld [vmem:[#allocation8 + $0x194] ss:$8 sps:$4 sm:$0xff]  }
 0x13a   :  { %2299 = vmatprep.subr.bf16.mxu1 %v5552_v61 }
 0x13c   :  { %2259 = vmatpush1.bf16.msra.mxu0 %v5502_v54  ;;  %v5583_v54 = vld [vmem:[#allocation8 + $0x1b0] ss:$8 sps:$4 sm:$0xff]  }
 0x13d   :  { %2260 = vmatprep.subr.bf16.mxu0 %v5507_v56  ;;  %2300 = vmatpush1.bf16.msra.mxu1 %v5550_v6  ;;  %v5586_v56 = vld [vmem:[#allocation8 + $0x1a0] ss:$8 sps:$4 sm:$0xff]  }
 0x13e   :  { %2301 = vmatprep.subr.bf16.mxu1 %v5555_v63  ;;  %v5592_v6 = vld [vmem:[#allocation8 + $0x180] ss:$8 sps:$4 sm:$0xff]   ;;  %v359_v63 = vlaneseq }
 0x140   :  { %2261 = vmatpush1.bf16.msra.mxu0 %v5505_v57 }
 0x141   :  { %2262 = vmatprep.subr.bf16.mxu0 %v5510_v58  ;;  %2302 = vmatpush1.bf16.msra.mxu1 %v5553_v0 }
 0x142   :  { %2303 = vmatprep.subr.bf16.mxu1 %v5558_v2 }
 0x144   :  { %2263 = vmatpush1.bf16.msra.mxu0 %v5508_v62 }
 0x145   :  { %2264 = vmatprep.subr.bf16.mxu0 %v5513_v47  ;;  %2304 = vmatpush1.bf16.msra.mxu1 %v5556_v4  ;;  %v5594_v47 = vld [vmem:[#allocation8 + $0x184] ss:$8 sps:$4 sm:$0xff]  }
 0x146   :  { %2305 = vmatprep.subr.bf16.mxu1 %v5561_v5 }
 0x148   :  { %2265 = vmatpush1.bf16.msra.mxu0 %v5511_v15  ;;  %v6323_v15 = vshrl.u32 %v359_v63, 7  ;;  %v5609_v63 = vld [vmem:[#allocation10 + $0xa4] ss:$16 sps:$4 sm:$0xff]  }
 0x149   :  { %2266 = vmatprep.subr.bf16.mxu0 %v5516_v1  ;;  %2306 = vmatpush1.bf16.msra.mxu1 %v5559_v9  ;;  %v357_v1 = vld [vmem:[%s6411_s3] sm:$0xf] }
 0x14a   :  { %2307 = vmatprep.subr.bf16.mxu1 %v5564_v17  ;;  %v6326_v0 = vsub.s32 0, %v6323_v15  ;;  %v6332_v2 = vsub.s32 1, %v6323_v15 }
 0x14c   :  { %2267 = vmatpush1.bf16.msra.mxu0 %v5514_v3  ;;  %v362_v3 = vrot.slane %v357_v1, %v6326_v0  ;;  %v366_v4 = vrot.slane %v357_v1, %v6332_v2 }
 0x14d   :  { %2268 = vmatprep.subr.bf16.mxu0 %v5519_v35  ;;  %2308 = vmatpush1.bf16.msra.mxu1 %v5562_v19 }
 0x14e   :  { %2309 = vmatprep.subr.bf16.mxu1 %v5567_v25 }
 0x150   :  { %2269 = vmatpush1.bf16.msra.mxu0 %v5517_v8 }
 0x151   :  { %2270 = vmatprep.subr.bf16.mxu0 %v5522_v10  ;;  %2310 = vmatpush1.bf16.msra.mxu1 %v5565_v27 }
 0x152   :  { %2311 = vmatprep.subr.bf16.mxu1 %v5570_v51  ;;  %v5600_v51 = vld [vmem:[#allocation10 + $0xec] ss:$16 sps:$4 sm:$0xff]  }
 0x154   :  { %2271 = vmatpush1.bf16.msra.mxu0 %v5520_v11 }
 0x155   :  { %2272 = vmatprep.subr.bf16.mxu0 %v5525_v12  ;;  %2312 = vmatpush1.bf16.msra.mxu1 %v5568_v33  ;;  %v5597_v33 = vld [vmem:[#allocation10 + $0xe4] ss:$16 sps:$4 sm:$0xff]  }
 0x156   :  { %2313 = vmatprep.subr.bf16.mxu1 %v5573_v7  ;;  %v6342_v7 = vsub.s32 2, %v6323_v15 }
 0x157   :  { %v6315_v20 = vpop.f32.mrf.mxu0 }
 0x158   :  { %v6317_v21 = vpop.f32.mrf.mxu1  ;;  %2273 = vmatpush2.bf16.msra.mxu0 %v5523_v13  ;;  %v1559_v35 = vadd.f32 %v6315_v20, %v362_v3  ;;  %v5607_v3 = vld [vmem:[#allocation10 + $0xa0] ss:$16 sps:$4 sm:$0xff]  }
 0x159   :  { %v6319_v23 = vpop.f32.mrf.mxu0  ;;  %2274 = vmatprep.subr.bf16.mxu0 %v5528_v14  ;;  %2314 = vmatpush2.bf16.msra.mxu1 %v5571_v37 }
 0x15a   :  { %v6321_v24 = vpop.f32.mrf.mxu1  ;;  %2315 = vmatprep.subr.bf16.mxu1 %v5576_v38  ;;  %v1561_v5 = vadd.f32 %v6319_v23, %v366_v4  ;;  %v1600_v8 = vadd.f32 %v6317_v21, %v1559_v35  ;;  %v5610_v4 = vld [vmem:[#allocation10 + $0xa8] ss:$16 sps:$4 sm:$0xff]   ;;  %v5615_v35 = vld [vmem:[#allocation10 + $0x84] ss:$16 sps:$4 sm:$0xff]  }
 0x15b   :  { %v1562_v28 = vpop.f32.mrf.mxu0 }
 0x15c   :  { %v1603_v29 = vpop.f32.mrf.mxu1  ;;  %2275 = vmatpush2.bf16.msra.mxu0 %v5526_v18  ;;  %v1602_v10 = vadd.f32 %v6321_v24, %v1561_v5  ;;  %v5618_v5 = vld [vmem:[#allocation10 + $0x8c] ss:$16 sps:$4 sm:$0xff]  }
 0x15d   :  { %v1563_v30 = vpop.f32.mrf.mxu0  ;;  %2276 = vmatprep.subr.bf16.mxu0 %v5531_v22  ;;  %2316 = vmatpush2.bf16.msra.mxu1 %v5574_v40 }
 0x15e   :  { %v1604_v31 = vpop.f32.mrf.mxu1  ;;  %2317 = vmatprep.subr.bf16.mxu1 %v5579_v42 }
 0x160   :  { %2277 = vmatpush2.bf16.msra.mxu0 %v5529_v26 }
 0x161   :  { %2278 = vmatprep.subr.bf16.mxu0 %v5534_v32  ;;  %2318 = vmatpush2.bf16.msra.mxu1 %v5577_v44  ;;  %v5595_v32 = vld [vmem:[#allocation10 + $0xe0] ss:$16 sps:$4 sm:$0xff]  }
 0x162   :  { %2319 = vmatprep.subr.bf16.mxu1 %v5582_v46 }
 0x164   :  { %2279 = vmatpush2.bf16.msra.mxu0 %v5532_v34  ;;  %v6345_v34 = vsub.s32 3, %v6323_v15 }
 0x165   :  { %2280 = vmatprep.subr.bf16.mxu0 %v5537_v36  ;;  %2320 = vmatpush2.bf16.msra.mxu1 %v5580_v49  ;;  %v370_v36 = vrot.slane %v357_v1, %v6342_v7 }
 0x166   :  { %2321 = vmatprep.subr.bf16.mxu1 %v5585_v52  ;;  %v374_v37 = vrot.slane %v357_v1, %v6345_v34  ;;  %v5612_v1 = vld [vmem:[#allocation10 + $0xac] ss:$16 sps:$4 sm:$0xff]  }
 0x168   :  { %2281 = vmatpush2.bf16.msra.mxu0 %v5535_v39 }
 0x169   :  { %2282 = vmatprep.subr.bf16.mxu0 %v5540_v41  ;;  %2322 = vmatpush2.bf16.msra.mxu1 %v5583_v54 }
 0x16a   :  { %2323 = vmatprep.subr.bf16.mxu1 %v5588_v55 }
 0x16c   :  { %2283 = vmatpush2.bf16.msra.mxu0 %v5538_v43 }
 0x16d   :  { %2284 = vmatprep.subr.bf16.mxu0 %v5543_v45  ;;  %2324 = vmatpush2.bf16.msra.mxu1 %v5586_v56 }
 0x16e   :  { %2325 = vmatprep.subr.bf16.mxu1 %v5591_v59  ;;  %v5598_v59 = vld [vmem:[#allocation10 + $0xe8] ss:$16 sps:$4 sm:$0xff]  }
 0x170   :  { %2285 = vmatpush2.bf16.msra.mxu0 %v5541_v48 }
 0x171   :  { %2286 = vmatprep.subr.bf16.mxu0 %v5546_v50  ;;  %2326 = vmatpush2.bf16.msra.mxu1 %v5589_v60 }
 0x172   :  { %2327 = vmatprep.subr.bf16.mxu1 %v5594_v47  ;;  %v5601_v47 = vld [vmem:[#allocation10 + $0xc0] ss:$16 sps:$4 sm:$0xff]  }
 0x174   :  { %2287 = vmatpush2.bf16.msra.mxu0 %v5544_v53 }
 0x175   :  { %2328 = vmatpush2.bf16.msra.mxu1 %v5592_v6  ;;  %2562 = vmatprep.subr.bf16.mxu0 %v5597_v33  ;;  %v5604_v6 = vld [vmem:[#allocation10 + $0xc8] ss:$16 sps:$4 sm:$0xff]   ;;  %v1924_v33 = vld [vmem:[%s6413_s5] sm:$0x3] }
 0x176   :  { %2603 = vmatprep.subr.bf16.mxu1 %v5600_v51  ;;  %v1929_v51 = vrot.slane %v1924_v33, %v6326_v0 }
 0x178   :  { %v1681_v57 = vpop.f32.mrf.mxu1 }
 0x17a   :  { %v1683_v58 = vpop.f32.mrf.mxu1 }
 0x17c   :  { %v1685_v61 = vpop.f32.mrf.mxu1 }
 0x17d   :  { %v5603_v61 = vld [vmem:[#allocation10 + $0xc4] ss:$16 sps:$4 sm:$0xff]  }
 0x17e   :  { %v1686_v62 = vpop.f32.mrf.mxu1 }
 0x17f   :  { %v5606_v62 = vld [vmem:[#allocation10 + $0xcc] ss:$16 sps:$4 sm:$0xff]  }
 0x197   :  { %v1640_v9 = vpop.f32.mrf.mxu0 }
 0x198   :  { %v1641_v11 = vadd.f32 %v1640_v9, %v1600_v8  ;;  %v5613_v8 = vld [vmem:[#allocation10 + $0x80] ss:$16 sps:$4 sm:$0xff]   ;;  %v5621_v9 = vld [vmem:[#allocation10 + $0x64] ss:$16 sps:$4 sm:$0xff]  }
 0x199   :  { %v1642_v12 = vpop.f32.mrf.mxu0 }
 0x19a   :  { %v1682_v13 = vadd.f32 %v1681_v57, %v1641_v11  ;;  %v1643_v14 = vadd.f32 %v1642_v12, %v1602_v10  ;;  %v5619_v10 = vld [vmem:[#allocation10 + $0x60] ss:$16 sps:$4 sm:$0xff]   ;;  %v5622_v11 = vld [vmem:[#allocation10 + $0x68] ss:$16 sps:$4 sm:$0xff]   ;;  %v5624_v12 = vld [vmem:[#allocation10 + $0x6c] ss:$16 sps:$4 sm:$0xff]  }
 0x19b   :  { %v1644_v17 = vpop.f32.mrf.mxu0 }
 0x19c   :  { %v1684_v18 = vadd.f32 %v1683_v58, %v1643_v14  ;;  %v1852_v19 = vmax.f32 %v1682_v13, 0.0  ;;  %v5627_v13 = vld [vmem:[#allocation10 + $0x44] ss:$16 sps:$4 sm:$0xff]   ;;  %v5630_v14 = vld [vmem:[#allocation10 + $0x4c] ss:$16 sps:$4 sm:$0xff]  }
 0x19d   :  { %v1645_v22 = vpop.f32.mrf.mxu0  ;;  %v5625_v17 = vld [vmem:[#allocation10 + $0x40] ss:$16 sps:$4 sm:$0xff]  }
 0x19e   :  { %v1853_v25 = vmax.f32 %v1684_v18, 0.0  ;;  %v1856_v27 = vpack.c.bf16 %v1852_v19, %v1852_v19  ;;  %v5628_v18 = vld [vmem:[#allocation10 + $0x48] ss:$16 sps:$4 sm:$0xff]   ;;  %v5633_v19 = vld [vmem:[#allocation10 + $0x24] ss:$16 sps:$4 sm:$0xff]  }
 0x19f   :  { %v5636_v22 = vld [vmem:[#allocation10 + $0x2c] ss:$16 sps:$4 sm:$0xff]  }
 0x1a0   :  { %v1857_v26 = vpack.c.bf16 %v1853_v25, %v1853_v25  ;;  %v5631_v25 = vld [vmem:[#allocation10 + $0x20] ss:$16 sps:$4 sm:$0xff]  }
 0x1a2   :  { %2288 = vmatprep.mubr.bf16.mxu0 %v1857_v26  ;;  %v5634_v26 = vld [vmem:[#allocation10 + $0x28] ss:$16 sps:$4 sm:$0xff]  }
 0x1a3   :  { %2289 = vmatmul.mubr.bf16.vlgmr.msra.gmra.mxu0 %v1856_v27  ;;  %v5639_v27 = vld [vmem:[#allocation10 + $0x4] ss:$16 sps:$4 sm:$0xff]  }
 0x1a4   :  { %2594 = vmatprep.mubr.bf16.mxu0 %v6199_v16  ;;  %2563 = vmatpush1.bf16.msra.mxu0 %v5595_v32 }
 0x1a5   :  { %2564 = vmatprep.subr.bf16.mxu0 %v5603_v61  ;;  %v5657_v61 = vld [vmem:[#allocation13 + $0x11c] ss:$28 sps:$4 sm:$0xff]  }
 0x1a8   :  { %2565 = vmatpush1.bf16.msra.mxu0 %v5601_v47  ;;  %v5655_v47 = vld [vmem:[#allocation13 + $0x118] ss:$28 sps:$4 sm:$0xff]  }
 0x1a9   :  { %2566 = vmatprep.subr.bf16.mxu0 %v5609_v63  ;;  %v5663_v63 = vld [vmem:[#allocation13 + $0xe4] ss:$28 sps:$4 sm:$0xff]  }
 0x1ac   :  { %2567 = vmatpush1.bf16.msra.mxu0 %v5607_v3  ;;  %v5661_v3 = vld [vmem:[#allocation13 + $0xe0] ss:$28 sps:$4 sm:$0xff]  }
 0x1ad   :  { %2568 = vmatprep.subr.bf16.mxu0 %v5615_v35  ;;  %v5669_v35 = vld [vmem:[#allocation13 + $0xac] ss:$28 sps:$4 sm:$0xff]  }
 0x1b0   :  { %2569 = vmatpush1.bf16.msra.mxu0 %v5613_v8  ;;  %v5667_v8 = vld [vmem:[#allocation13 + $0xa8] ss:$28 sps:$4 sm:$0xff]  }
 0x1b1   :  { %2570 = vmatprep.subr.bf16.mxu0 %v5621_v9  ;;  %v5675_v9 = vld [vmem:[#allocation13 + $0x74] ss:$28 sps:$4 sm:$0xff]  }
 0x1b4   :  { %2571 = vmatpush1.bf16.msra.mxu0 %v5619_v10  ;;  %v5678_v10 = vld [vmem:[#allocation13 + $0x3f4] ss:$28 sps:$4 sm:$0xff]  }
 0x1b5   :  { %2572 = vmatprep.subr.bf16.mxu0 %v5627_v13  ;;  %v5681_v13 = vld [vmem:[#allocation13 + $0x3c] ss:$28 sps:$4 sm:$0xff]  }
 0x1b8   :  { %v1722_v20 = vpop.f32.mrf.mxu1  ;;  %2573 = vmatpush1.bf16.msra.mxu0 %v5625_v17  ;;  %v5679_v17 = vld [vmem:[#allocation13 + $0x38] ss:$28 sps:$4 sm:$0xff]  }
 0x1b9   :  { %v1723_v38 = vadd.f32 %v1722_v20, %v370_v36  ;;  %2574 = vmatprep.subr.bf16.mxu0 %v5633_v19  ;;  %v5642_v20 = vld [vmem:[#allocation10 + $0xc] ss:$16 sps:$4 sm:$0xff]   ;;  %v1933_v36 = vrot.slane %v1924_v33, %v6332_v2  ;;  %v5687_v19 = vld [vmem:[#allocation13 + $0x4] ss:$28 sps:$4 sm:$0xff]  }
 0x1ba   :  { %v1724_v21 = vpop.f32.mrf.mxu1  ;;  %v5703_v33 = vld [vmem:[#allocation13 + $0x2d8] ss:$28 sps:$4 sm:$0xff]  }
 0x1bb   :  { %v1725_v39 = vadd.f32 %v1724_v21, %v374_v37  ;;  %v5637_v21 = vld [vmem:[#allocation10] ss:$16 sps:$4 sm:$0xff]  }
 0x1bc   :  { %v1726_v23 = vpop.f32.mrf.mxu1  ;;  %2575 = vmatpush1.bf16.msra.mxu0 %v5631_v25  ;;  %v5685_v25 = vld [vmem:[#allocation13] ss:$28 sps:$4 sm:$0xff]  }
 0x1bd   :  { %v5640_v23 = vld [vmem:[#allocation10 + $0x8] ss:$16 sps:$4 sm:$0xff]   ;;  %2576 = vmatprep.subr.bf16.mxu0 %v5639_v27  ;;  %v5693_v27 = vld [vmem:[#allocation13 + $0x34c] ss:$28 sps:$4 sm:$0xff]  }
 0x1be   :  { %v1727_v28 = vpop.f32.mrf.mxu1 }
 0x1bf   :  { %v5645_v28 = vld [vmem:[#allocation13 + $0x18c] ss:$28 sps:$4 sm:$0xff]  }
 0x1c0   :  { %2577 = vmatpush1.bf16.msra.mxu0 %v5637_v21  ;;  %v5691_v21 = vld [vmem:[#allocation13 + $0x348] ss:$28 sps:$4 sm:$0xff]  }
 0x1c1   :  { %4097 = vmatprep.subr.bf16.mxu0 %v5645_v28  ;;  %v5699_v28 = vld [vmem:[#allocation13 + $0x314] ss:$28 sps:$4 sm:$0xff]  }
 0x1d7   :  { %v1763_v24 = vpop.f32.mrf.mxu0 }
 0x1d8   :  { %v1764_v40 = vadd.f32 %v1763_v24, %v1723_v38  ;;  %v5648_v24 = vld [vmem:[#allocation13 + $0x50c] ss:$28 sps:$4 sm:$0xff]  }
 0x1d9   :  { %v1765_v29 = vpop.f32.mrf.mxu0 }
 0x1da   :  { %v1766_v43 = vadd.f32 %v1765_v29, %v1725_v39 }
 0x1db   :  { %v1767_v30 = vpop.f32.mrf.mxu0 }
 0x1dd   :  { %v1768_v31 = vpop.f32.mrf.mxu0 }
 0x1f7   :  { %v1845_v42 = vpop.f32.mrf.mxu0 }
 0x1f8   :  { %v1804_v41 = vpop.f32.mrf.mxu1 }
 0x1f9   :  { %v1805_v44 = vadd.f32 %v1804_v41, %v1764_v40  ;;  %v1847_v46 = vpop.f32.mrf.mxu0 }
 0x1fa   :  { %v1806_v45 = vpop.f32.mrf.mxu1 }
 0x1fb   :  { %v1846_v48 = vadd.f32 %v1845_v42, %v1805_v44  ;;  %v1807_v49 = vadd.f32 %v1806_v45, %v1766_v43  ;;  %v1849_v52 = vpop.f32.mrf.mxu0 }
 0x1fc   :  { %v1808_v50 = vpop.f32.mrf.mxu1 }
 0x1fd   :  { %v1848_v53 = vadd.f32 %v1847_v46, %v1807_v49  ;;  %v1854_v54 = vmax.f32 %v1846_v48, 0.0  ;;  %v1850_v56 = vpop.f32.mrf.mxu0  ;;  %v2340_v48 = vld [vmem:[#allocation5] sm:$0xf] }
 0x1fe   :  { %v1809_v55 = vpop.f32.mrf.mxu1  ;;  %v2341_v49 = vunpack.c.l.bf16 %v2340_v48  ;;  %v5724_v48 = vld [vmem:[#allocation13 + $0x5b0] ss:$28 sps:$4 sm:$0xff]  }
 0x1ff   :  { %v1855_v57 = vmax.f32 %v1848_v53, 0.0  ;;  %v1858_v60 = vpack.c.bf16 %v1854_v54, %v1854_v54  ;;  %v5643_v54 = vld [vmem:[#allocation13 + $0x188] ss:$28 sps:$4 sm:$0xff]  }
 0x200   :  { %v5646_v55 = vld [vmem:[#allocation13 + $0x508] ss:$28 sps:$4 sm:$0xff]  }
 0x201   :  { %v1859_v58 = vpack.c.bf16 %v1855_v57, %v1855_v57  ;;  %v5651_v57 = vld [vmem:[#allocation13 + $0x154] ss:$28 sps:$4 sm:$0xff]  }
 0x203   :  { %2329 = vmatprep.mubr.bf16.mxu1 %v1859_v58  ;;  %v5654_v58 = vld [vmem:[#allocation13 + $0x4d4] ss:$28 sps:$4 sm:$0xff]  }
 0x204   :  { %2330 = vmatmul.mubr.bf16.vlgmr.msra.gmra.mxu1 %v1858_v60  ;;  %v5652_v60 = vld [vmem:[#allocation13 + $0x4d0] ss:$28 sps:$4 sm:$0xff]  }
 0x205   :  { %2604 = vmatpush1.bf16.msra.mxu1 %v5598_v59  ;;  %2635 = vmatprep.mubr.bf16.mxu1 %v6199_v16  ;;  %v5616_v16 = vld [vmem:[#allocation10 + $0x88] ss:$16 sps:$4 sm:$0xff]   ;;  %v5649_v59 = vld [vmem:[#allocation13 + $0x150] ss:$28 sps:$4 sm:$0xff]  }
 0x206   :  { %2605 = vmatprep.subr.bf16.mxu1 %v5606_v62  ;;  %v5660_v62 = vld [vmem:[#allocation13 + $0x49c] ss:$28 sps:$4 sm:$0xff]  }
 0x209   :  { %2606 = vmatpush1.bf16.msra.mxu1 %v5604_v6  ;;  %v5658_v6 = vld [vmem:[#allocation13 + $0x498] ss:$28 sps:$4 sm:$0xff]  }
 0x20a   :  { %2607 = vmatprep.subr.bf16.mxu1 %v5612_v1  ;;  %v5666_v1 = vld [vmem:[#allocation13 + $0x464] ss:$28 sps:$4 sm:$0xff]  }
 0x20d   :  { %2608 = vmatpush1.bf16.msra.mxu1 %v5610_v4  ;;  %v5664_v4 = vld [vmem:[#allocation13 + $0x460] ss:$28 sps:$4 sm:$0xff]  }
 0x20e   :  { %2609 = vmatprep.subr.bf16.mxu1 %v5618_v5  ;;  %v5672_v5 = vld [vmem:[#allocation13 + $0x42c] ss:$28 sps:$4 sm:$0xff]  }
 0x211   :  { %2610 = vmatpush1.bf16.msra.mxu1 %v5616_v16  ;;  %v5670_v16 = vld [vmem:[#allocation13 + $0x428] ss:$28 sps:$4 sm:$0xff]  }
 0x212   :  { %2611 = vmatprep.subr.bf16.mxu1 %v5624_v12  ;;  %v5676_v12 = vld [vmem:[#allocation13 + $0x3f0] ss:$28 sps:$4 sm:$0xff]  }
 0x215   :  { %2612 = vmatpush1.bf16.msra.mxu1 %v5622_v11  ;;  %v5673_v11 = vld [vmem:[#allocation13 + $0x70] ss:$28 sps:$4 sm:$0xff]  }
 0x216   :  { %2613 = vmatprep.subr.bf16.mxu1 %v5630_v14  ;;  %v5684_v14 = vld [vmem:[#allocation13 + $0x3bc] ss:$28 sps:$4 sm:$0xff]  }
 0x219   :  { %2614 = vmatpush1.bf16.msra.mxu1 %v5628_v18  ;;  %v5682_v18 = vld [vmem:[#allocation13 + $0x3b8] ss:$28 sps:$4 sm:$0xff]  }
 0x21a   :  { %2615 = vmatprep.subr.bf16.mxu1 %v5636_v22  ;;  %v5690_v22 = vld [vmem:[#allocation13 + $0x384] ss:$28 sps:$4 sm:$0xff]  }
 0x21d   :  { %2616 = vmatpush1.bf16.msra.mxu1 %v5634_v26  ;;  %v5688_v26 = vld [vmem:[#allocation13 + $0x380] ss:$28 sps:$4 sm:$0xff]  }
 0x21e   :  { %2617 = vmatprep.subr.bf16.mxu1 %v5642_v20  ;;  %v5696_v20 = vld [vmem:[#allocation13 + $0x6cc] ss:$28 sps:$4 sm:$0xff]  }
 0x221   :  { %2618 = vmatpush1.bf16.msra.mxu1 %v5640_v23  ;;  %v5694_v23 = vld [vmem:[#allocation13 + $0x6c8] ss:$28 sps:$4 sm:$0xff]  }
 0x222   :  { %4138 = vmatprep.subr.bf16.mxu1 %v5648_v24  ;;  %v5702_v24 = vld [vmem:[#allocation13 + $0x694] ss:$28 sps:$4 sm:$0xff]  }
 0x263   :  { %v2290_v29 = vpop.f32.mrf.mxu0 }
 0x264   :  { %v2291_v37 = vadd.f32 %v2290_v29, %v1929_v51  ;;  %v5697_v29 = vld [vmem:[#allocation13 + $0x310] ss:$28 sps:$4 sm:$0xff]   ;;  %v5706_v51 = vld [vmem:[#allocation13 + $0x658] ss:$28 sps:$4 sm:$0xff]  }
 0x265   :  { %v2292_v30 = vpop.f32.mrf.mxu0 }
 0x266   :  { %v2293_v39 = vadd.f32 %v2292_v30, %v1933_v36  ;;  %v5700_v30 = vld [vmem:[#allocation13 + $0x690] ss:$28 sps:$4 sm:$0xff]   ;;  %v5711_v36 = vld [vmem:[#allocation13 + $0x2a4] ss:$28 sps:$4 sm:$0xff]  }
 0x267   :  { %v2294_v31 = vpop.f32.mrf.mxu0 }
 0x268   :  { %v5705_v31 = vld [vmem:[#allocation13 + $0x2dc] ss:$28 sps:$4 sm:$0xff]  }
 0x269   :  { %v2295_v32 = vpop.f32.mrf.mxu0 }
 0x26a   :  { %v5708_v32 = vld [vmem:[#allocation13 + $0x65c] ss:$28 sps:$4 sm:$0xff]  }
 0x2c4   :  { %v2331_v38 = vpop.f32.mrf.mxu1 }
 0x2c5   :  { %v2332_v40 = vadd.f32 %v2331_v38, %v2291_v37  ;;  %v5714_v37 = vld [vmem:[#allocation13 + $0x624] ss:$28 sps:$4 sm:$0xff]  }
 0x2c6   :  { %v2333_v41 = vpop.f32.mrf.mxu1  ;;  %v5709_v38 = vld [vmem:[#allocation13 + $0x2a0] ss:$28 sps:$4 sm:$0xff]  }
 0x2c7   :  { %2338 = vst [vmem:[#allocation14] sm:$0xff] %v2332_v40  ;;  %v2334_v42 = vadd.f32 %v2333_v41, %v2293_v39  ;;  %v5712_v39 = vld [vmem:[#allocation13 + $0x620] ss:$28 sps:$4 sm:$0xff]   ;;  %v5720_v41 = vld [vmem:[#allocation13 + $0x5ec] ss:$28 sps:$4 sm:$0xff]  }
 0x2c8   :  { %v2335_v43 = vpop.f32.mrf.mxu1 }
 0x2c9   :  { %2339 = vst [vmem:[#allocation14 + $0x8] sm:$0xff] %v2334_v42  ;;  %v2342_v44 = vmul.f32 0.5, %v2334_v42  ;;  %v5715_v42 = vld [vmem:[#allocation13 + $0x268] ss:$28 sps:$4 sm:$0xff]  }
 0x2ca   :  { %v2336_v45 = vpop.f32.mrf.mxu1  ;;  %v5718_v43 = vld [vmem:[#allocation13 + $0x5e8] ss:$28 sps:$4 sm:$0xff]  }
 0x2cb   :  { %v2343_v46 = vmul.f32 1.442695, %v2342_v44  ;;  %v5723_v44 = vld [vmem:[#allocation13 + $0x234] ss:$28 sps:$4 sm:$0xff]  }
 0x2cc   :  { %v5726_v45 = vld [vmem:[#allocation13 + $0x5b4] ss:$28 sps:$4 sm:$0xff]  }
 0x2cd   :  { %5963 = vpow2.f32 %v2343_v46  ;;  %v5721_v46 = vld [vmem:[#allocation13 + $0x230] ss:$28 sps:$4 sm:$0xff]  }
 0x2da   :  { %v5964_v50 = vpop.eup %5963 }
 0x2db   :  { %v2345_v52 = vmul.f32 %v5964_v50, %v2341_v49  ;;  %v5729_v49 = vld [vmem:[#allocation13 + $0x1fc] ss:$28 sps:$4 sm:$0xff]  }
 0x2dc   :  { %v5732_v50 = vld [vmem:[#allocation13 + $0x57c] ss:$28 sps:$4 sm:$0xff]  }
 0x2dd   :  { %v2346_v53 = vadd.f32 %v2345_v52, %v2332_v40  ;;  %v5717_v40 = vld [vmem:[#allocation13 + $0x26c] ss:$28 sps:$4 sm:$0xff]   ;;  %v5727_v52 = vld [vmem:[#allocation13 + $0x1f8] ss:$28 sps:$4 sm:$0xff]  }
 0x2df   :  { %v2347_v56 = vpack.c.bf16 %v2346_v53, %v2346_v53  ;;  %v5730_v53 = vld [vmem:[#allocation13 + $0x578] ss:$28 sps:$4 sm:$0xff]  }
 0x2e1   :  { %2595 = vmatmul.mubr.bf16.vlgmr.msra.gmra.mxu0 %v2347_v56  ;;  %2636 = vmatmul.mubr.bf16.vlgmr.msra.gmra.mxu1 %v2347_v56  ;;  %v5733_v56 = vld [vmem:[#allocation13 + $0x1c0] ss:$28 sps:$4 sm:$0xff]  }
 0x2e2   :  { %4098 = vmatpush1.bf16.msra.mxu0 %v5643_v54  ;;  %4139 = vmatpush1.bf16.msra.mxu1 %v5646_v55  ;;  %v5735_v54 = vld [vmem:[#allocation13 + $0x1c4] ss:$28 sps:$4 sm:$0xff]  }
 0x2e3   :  { %4099 = vmatprep.subr.bf16.mxu0 %v5651_v57  ;;  %4140 = vmatprep.subr.bf16.mxu1 %v5654_v58  ;;  %v5738_v55 = vld [vmem:[#allocation13 + $0x544] ss:$28 sps:$4 sm:$0xff]   ;;  %v5741_v58 = vld [vmem:[#allocation13 + $0x194] ss:$28 sps:$4 sm:$0xff]  }
 0x2e4   :  { %v5736_v57 = vld [vmem:[#allocation13 + $0x540] ss:$28 sps:$4 sm:$0xff]  }
 0x2e6   :  { %4100 = vmatpush1.bf16.msra.mxu0 %v5649_v59  ;;  %4141 = vmatpush1.bf16.msra.mxu1 %v5652_v60  ;;  %v5744_v59 = vld [vmem:[#allocation13 + $0x514] ss:$28 sps:$4 sm:$0xff]   ;;  %v2380_v60 = vld [vmem:[#allocation11] sm:$0xf] }
 0x2e7   :  { %4101 = vmatprep.subr.bf16.mxu0 %v5657_v61  ;;  %4142 = vmatprep.subr.bf16.mxu1 %v5660_v62  ;;  %v2385_v61 = vrot.slane %v2380_v60, %v6326_v0  ;;  %v2393_v62 = vrot.slane %v2380_v60, %v6342_v7 }
 0x2ea   :  { %4102 = vmatpush1.bf16.msra.mxu0 %v5655_v47  ;;  %4143 = vmatpush1.bf16.msra.mxu1 %v5658_v6  ;;  %v2389_v47 = vrot.slane %v2380_v60, %v6332_v2  ;;  %v2397_v6 = vrot.slane %v2380_v60, %v6345_v34  ;;  %v5795_v60 = vld [vmem:[#allocation13 + $0x31c] ss:$28 sps:$4 sm:$0xff]  }
 0x2eb   :  { %4103 = vmatprep.subr.bf16.mxu0 %v5663_v63  ;;  %4144 = vmatprep.subr.bf16.mxu1 %v5666_v1 }
 0x2ee   :  { %4104 = vmatpush1.bf16.msra.mxu0 %v5661_v3  ;;  %4145 = vmatpush1.bf16.msra.mxu1 %v5664_v4 }
 0x2ef   :  { %4105 = vmatprep.subr.bf16.mxu0 %v5669_v35  ;;  %4146 = vmatprep.subr.bf16.mxu1 %v5672_v5 }
 0x2f2   :  { %4106 = vmatpush1.bf16.msra.mxu0 %v5667_v8  ;;  %4147 = vmatpush1.bf16.msra.mxu1 %v5670_v16 }
 0x2f3   :  { %4107 = vmatprep.subr.bf16.mxu0 %v5675_v9  ;;  %4148 = vmatprep.subr.bf16.mxu1 %v5678_v10 }
 0x2f6   :  { %4108 = vmatpush1.bf16.msra.mxu0 %v5673_v11  ;;  %4149 = vmatpush1.bf16.msra.mxu1 %v5676_v12 }
 0x2f7   :  { %4109 = vmatprep.subr.bf16.mxu0 %v5681_v13  ;;  %4150 = vmatprep.subr.bf16.mxu1 %v5684_v14 }
 0x2fa   :  { %4110 = vmatpush1.bf16.msra.mxu0 %v5679_v17  ;;  %4151 = vmatpush1.bf16.msra.mxu1 %v5682_v18 }
 0x2fb   :  { %4111 = vmatprep.subr.bf16.mxu0 %v5687_v19  ;;  %4152 = vmatprep.subr.bf16.mxu1 %v5690_v22 }
 0x2fe   :  { %4112 = vmatpush1.bf16.msra.mxu0 %v5685_v25  ;;  %4153 = vmatpush1.bf16.msra.mxu1 %v5688_v26  ;;  %v5739_v25 = vld [vmem:[#allocation13 + $0x190] ss:$28 sps:$4 sm:$0xff]  }
 0x2ff   :  { %4113 = vmatprep.subr.bf16.mxu0 %v5693_v27  ;;  %4154 = vmatprep.subr.bf16.mxu1 %v5696_v20  ;;  %v5742_v26 = vld [vmem:[#allocation13 + $0x510] ss:$28 sps:$4 sm:$0xff]  }
 0x302   :  { %4114 = vmatpush2.bf16.msra.mxu0 %v5691_v21  ;;  %4155 = vmatpush2.bf16.msra.mxu1 %v5694_v23  ;;  %v5747_v21 = vld [vmem:[#allocation13 + $0x15c] ss:$28 sps:$4 sm:$0xff]  }
 0x303   :  { %4115 = vmatprep.subr.bf16.mxu0 %v5699_v28  ;;  %4156 = vmatprep.subr.bf16.mxu1 %v5702_v24  ;;  %v5750_v23 = vld [vmem:[#allocation13 + $0x4dc] ss:$28 sps:$4 sm:$0xff]  }
 0x304   :  { %v5745_v28 = vld [vmem:[#allocation13 + $0x158] ss:$28 sps:$4 sm:$0xff]  }
 0x305   :  { %v5748_v24 = vld [vmem:[#allocation13 + $0x4d8] ss:$28 sps:$4 sm:$0xff]  }
 0x306   :  { %4116 = vmatpush2.bf16.msra.mxu0 %v5697_v29  ;;  %4157 = vmatpush2.bf16.msra.mxu1 %v5700_v30  ;;  %v5753_v29 = vld [vmem:[#allocation13 + $0x124] ss:$28 sps:$4 sm:$0xff]  }
 0x307   :  { %4117 = vmatprep.subr.bf16.mxu0 %v5705_v31  ;;  %4158 = vmatprep.subr.bf16.mxu1 %v5708_v32  ;;  %v5756_v30 = vld [vmem:[#allocation13 + $0x4a4] ss:$28 sps:$4 sm:$0xff]  }
 0x308   :  { %v5751_v31 = vld [vmem:[#allocation13 + $0x120] ss:$28 sps:$4 sm:$0xff]  }
 0x309   :  { %v5754_v32 = vld [vmem:[#allocation13 + $0x4a0] ss:$28 sps:$4 sm:$0xff]  }
 0x30a   :  { %4118 = vmatpush2.bf16.msra.mxu0 %v5703_v33  ;;  %4159 = vmatpush2.bf16.msra.mxu1 %v5706_v51  ;;  %v5759_v33 = vld [vmem:[#allocation13 + $0xec] ss:$28 sps:$4 sm:$0xff]  }
 0x30b   :  { %4119 = vmatprep.subr.bf16.mxu0 %v5711_v36  ;;  %4160 = vmatprep.subr.bf16.mxu1 %v5714_v37  ;;  %v5762_v51 = vld [vmem:[#allocation13 + $0x46c] ss:$28 sps:$4 sm:$0xff]  }
 0x30c   :  { %v5757_v36 = vld [vmem:[#allocation13 + $0xe8] ss:$28 sps:$4 sm:$0xff]  }
 0x30d   :  { %v5760_v37 = vld [vmem:[#allocation13 + $0x468] ss:$28 sps:$4 sm:$0xff]  }
 0x30e   :  { %4120 = vmatpush2.bf16.msra.mxu0 %v5709_v38  ;;  %4161 = vmatpush2.bf16.msra.mxu1 %v5712_v39  ;;  %v5765_v38 = vld [vmem:[#allocation13 + $0xb4] ss:$28 sps:$4 sm:$0xff]  }
 0x30f   :  { %4121 = vmatprep.subr.bf16.mxu0 %v5717_v40  ;;  %4162 = vmatprep.subr.bf16.mxu1 %v5720_v41  ;;  %v5768_v39 = vld [vmem:[#allocation13 + $0x434] ss:$28 sps:$4 sm:$0xff]  }
 0x310   :  { %v5763_v40 = vld [vmem:[#allocation13 + $0xb0] ss:$28 sps:$4 sm:$0xff]  }
 0x311   :  { %v5766_v41 = vld [vmem:[#allocation13 + $0x430] ss:$28 sps:$4 sm:$0xff]  }
 0x312   :  { %4122 = vmatpush2.bf16.msra.mxu0 %v5715_v42  ;;  %4163 = vmatpush2.bf16.msra.mxu1 %v5718_v43  ;;  %v5771_v42 = vld [vmem:[#allocation13 + $0x7c] ss:$28 sps:$4 sm:$0xff]  }
 0x313   :  { %4123 = vmatprep.subr.bf16.mxu0 %v5723_v44  ;;  %4164 = vmatprep.subr.bf16.mxu1 %v5726_v45  ;;  %v5774_v43 = vld [vmem:[#allocation13 + $0x3fc] ss:$28 sps:$4 sm:$0xff]  }
 0x314   :  { %v5769_v44 = vld [vmem:[#allocation13 + $0x78] ss:$28 sps:$4 sm:$0xff]  }
 0x315   :  { %v5772_v45 = vld [vmem:[#allocation13 + $0x3f8] ss:$28 sps:$4 sm:$0xff]  }
 0x316   :  { %4124 = vmatpush2.bf16.msra.mxu0 %v5721_v46  ;;  %4165 = vmatpush2.bf16.msra.mxu1 %v5724_v48  ;;  %v5777_v46 = vld [vmem:[#allocation13 + $0x44] ss:$28 sps:$4 sm:$0xff]  }
 0x317   :  { %4125 = vmatprep.subr.bf16.mxu0 %v5729_v49  ;;  %4166 = vmatprep.subr.bf16.mxu1 %v5732_v50  ;;  %v5780_v48 = vld [vmem:[#allocation13 + $0x3c4] ss:$28 sps:$4 sm:$0xff]  }
 0x318   :  { %v5775_v49 = vld [vmem:[#allocation13 + $0x40] ss:$28 sps:$4 sm:$0xff]  }
 0x319   :  { %v5778_v50 = vld [vmem:[#allocation13 + $0x3c0] ss:$28 sps:$4 sm:$0xff]  }
 0x31a   :  { %4126 = vmatpush2.bf16.msra.mxu0 %v5727_v52  ;;  %4167 = vmatpush2.bf16.msra.mxu1 %v5730_v53  ;;  %v5783_v52 = vld [vmem:[#allocation13 + $0xc] ss:$28 sps:$4 sm:$0xff]  }
 0x31b   :  { %4127 = vmatprep.subr.bf16.mxu0 %v5735_v54  ;;  %4168 = vmatprep.subr.bf16.mxu1 %v5738_v55  ;;  %v5786_v53 = vld [vmem:[#allocation13 + $0x38c] ss:$28 sps:$4 sm:$0xff]  }
 0x31c   :  { %v5781_v54 = vld [vmem:[#allocation13 + $0x8] ss:$28 sps:$4 sm:$0xff]  }
 0x31d   :  { %v5784_v55 = vld [vmem:[#allocation13 + $0x388] ss:$28 sps:$4 sm:$0xff]  }
 0x31e   :  { %4128 = vmatpush2.bf16.msra.mxu0 %v5733_v56  ;;  %4169 = vmatpush2.bf16.msra.mxu1 %v5736_v57  ;;  %v5789_v56 = vld [vmem:[#allocation13 + $0x354] ss:$28 sps:$4 sm:$0xff]  }
 0x31f   :  { %4179 = vmatprep.subr.bf16.mxu0 %v5741_v58  ;;  %4220 = vmatprep.subr.bf16.mxu1 %v5744_v59  ;;  %v5792_v57 = vld [vmem:[#allocation13 + $0x6d4] ss:$28 sps:$4 sm:$0xff]  }
 0x320   :  { %v5787_v58 = vld [vmem:[#allocation13 + $0x350] ss:$28 sps:$4 sm:$0xff]  }
 0x321   :  { %v5790_v59 = vld [vmem:[#allocation13 + $0x6d0] ss:$28 sps:$4 sm:$0xff]  }
 0x3a1   :  { %v2596_v63 = vpop.f32.mrf.mxu0  ;;  %v2637_v1 = vpop.f32.mrf.mxu1 }
 0x3a2   :  { %v2597_v3 = vadd.f32 %v2596_v63, %v2385_v61  ;;  %v2638_v4 = vadd.f32 %v2637_v1, %v2393_v62  ;;  %v5798_v61 = vld [vmem:[#allocation13 + $0x69c] ss:$28 sps:$4 sm:$0xff]   ;;  %v5804_v63 = vld [vmem:[#allocation13 + $0x664] ss:$28 sps:$4 sm:$0xff]  }
 0x3a3   :  { %v2598_v35 = vpop.f32.mrf.mxu0  ;;  %v2639_v5 = vpop.f32.mrf.mxu1  ;;  %v5793_v62 = vld [vmem:[#allocation13 + $0x318] ss:$28 sps:$4 sm:$0xff]   ;;  %v5799_v1 = vld [vmem:[#allocation13 + $0x2e0] ss:$28 sps:$4 sm:$0xff]  }
 0x3a4   :  { %v2599_v8 = vadd.f32 %v2598_v35, %v2389_v47  ;;  %v2640_v16 = vadd.f32 %v2639_v5, %v2397_v6  ;;  %v2644_v9 = vmax.f32 %v2597_v3, 0.0  ;;  %v2646_v10 = vmax.f32 %v2638_v4, 0.0  ;;  %v5796_v47 = vld [vmem:[#allocation13 + $0x698] ss:$28 sps:$4 sm:$0xff]   ;;  %v5801_v6 = vld [vmem:[#allocation13 + $0x2e4] ss:$28 sps:$4 sm:$0xff]  }
 0x3a5   :  { %v2600_v11 = vpop.f32.mrf.mxu0  ;;  %v2641_v12 = vpop.f32.mrf.mxu1  ;;  %v5802_v3 = vld [vmem:[#allocation13 + $0x660] ss:$28 sps:$4 sm:$0xff]   ;;  %v5807_v4 = vld [vmem:[#allocation13 + $0x2ac] ss:$28 sps:$4 sm:$0xff]  }
 0x3a6   :  { %v2645_v13 = vmax.f32 %v2599_v8, 0.0  ;;  %v2647_v14 = vmax.f32 %v2640_v16, 0.0  ;;  %v6363_v27 = vpack.c.bf16 %v2644_v9, %v2644_v9  ;;  %v6365_v20 = vpack.c.bf16 %v2646_v10, %v2646_v10  ;;  %v5810_v35 = vld [vmem:[#allocation13 + $0x62c] ss:$28 sps:$4 sm:$0xff]   ;;  %v5813_v16 = vld [vmem:[#allocation13 + $0x274] ss:$28 sps:$4 sm:$0xff]  }
 0x3a7   :  { %v2601_v17 = vpop.f32.mrf.mxu0  ;;  %v2642_v18 = vpop.f32.mrf.mxu1  ;;  %v5805_v5 = vld [vmem:[#allocation13 + $0x2a8] ss:$28 sps:$4 sm:$0xff]   ;;  %v5816_v9 = vld [vmem:[#allocation13 + $0x5f4] ss:$28 sps:$4 sm:$0xff]   ;;  %v5819_v12 = vld [vmem:[#allocation13 + $0x23c] ss:$28 sps:$4 sm:$0xff]  }
 0x3a8   :  { %v6359_v19 = vpack.c.bf16 %v2645_v13, %v2645_v13  ;;  %v6361_v22 = vpack.c.bf16 %v2647_v14, %v2647_v14  ;;  %v5808_v8 = vld [vmem:[#allocation13 + $0x628] ss:$28 sps:$4 sm:$0xff]   ;;  %v5811_v10 = vld [vmem:[#allocation13 + $0x270] ss:$28 sps:$4 sm:$0xff]   ;;  %v5822_v13 = vld [vmem:[#allocation13 + $0x5bc] ss:$28 sps:$4 sm:$0xff]  }
 0x3a9   :  { %v5814_v11 = vld [vmem:[#allocation13 + $0x5f0] ss:$28 sps:$4 sm:$0xff]   ;;  %v5817_v14 = vld [vmem:[#allocation13 + $0x238] ss:$28 sps:$4 sm:$0xff]   ;;  %v5825_v18 = vld [vmem:[#allocation13 + $0x204] ss:$28 sps:$4 sm:$0xff]  }
 0x3aa   :  { %4129 = vmatprep.mubr.bf16.mxu0 %v6359_v19  ;;  %4170 = vmatprep.mubr.bf16.mxu1 %v6361_v22  ;;  %v5820_v17 = vld [vmem:[#allocation13 + $0x5b8] ss:$28 sps:$4 sm:$0xff]  }
 0x3ab   :  { %4130 = vmatmul.mubr.bf16.vlgmr.msra.gmra.mxu0 %v6363_v27  ;;  %4171 = vmatmul.mubr.bf16.vlgmr.msra.gmra.mxu1 %v6365_v20 }
 0x3ac   :  { %4180 = vmatpush1.bf16.msra.mxu0 %v5739_v25  ;;  %4221 = vmatpush1.bf16.msra.mxu1 %v5742_v26  ;;  %v5828_v25 = vld [vmem:[#allocation13 + $0x584] ss:$28 sps:$4 sm:$0xff]  }
 0x3ad   :  { %4211 = vmatprep.mubr.bf16.mxu0 %v6359_v19  ;;  %4252 = vmatprep.mubr.bf16.mxu1 %v6361_v22  ;;  %v5823_v26 = vld [vmem:[#allocation13 + $0x200] ss:$28 sps:$4 sm:$0xff]  }
 0x3ae   :  { %4181 = vmatprep.subr.bf16.mxu0 %v5747_v21  ;;  %4222 = vmatprep.subr.bf16.mxu1 %v5750_v23  ;;  %v5826_v21 = vld [vmem:[#allocation13 + $0x580] ss:$28 sps:$4 sm:$0xff]   ;;  %v5831_v23 = vld [vmem:[#allocation13 + $0x1cc] ss:$28 sps:$4 sm:$0xff]  }
 0x3b0   :  { %4182 = vmatpush1.bf16.msra.mxu0 %v5745_v28  ;;  %4223 = vmatpush1.bf16.msra.mxu1 %v5748_v24  ;;  %v5834_v28 = vld [vmem:[#allocation13 + $0x54c] ss:$28 sps:$4 sm:$0xff]  }
 0x3b1   :  { %4183 = vmatprep.subr.bf16.mxu0 %v5753_v29  ;;  %4224 = vmatprep.subr.bf16.mxu1 %v5756_v30  ;;  %v5829_v24 = vld [vmem:[#allocation13 + $0x1c8] ss:$28 sps:$4 sm:$0xff]   ;;  %v5837_v30 = vld [vmem:[#allocation13 + $0x19c] ss:$28 sps:$4 sm:$0xff]  }
 0x3b2   :  { %v5832_v29 = vld [vmem:[#allocation13 + $0x548] ss:$28 sps:$4 sm:$0xff]  }
 0x3b4   :  { %4184 = vmatpush1.bf16.msra.mxu0 %v5751_v31  ;;  %4225 = vmatpush1.bf16.msra.mxu1 %v5754_v32  ;;  %v5840_v31 = vld [vmem:[#allocation13 + $0x51c] ss:$28 sps:$4 sm:$0xff]  }
 0x3b5   :  { %4185 = vmatprep.subr.bf16.mxu0 %v5759_v33  ;;  %4226 = vmatprep.subr.bf16.mxu1 %v5762_v51  ;;  %v5835_v32 = vld [vmem:[#allocation13 + $0x198] ss:$28 sps:$4 sm:$0xff]   ;;  %v5843_v51 = vld [vmem:[#allocation13 + $0x164] ss:$28 sps:$4 sm:$0xff]  }
 0x3b6   :  { %v5838_v33 = vld [vmem:[#allocation13 + $0x518] ss:$28 sps:$4 sm:$0xff]  }
 0x3b8   :  { %4186 = vmatpush1.bf16.msra.mxu0 %v5757_v36  ;;  %4227 = vmatpush1.bf16.msra.mxu1 %v5760_v37  ;;  %v5846_v36 = vld [vmem:[#allocation13 + $0x4e4] ss:$28 sps:$4 sm:$0xff]  }
 0x3b9   :  { %4187 = vmatprep.subr.bf16.mxu0 %v5765_v38  ;;  %4228 = vmatprep.subr.bf16.mxu1 %v5768_v39  ;;  %v5841_v37 = vld [vmem:[#allocation13 + $0x160] ss:$28 sps:$4 sm:$0xff]   ;;  %v5849_v39 = vld [vmem:[#allocation13 + $0x12c] ss:$28 sps:$4 sm:$0xff]  }
 0x3ba   :  { %v5844_v38 = vld [vmem:[#allocation13 + $0x4e0] ss:$28 sps:$4 sm:$0xff]  }
 0x3bc   :  { %4188 = vmatpush1.bf16.msra.mxu0 %v5763_v40  ;;  %4229 = vmatpush1.bf16.msra.mxu1 %v5766_v41  ;;  %v5852_v40 = vld [vmem:[#allocation13 + $0x4ac] ss:$28 sps:$4 sm:$0xff]  }
 0x3bd   :  { %4189 = vmatprep.subr.bf16.mxu0 %v5771_v42  ;;  %4230 = vmatprep.subr.bf16.mxu1 %v5774_v43  ;;  %v5847_v41 = vld [vmem:[#allocation13 + $0x128] ss:$28 sps:$4 sm:$0xff]   ;;  %v5855_v43 = vld [vmem:[#allocation13 + $0xf4] ss:$28 sps:$4 sm:$0xff]  }
 0x3be   :  { %v5850_v42 = vld [vmem:[#allocation13 + $0x4a8] ss:$28 sps:$4 sm:$0xff]  }
 0x3c0   :  { %4190 = vmatpush1.bf16.msra.mxu0 %v5769_v44  ;;  %4231 = vmatpush1.bf16.msra.mxu1 %v5772_v45  ;;  %v5858_v44 = vld [vmem:[#allocation13 + $0x474] ss:$28 sps:$4 sm:$0xff]  }
 0x3c1   :  { %4191 = vmatprep.subr.bf16.mxu0 %v5777_v46  ;;  %4232 = vmatprep.subr.bf16.mxu1 %v5780_v48  ;;  %v5853_v45 = vld [vmem:[#allocation13 + $0xf0] ss:$28 sps:$4 sm:$0xff]   ;;  %v5861_v48 = vld [vmem:[#allocation13 + $0xbc] ss:$28 sps:$4 sm:$0xff]  }
 0x3c2   :  { %v5856_v46 = vld [vmem:[#allocation13 + $0x470] ss:$28 sps:$4 sm:$0xff]  }
 0x3c4   :  { %4192 = vmatpush1.bf16.msra.mxu0 %v5775_v49  ;;  %4233 = vmatpush1.bf16.msra.mxu1 %v5778_v50  ;;  %v5864_v49 = vld [vmem:[#allocation13 + $0x43c] ss:$28 sps:$4 sm:$0xff]  }
 0x3c5   :  { %4193 = vmatprep.subr.bf16.mxu0 %v5783_v52  ;;  %4234 = vmatprep.subr.bf16.mxu1 %v5786_v53  ;;  %v5859_v50 = vld [vmem:[#allocation13 + $0xb8] ss:$28 sps:$4 sm:$0xff]   ;;  %v5867_v53 = vld [vmem:[#allocation13 + $0x84] ss:$28 sps:$4 sm:$0xff]  }
 0x3c6   :  { %v5862_v52 = vld [vmem:[#allocation13 + $0x438] ss:$28 sps:$4 sm:$0xff]  }
 0x3c8   :  { %4194 = vmatpush1.bf16.msra.mxu0 %v5781_v54  ;;  %4235 = vmatpush1.bf16.msra.mxu1 %v5784_v55  ;;  %v5870_v54 = vld [vmem:[#allocation13 + $0x404] ss:$28 sps:$4 sm:$0xff]  }
 0x3c9   :  { %4195 = vmatprep.subr.bf16.mxu0 %v5789_v56  ;;  %4236 = vmatprep.subr.bf16.mxu1 %v5792_v57  ;;  %v5865_v55 = vld [vmem:[#allocation13 + $0x80] ss:$28 sps:$4 sm:$0xff]   ;;  %v5873_v57 = vld [vmem:[#allocation13 + $0x4c] ss:$28 sps:$4 sm:$0xff]  }
 0x3ca   :  { %v5868_v56 = vld [vmem:[#allocation13 + $0x400] ss:$28 sps:$4 sm:$0xff]  }
 0x3cc   :  { %4196 = vmatpush2.bf16.msra.mxu0 %v5787_v58  ;;  %4237 = vmatpush2.bf16.msra.mxu1 %v5790_v59  ;;  %v5876_v58 = vld [vmem:[#allocation13 + $0x3cc] ss:$28 sps:$4 sm:$0xff]  }
 0x3cd   :  { %4197 = vmatprep.subr.bf16.mxu0 %v5795_v60  ;;  %4238 = vmatprep.subr.bf16.mxu1 %v5798_v61  ;;  %v5871_v59 = vld [vmem:[#allocation13 + $0x48] ss:$28 sps:$4 sm:$0xff]   ;;  %v5879_v61 = vld [vmem:[#allocation13 + $0x14] ss:$28 sps:$4 sm:$0xff]  }
 0x3ce   :  { %v5874_v60 = vld [vmem:[#allocation13 + $0x3c8] ss:$28 sps:$4 sm:$0xff]  }
 0x3d0   :  { %4198 = vmatpush2.bf16.msra.mxu0 %v5793_v62  ;;  %4239 = vmatpush2.bf16.msra.mxu1 %v5796_v47  ;;  %v5882_v62 = vld [vmem:[#allocation13 + $0x394] ss:$28 sps:$4 sm:$0xff]  }
 0x3d1   :  { %4199 = vmatprep.subr.bf16.mxu0 %v5801_v6  ;;  %4240 = vmatprep.subr.bf16.mxu1 %v5804_v63  ;;  %v5877_v47 = vld [vmem:[#allocation13 + $0x10] ss:$28 sps:$4 sm:$0xff]   ;;  %v5885_v63 = vld [vmem:[#allocation13 + $0x35c] ss:$28 sps:$4 sm:$0xff]  }
 0x3d2   :  { %v5880_v6 = vld [vmem:[#allocation13 + $0x390] ss:$28 sps:$4 sm:$0xff]  }
 0x3d4   :  { %4200 = vmatpush2.bf16.msra.mxu0 %v5799_v1  ;;  %4241 = vmatpush2.bf16.msra.mxu1 %v5802_v3  ;;  %v5888_v1 = vld [vmem:[#allocation13 + $0x6dc] ss:$28 sps:$4 sm:$0xff]  }
 0x3d5   :  { %4201 = vmatprep.subr.bf16.mxu0 %v5807_v4  ;;  %4242 = vmatprep.subr.bf16.mxu1 %v5810_v35  ;;  %v5883_v3 = vld [vmem:[#allocation13 + $0x358] ss:$28 sps:$4 sm:$0xff]   ;;  %v5891_v35 = vld [vmem:[#allocation13 + $0x324] ss:$28 sps:$4 sm:$0xff]  }
 0x3d6   :  { %v5886_v4 = vld [vmem:[#allocation13 + $0x6d8] ss:$28 sps:$4 sm:$0xff]  }
 0x3d8   :  { %4202 = vmatpush2.bf16.msra.mxu0 %v5805_v5  ;;  %4243 = vmatpush2.bf16.msra.mxu1 %v5808_v8  ;;  %v5894_v5 = vld [vmem:[#allocation13 + $0x6a4] ss:$28 sps:$4 sm:$0xff]  }
 0x3d9   :  { %4203 = vmatprep.subr.bf16.mxu0 %v5813_v16  ;;  %4244 = vmatprep.subr.bf16.mxu1 %v5816_v9  ;;  %v5889_v8 = vld [vmem:[#allocation13 + $0x320] ss:$28 sps:$4 sm:$0xff]   ;;  %v5897_v9 = vld [vmem:[#allocation13 + $0x2ec] ss:$28 sps:$4 sm:$0xff]  }
 0x3da   :  { %v5892_v16 = vld [vmem:[#allocation13 + $0x6a0] ss:$28 sps:$4 sm:$0xff]  }
 0x3dc   :  { %4204 = vmatpush2.bf16.msra.mxu0 %v5811_v10  ;;  %4245 = vmatpush2.bf16.msra.mxu1 %v5814_v11  ;;  %v5900_v10 = vld [vmem:[#allocation13 + $0x66c] ss:$28 sps:$4 sm:$0xff]  }
 0x3dd   :  { %4205 = vmatprep.subr.bf16.mxu0 %v5819_v12  ;;  %4246 = vmatprep.subr.bf16.mxu1 %v5822_v13  ;;  %v5895_v11 = vld [vmem:[#allocation13 + $0x2e8] ss:$28 sps:$4 sm:$0xff]   ;;  %v5903_v13 = vld [vmem:[#allocation13 + $0x2b4] ss:$28 sps:$4 sm:$0xff]  }
 0x3de   :  { %v5898_v12 = vld [vmem:[#allocation13 + $0x668] ss:$28 sps:$4 sm:$0xff]  }
 0x3e0   :  { %4206 = vmatpush2.bf16.msra.mxu0 %v5817_v14  ;;  %4247 = vmatpush2.bf16.msra.mxu1 %v5820_v17  ;;  %v5906_v14 = vld [vmem:[#allocation13 + $0x634] ss:$28 sps:$4 sm:$0xff]  }
 0x3e1   :  { %4207 = vmatprep.subr.bf16.mxu0 %v5825_v18  ;;  %4248 = vmatprep.subr.bf16.mxu1 %v5828_v25  ;;  %v5901_v17 = vld [vmem:[#allocation13 + $0x2b0] ss:$28 sps:$4 sm:$0xff]   ;;  %v5909_v25 = vld [vmem:[#allocation13 + $0x27c] ss:$28 sps:$4 sm:$0xff]  }
 0x3e2   :  { %v5904_v18 = vld [vmem:[#allocation13 + $0x630] ss:$28 sps:$4 sm:$0xff]  }
 0x3e4   :  { %4208 = vmatpush2.bf16.msra.mxu0 %v5823_v26  ;;  %4249 = vmatpush2.bf16.msra.mxu1 %v5826_v21  ;;  %v5912_v26 = vld [vmem:[#allocation13 + $0x5fc] ss:$28 sps:$4 sm:$0xff]  }
 0x3e5   :  { %4209 = vmatprep.subr.bf16.mxu0 %v5831_v23  ;;  %4250 = vmatprep.subr.bf16.mxu1 %v5834_v28  ;;  %v5907_v21 = vld [vmem:[#allocation13 + $0x278] ss:$28 sps:$4 sm:$0xff]   ;;  %v5915_v28 = vld [vmem:[#allocation13 + $0x244] ss:$28 sps:$4 sm:$0xff]  }
 0x3e6   :  { %v5910_v23 = vld [vmem:[#allocation13 + $0x5f8] ss:$28 sps:$4 sm:$0xff]  }
 0x3e8   :  { %4210 = vmatpush2.bf16.msra.mxu0 %v5829_v24  ;;  %4251 = vmatpush2.bf16.msra.mxu1 %v5832_v29  ;;  %v5918_v24 = vld [vmem:[#allocation13 + $0x5c4] ss:$28 sps:$4 sm:$0xff]  }
 0x3e9   :  { %4261 = vmatprep.subr.bf16.mxu0 %v5837_v30  ;;  %4302 = vmatprep.subr.bf16.mxu1 %v5840_v31  ;;  %v5913_v29 = vld [vmem:[#allocation13 + $0x240] ss:$28 sps:$4 sm:$0xff]   ;;  %v5921_v31 = vld [vmem:[#allocation13 + $0x20c] ss:$28 sps:$4 sm:$0xff]  }
 0x3ea   :  { %v5916_v30 = vld [vmem:[#allocation13 + $0x5c0] ss:$28 sps:$4 sm:$0xff]  }
 0x3eb   :  { %4212 = vmatmul.mubr.bf16.vlgmr.msra.gmra.mxu0 %v6363_v27  ;;  %4253 = vmatmul.mubr.bf16.vlgmr.msra.gmra.mxu1 %v6365_v20 }
 0x3ec   :  { %4262 = vmatpush1.bf16.msra.mxu0 %v5835_v32  ;;  %4293 = vmatprep.mubr.bf16.mxu0 %v6359_v19  ;;  %v5924_v32 = vld [vmem:[#allocation13 + $0x58c] ss:$28 sps:$4 sm:$0xff]  }
 0x3ed   :  { %4303 = vmatpush1.bf16.msra.mxu1 %v5838_v33  ;;  %4334 = vmatprep.mubr.bf16.mxu1 %v6361_v22  ;;  %v5919_v33 = vld [vmem:[#allocation13 + $0x208] ss:$28 sps:$4 sm:$0xff]  }
 0x3ee   :  { %4263 = vmatprep.subr.bf16.mxu0 %v5843_v51  ;;  %4304 = vmatprep.subr.bf16.mxu1 %v5846_v36  ;;  %v5922_v51 = vld [vmem:[#allocation13 + $0x588] ss:$28 sps:$4 sm:$0xff]   ;;  %v5927_v36 = vld [vmem:[#allocation13 + $0x1d4] ss:$28 sps:$4 sm:$0xff]  }
 0x3f0   :  { %4264 = vmatpush1.bf16.msra.mxu0 %v5841_v37  ;;  %v5930_v37 = vld [vmem:[#allocation13 + $0x554] ss:$28 sps:$4 sm:$0xff]  }
 0x3f1   :  { %4305 = vmatpush1.bf16.msra.mxu1 %v5844_v38  ;;  %4265 = vmatprep.subr.bf16.mxu0 %v5849_v39  ;;  %v5925_v38 = vld [vmem:[#allocation13 + $0x1d0] ss:$28 sps:$4 sm:$0xff]  }
 0x3f2   :  { %4306 = vmatprep.subr.bf16.mxu1 %v5852_v40  ;;  %v5928_v39 = vld [vmem:[#allocation13 + $0x550] ss:$28 sps:$4 sm:$0xff]   ;;  %v5931_v40 = vld [vmem:[#allocation13 + $0x360] ss:$28 sps:$4 sm:$0xff]  }
 0x3f4   :  { %4266 = vmatpush1.bf16.msra.mxu0 %v5847_v41  ;;  %v5932_v41 = vld [vmem:[#allocation13 + $0x6e0] ss:$28 sps:$4 sm:$0xff]  }
 0x3f5   :  { %4307 = vmatpush1.bf16.msra.mxu1 %v5850_v42  ;;  %4267 = vmatprep.subr.bf16.mxu0 %v5855_v43  ;;  %v5933_v42 = vld [vmem:[#allocation13 + $0x1a0] ss:$28 sps:$4 sm:$0xff]  }
 0x3f6   :  { %4308 = vmatprep.subr.bf16.mxu1 %v5858_v44  ;;  %v5934_v43 = vld [vmem:[#allocation13 + $0x520] ss:$28 sps:$4 sm:$0xff]   ;;  %v5935_v44 = vld [vmem:[#allocation13 + $0x328] ss:$28 sps:$4 sm:$0xff]  }
 0x3f8   :  { %4268 = vmatpush1.bf16.msra.mxu0 %v5853_v45  ;;  %v5936_v45 = vld [vmem:[#allocation13 + $0x6a8] ss:$28 sps:$4 sm:$0xff]  }
 0x3f9   :  { %4309 = vmatpush1.bf16.msra.mxu1 %v5856_v46  ;;  %4269 = vmatprep.subr.bf16.mxu0 %v5861_v48  ;;  %v5937_v46 = vld [vmem:[#allocation13 + $0x168] ss:$28 sps:$4 sm:$0xff]  }
 0x3fa   :  { %4310 = vmatprep.subr.bf16.mxu1 %v5864_v49  ;;  %v5938_v48 = vld [vmem:[#allocation13 + $0x4e8] ss:$28 sps:$4 sm:$0xff]   ;;  %v5939_v49 = vld [vmem:[#allocation13 + $0x2f0] ss:$28 sps:$4 sm:$0xff]  }
 0x3fc   :  { %4270 = vmatpush1.bf16.msra.mxu0 %v5859_v50  ;;  %v5940_v50 = vld [vmem:[#allocation13 + $0x670] ss:$28 sps:$4 sm:$0xff]  }
 0x3fd   :  { %4311 = vmatpush1.bf16.msra.mxu1 %v5862_v52  ;;  %4271 = vmatprep.subr.bf16.mxu0 %v5867_v53  ;;  %v5941_v52 = vld [vmem:[#allocation13 + $0x130] ss:$28 sps:$4 sm:$0xff]  }
 0x3fe   :  { %4312 = vmatprep.subr.bf16.mxu1 %v5870_v54  ;;  %v5942_v53 = vld [vmem:[#allocation13 + $0x4b0] ss:$28 sps:$4 sm:$0xff]   ;;  %v5943_v54 = vld [vmem:[#allocation13 + $0x2b8] ss:$28 sps:$4 sm:$0xff]  }
 0x400   :  { %4272 = vmatpush1.bf16.msra.mxu0 %v5865_v55  ;;  %v5944_v55 = vld [vmem:[#allocation13 + $0x638] ss:$28 sps:$4 sm:$0xff]  }
 0x401   :  { %4313 = vmatpush1.bf16.msra.mxu1 %v5868_v56  ;;  %4273 = vmatprep.subr.bf16.mxu0 %v5873_v57  ;;  %v5945_v56 = vld [vmem:[#allocation13 + $0xf8] ss:$28 sps:$4 sm:$0xff]   ;;  %v5947_v57 = vld [vmem:[#allocation13 + $0x280] ss:$28 sps:$4 sm:$0xff]  }
 0x402   :  { %4314 = vmatprep.subr.bf16.mxu1 %v5876_v58  ;;  %v5948_v58 = vld [vmem:[#allocation13 + $0x600] ss:$28 sps:$4 sm:$0xff]  }
 0x404   :  { %4274 = vmatpush1.bf16.msra.mxu0 %v5871_v59  ;;  %v5950_v59 = vld [vmem:[#allocation13 + $0x440] ss:$28 sps:$4 sm:$0xff]  }
 0x405   :  { %4315 = vmatpush1.bf16.msra.mxu1 %v5874_v60  ;;  %4275 = vmatprep.subr.bf16.mxu0 %v5879_v61  ;;  %v5951_v60 = vld [vmem:[#allocation13 + $0x248] ss:$28 sps:$4 sm:$0xff]  }
 0x406   :  { %4316 = vmatprep.subr.bf16.mxu1 %v5882_v62  ;;  %v5952_v61 = vld [vmem:[#allocation13 + $0x5c8] ss:$28 sps:$4 sm:$0xff]  }
 0x407   :  { %v5953_v62 = vld [vmem:[#allocation13 + $0x88] ss:$28 sps:$4 sm:$0xff]  }
 0x408   :  { %4276 = vmatpush1.bf16.msra.mxu0 %v5877_v47  ;;  %v5954_v47 = vld [vmem:[#allocation13 + $0x408] ss:$28 sps:$4 sm:$0xff]  }
 0x409   :  { %4317 = vmatpush1.bf16.msra.mxu1 %v5880_v6  ;;  %4277 = vmatprep.subr.bf16.mxu0 %v5885_v63  ;;  %v5955_v6 = vld [vmem:[#allocation13 + $0x210] ss:$28 sps:$4 sm:$0xff]  }
 0x40a   :  { %4318 = vmatprep.subr.bf16.mxu1 %v5888_v1  ;;  %v5956_v63 = vld [vmem:[#allocation13 + $0x590] ss:$28 sps:$4 sm:$0xff]  }
 0x40b   :  { %v5957_v1 = vld [vmem:[#allocation13 + $0x50] ss:$28 sps:$4 sm:$0xff]  }
 0x40c   :  { %4278 = vmatpush2.bf16.msra.mxu0 %v5883_v3  ;;  %v5958_v3 = vld [vmem:[#allocation13 + $0x3d0] ss:$28 sps:$4 sm:$0xff]  }
 0x40d   :  { %4319 = vmatpush2.bf16.msra.mxu1 %v5886_v4  ;;  %4279 = vmatprep.subr.bf16.mxu0 %v5891_v35  ;;  %v5959_v4 = vld [vmem:[#allocation13 + $0x1d8] ss:$28 sps:$4 sm:$0xff]  }
 0x40e   :  { %4320 = vmatprep.subr.bf16.mxu1 %v5894_v5  ;;  %v5960_v35 = vld [vmem:[#allocation13 + $0x558] ss:$28 sps:$4 sm:$0xff]  }
 0x40f   :  { %v5961_v5 = vld [vmem:[#allocation13 + $0x18] ss:$28 sps:$4 sm:$0xff]  }
 0x410   :  { %4280 = vmatpush2.bf16.msra.mxu0 %v5889_v8  ;;  %v5962_v8 = vld [vmem:[#allocation13 + $0x398] ss:$28 sps:$4 sm:$0xff]  }
 0x411   :  { %4321 = vmatpush2.bf16.msra.mxu1 %v5892_v16  ;;  %4281 = vmatprep.subr.bf16.mxu0 %v5897_v9  ;;  %v6386_v16 = vld [vmem:[%s6417_s9] sm:$0xff]  ;;  %s6200_s9 = smov [#allocation14]  }
 0x412   :  { %4322 = vmatprep.subr.bf16.mxu1 %v5900_v10  ;;  %v2913_v9 = vrot.slane %v6386_v16, %v6326_v0  ;;  %v2917_v10 = vrot.slane %v6386_v16, %v6332_v2  ;;  %s4504_s16 = sshll.u32 %s6200_s9, 4  ;;  %s4505_s16 = int_to_ptr.vmem [resolvable:$true] %s4504_s16 }
 0x413   :  { %s6134_s4 = scalar_lea.vmem %s4505_s16, 256  ;;  %p6139_p8 = scmp.lt.s32.totalorder %s4505_s16, %s4505_s16 }
 0x414   :  { %4282 = vmatpush2.bf16.msra.mxu0 %v5895_v11  ;;  %p6135_p7 = scmp.ne.s32.totalorder %s4505_s16, %s6134_s4  ;;  %p6140_p9 = scmp.lt.s32.totalorder %s6134_s4, %s6134_s4 }
 0x415   :  { %4323 = vmatpush2.bf16.msra.mxu1 %v5898_v12  ;;  %4283 = vmatprep.subr.bf16.mxu0 %v5903_v13 }
 0x416   :  { %4324 = vmatprep.subr.bf16.mxu1 %v5906_v14  ;;  %p6141_p10 = por %p6140_p9, %p6139_p8 }
 0x418   :  { %4284 = vmatpush2.bf16.msra.mxu0 %v5901_v17  ;;  %p6142_p11 = pnand %p6141_p10, %p6135_p7 }
 0x419   :  { %4325 = vmatpush2.bf16.msra.mxu1 %v5904_v18  ;;  %4285 = vmatprep.subr.bf16.mxu0 %v5909_v25 }
 0x41a   :  { %4326 = vmatprep.subr.bf16.mxu1 %v5912_v26 }
 0x41c   :  { %4286 = vmatpush2.bf16.msra.mxu0 %v5907_v21 }
 0x41d   :  { %4327 = vmatpush2.bf16.msra.mxu1 %v5910_v23  ;;  %4287 = vmatprep.subr.bf16.mxu0 %v5915_v28 }
 0x41e   :  { %4328 = vmatprep.subr.bf16.mxu1 %v5918_v24 }
 0x420   :  { %4288 = vmatpush2.bf16.msra.mxu0 %v5913_v29 }
 0x421   :  { %4329 = vmatpush2.bf16.msra.mxu1 %v5916_v30  ;;  %4289 = vmatprep.subr.bf16.mxu0 %v5921_v31 }
 0x422   :  { %4330 = vmatprep.subr.bf16.mxu1 %v5924_v32 }
 0x424   :  { %4290 = vmatpush2.bf16.msra.mxu0 %v5919_v33 }
 0x425   :  { %4331 = vmatpush2.bf16.msra.mxu1 %v5922_v51  ;;  %4291 = vmatprep.subr.bf16.mxu0 %v5927_v36  ;;  %v2921_v51 = vrot.slane %v6386_v16, %v6342_v7 }
 0x426   :  { %4332 = vmatprep.subr.bf16.mxu1 %v5930_v37 }
 0x428   :  { %4292 = vmatpush2.bf16.msra.mxu0 %v5925_v38 }
 0x429   :  { %4333 = vmatpush2.bf16.msra.mxu1 %v5928_v39  ;;  %5096 = vmatprep.subr.bf16.mxu0 %v5931_v40 }
 0x42a   :  { %5118 = vmatprep.subr.bf16.mxu1 %v5932_v41 }
 0x42b   :  { %4294 = vmatmul.mubr.bf16.vlgmr.msra.gmra.mxu0 %v6363_v27 }
 0x42c   :  { %4335 = vmatmul.mubr.bf16.vlgmr.msra.gmra.mxu1 %v6365_v20  ;;  %5097 = vmatpush3.bf16.msra.mxu0 %v5933_v42 }
 0x42d   :  { %4375 = vmatprep.mubr.bf16.mxu0 %v6359_v19  ;;  %5119 = vmatpush3.bf16.msra.mxu1 %v5934_v43  ;;  %v5946_v19 = vld [vmem:[#allocation13 + $0x478] ss:$28 sps:$4 sm:$0xff]  }
 0x42e   :  { %4415 = vmatprep.mubr.bf16.mxu1 %v6361_v22  ;;  %5098 = vmatprep.subr.bf16.mxu0 %v5935_v44  ;;  %v5949_v22 = vld [vmem:[#allocation13 + $0xc0] ss:$28 sps:$4 sm:$0xff]  }
 0x42f   :  { %5120 = vmatprep.subr.bf16.mxu1 %v5936_v45 }
 0x430   :  { %5099 = vmatpush3.bf16.msra.mxu0 %v5937_v46 }
 0x431   :  { %5121 = vmatpush3.bf16.msra.mxu1 %v5938_v48  ;;  %5100 = vmatprep.subr.bf16.mxu0 %v5939_v49 }
 0x432   :  { %5122 = vmatprep.subr.bf16.mxu1 %v5940_v50 }
 0x434   :  { %5101 = vmatpush3.bf16.msra.mxu0 %v5941_v52 }
 0x435   :  { %5123 = vmatpush3.bf16.msra.mxu1 %v5942_v53  ;;  %5102 = vmatprep.subr.bf16.mxu0 %v5943_v54 }
 0x436   :  { %5124 = vmatprep.subr.bf16.mxu1 %v5944_v55 }
 0x438   :  { %5103 = vmatpush3.bf16.msra.mxu0 %v5945_v56 }
 0x439   :  { %5125 = vmatpush3.bf16.msra.mxu1 %v5946_v19  ;;  %5104 = vmatprep.subr.bf16.mxu0 %v5947_v57 }
 0x43a   :  { %5126 = vmatprep.subr.bf16.mxu1 %v5948_v58 }
 0x43c   :  { %5105 = vmatpush3.bf16.msra.mxu0 %v5949_v22 }
 0x43d   :  { %5127 = vmatpush3.bf16.msra.mxu1 %v5950_v59  ;;  %5106 = vmatprep.subr.bf16.mxu0 %v5951_v60 }
 0x43e   :  { %5128 = vmatprep.subr.bf16.mxu1 %v5952_v61 }
 0x440   :  { %5107 = vmatpush3.bf16.msra.mxu0 %v5953_v62 }
 0x441   :  { %5129 = vmatpush3.bf16.msra.mxu1 %v5954_v47  ;;  %5108 = vmatprep.subr.bf16.mxu0 %v5955_v6 }
 0x442   :  { %5130 = vmatprep.subr.bf16.mxu1 %v5956_v63 }
 0x444   :  { %5109 = vmatpush3.bf16.msra.mxu0 %v5957_v1 }
 0x445   :  { %5131 = vmatpush3.bf16.msra.mxu1 %v5958_v3  ;;  %5110 = vmatprep.subr.bf16.mxu0 %v5959_v4 }
 0x446   :  { %5132 = vmatprep.subr.bf16.mxu1 %v5960_v35 }
 0x448   :  { %5111 = vmatpush3.bf16.msra.mxu0 %v5961_v5 }
 0x449   :  { %5133 = vmatpush3.bf16.msra.mxu1 %v5962_v8 }
 0x44b   :  { %4376 = vmatmul.mubr.bf16.vlgmr.msra.gmra.mxu0 %v6363_v27 }
 0x44c   :  { %4416 = vmatmul.mubr.bf16.vlgmr.msra.gmra.mxu1 %v6365_v20 }
 0x46b   :  { %v4131_v11 = vpop.f32.mrf.mxu0  ;;  %v4172_v12 = vpop.f32.mrf.mxu1 }
 0x46c   :  { %v4132_v13 = vadd.f32 %v4131_v11, %v2913_v9 }
 0x46d   :  { %v4133_v14 = vpop.f32.mrf.mxu0  ;;  %v4174_v17 = vpop.f32.mrf.mxu1 }
 0x46e   :  { %v4173_v18 = vadd.f32 %v4172_v12, %v4132_v13  ;;  %v4134_v27 = vadd.f32 %v4133_v14, %v2917_v10 }
 0x46f   :  { %v4135_v25 = vpop.f32.mrf.mxu0  ;;  %v4176_v20 = vpop.f32.mrf.mxu1 }
 0x470   :  { %v5081_v26 = vmul.f32 -1.442695, %v4173_v18  ;;  %v4175_v21 = vadd.f32 %v4174_v17, %v4134_v27 }
 0x471   :  { %v4136_v23 = vpop.f32.mrf.mxu0  ;;  %v4177_v28 = vpop.f32.mrf.mxu1 }
 0x472   :  { %5965 = vpow2.f32 %v5081_v26  ;;  %v5082_v24 = vmul.f32 -1.442695, %v4175_v21 }
 0x474   :  { %5967 = vpow2.f32 %v5082_v24 }
 0x47f   :  { %v5966_v0 = vpop.eup %5965 }
 0x480   :  { %v4444_v29 = vadd.f32 1.0, %v5966_v0 }
 0x481   :  { %v5968_v30 = vpop.eup %5967 }
 0x482   :  { %v4445_v2 = vadd.f32 1.0, %v5968_v30  ;;  %5969 = vrcp.f32 %v4444_v29 }
 0x484   :  { %5971 = vrcp.f32 %v4445_v2 }
 0x48f   :  { %v5970_v31 = vpop.eup %5969 }
 0x491   :  { %v5972_v32 = vpop.eup %5971 }
 0x492   :  { %v5092_v33 = vpack.c.bf16 %v5972_v32, %v5970_v31 }
 0x494   :  { %4494 = vst [vmem:[#allocation15] sm:$0xff] %v5092_v33 }
 0x495   :  { %6145 = shalt.err (!%p6142_p11)
}
 0x496   :  { %4507 = dma.vmem_to_hbm [thread:$0]  %s4505_s16, 256, %s6418_s10, [#allocation4]   ;;  %v2925_v36 = vrot.slane %v6386_v16, %v6345_v34  ;;  %v2928_v57 = vsub.s32 4, %v6323_v15  ;;  %v2932_v58 = vsub.s32 5, %v6323_v15  ;;  %v2936_v17 = vsub.s32 6, %v6323_v15 }
 0x497   :  { %s6201_s10 = smov [#allocation15]  }
 0x498   :  { %v2929_v22 = vrot.slane %v6386_v16, %v2928_v57  ;;  %v2933_v59 = vrot.slane %v6386_v16, %v2932_v58  ;;  %v2937_v25 = vrot.slane %v6386_v16, %v2936_v17  ;;  %s4514_s19 = sshll.u32 %s6201_s10, 4  ;;  %s4515_s19 = int_to_ptr.vmem [resolvable:$true] %s4514_s19 }
 0x499   :  { %s6154_s20 = scalar_lea.vmem %s4515_s19, 448  ;;  %p6159_p13 = scmp.lt.s32.totalorder %s4515_s19, %s4515_s19 }
 0x49a   :  { %p6155_p12 = scmp.ne.s32.totalorder %s4515_s19, %s6154_s20  ;;  %p6160_p0 = scmp.lt.s32.totalorder %s6154_s20, %s6154_s20 }
 0x49c   :  { %p6161_p1 = por %p6160_p0, %p6159_p13 }
 0x49e   :  { %p6162_p2 = pnand %p6161_p1, %p6155_p12 }
 0x4ab   :  { %v4213_v37 = vpop.f32.mrf.mxu0  ;;  %v4254_v38 = vpop.f32.mrf.mxu1 }
 0x4ac   :  { %v4214_v39 = vadd.f32 %v4213_v37, %v2921_v51 }
 0x4ad   :  { %v4215_v40 = vpop.f32.mrf.mxu0  ;;  %v4256_v7 = vpop.f32.mrf.mxu1 }
 0x4ae   :  { %v4255_v41 = vadd.f32 %v4254_v38, %v4214_v39  ;;  %v4216_v42 = vadd.f32 %v4215_v40, %v2925_v36 }
 0x4af   :  { %v4217_v43 = vpop.f32.mrf.mxu0  ;;  %v4258_v44 = vpop.f32.mrf.mxu1 }
 0x4b0   :  { %v5083_v45 = vmul.f32 -1.442695, %v4255_v41  ;;  %v4257_v46 = vadd.f32 %v4256_v7, %v4216_v42 }
 0x4b1   :  { %v4218_v48 = vpop.f32.mrf.mxu0  ;;  %v4259_v49 = vpop.f32.mrf.mxu1 }
 0x4b2   :  { %5973 = vpow2.f32 %v5083_v45  ;;  %v5084_v50 = vmul.f32 -1.442695, %v4257_v46 }
 0x4b4   :  { %5975 = vpow2.f32 %v5084_v50 }
 0x4bf   :  { %v5974_v52 = vpop.eup %5973 }
 0x4c0   :  { %v4446_v53 = vadd.f32 1.0, %v5974_v52 }
 0x4c1   :  { %v5976_v54 = vpop.eup %5975 }
 0x4c2   :  { %v4447_v34 = vadd.f32 1.0, %v5976_v54  ;;  %5977 = vrcp.f32 %v4446_v53 }
 0x4c4   :  { %5979 = vrcp.f32 %v4447_v34 }
 0x4cf   :  { %v5978_v55 = vpop.eup %5977 }
 0x4d1   :  { %v5980_v56 = vpop.eup %5979 }
 0x4d2   :  { %v5093_v19 = vpack.c.bf16 %v5980_v56, %v5978_v55 }
 0x4d4   :  { %4495 = vst [vmem:[#allocation15 + $0x8] sm:$0xff] %v5093_v19 }
 0x4eb   :  { %v4295_v60 = vpop.f32.mrf.mxu0 }
 0x4ec   :  { %v4296_v61 = vadd.f32 %v4295_v60, %v2929_v22  ;;  %v4336_v62 = vpop.f32.mrf.mxu1 }
 0x4ed   :  { %v4297_v47 = vpop.f32.mrf.mxu0 }
 0x4ee   :  { %v4337_v6 = vadd.f32 %v4336_v62, %v4296_v61  ;;  %v4298_v63 = vadd.f32 %v4297_v47, %v2933_v59  ;;  %v4338_v1 = vpop.f32.mrf.mxu1 }
 0x4ef   :  { %v4299_v3 = vpop.f32.mrf.mxu0 }
 0x4f0   :  { %v5085_v4 = vmul.f32 -1.442695, %v4337_v6  ;;  %v4339_v35 = vadd.f32 %v4338_v1, %v4298_v63  ;;  %v4340_v5 = vpop.f32.mrf.mxu1 }
 0x4f1   :  { %v4300_v8 = vpop.f32.mrf.mxu0 }
 0x4f2   :  { %5981 = vpow2.f32 %v5085_v4  ;;  %v5086_v9 = vmul.f32 -1.442695, %v4339_v35  ;;  %v4341_v10 = vpop.f32.mrf.mxu1 }
 0x4f4   :  { %5983 = vpow2.f32 %v5086_v9 }
 0x4ff   :  { %v5982_v11 = vpop.eup %5981 }
 0x500   :  { %v4448_v12 = vadd.f32 1.0, %v5982_v11 }
 0x501   :  { %v5984_v13 = vpop.eup %5983 }
 0x502   :  { %v4449_v14 = vadd.f32 1.0, %v5984_v13  ;;  %5985 = vrcp.f32 %v4448_v12 }
 0x504   :  { %5987 = vrcp.f32 %v4449_v14 }
 0x50b   :  { %v5112_v18 = vpop.f32.mrf.mxu0 }
 0x50c   :  { %v5134_v27 = vpop.f32.mrf.mxu1 }
 0x50d   :  { %v5113_v20 = vpop.f32.mrf.mxu0 }
 0x50e   :  { %v5114_v26 = vadd.f32 %v5113_v20, %v5112_v18  ;;  %v5135_v21 = vpop.f32.mrf.mxu1 }
 0x50f   :  { %v5115_v23 = vpop.f32.mrf.mxu0  ;;  %v5986_v28 = vpop.eup %5985  ;;  %v5136_v0 = vadd.f32 %v5135_v21, %v5134_v27 }
 0x510   :  { %v4378_v24 = vadd.f32 %v5114_v26, %v2937_v25  ;;  %v5137_v29 = vpop.f32.mrf.mxu1 }
 0x511   :  { %v5988_v30 = vpop.eup %5987  ;;  %v5116_v2 = vpop.f32.mrf.mxu0 }
 0x512   :  { %v4418_v31 = vadd.f32 %v5136_v0, %v4378_v24  ;;  %v5138_v32 = vpop.f32.mrf.mxu1  ;;  %v5094_v33 = vpack.c.bf16 %v5988_v30, %v5986_v28 }
 0x514   :  { %v5087_v51 = vmul.f32 -1.442695, %v4418_v31  ;;  %4496 = vst [vmem:[#allocation15 + $0x10] sm:$0xff] %v5094_v33 }
 0x516   :  { %5989 = vpow2.f32 %v5087_v51 }
 0x523   :  { %v5990_v15 = vpop.eup %5989 }
 0x524   :  { %v4450_v36 = vadd.f32 1.0, %v5990_v15 }
 0x526   :  { %5991 = vrcp.f32 %v4450_v36 }
 0x533   :  { %v5992_v16 = vpop.eup %5991 }
 0x534   :  { %v5095_v37 = vpack.c.bf16 %v5992_v16, %v5992_v16 }
 0x536   :  { %4497 = vst [vmem:[#allocation15 + $0x18] sm:$0xf] %v5095_v37 }
 0x537   :  { %6165 = shalt.err (!%p6162_p2)
}
 0x538   :  { %4517 = dma.vmem_to_hbm [thread:$0]  %s4515_s19, 448, %s6419_s11, [#allocation16]  }
 0x539   :  { %6182 = dma.done.wait [#allocation4], 256  }
 0x53a   :  { %6183 = vsyncadd [#allocation4], 4294967040 }
 0x53b   :  { %6184 = dma.done.wait [#allocation16], 448  }
 0x53c   :  { %6185 = vsyncadd [#allocation16], 4294966848 }
 0x53d   :  { %4524 = vsyncpa [#allocation3], 1 }
 0x53e   :  { %4525 = vsyncpa [#allocation6], 1 }
 0x53f   :  { %4526 = vsyncpa [#allocation9], 1 }
 0x540   :  { %4527 = vsyncpa [#allocation12], 1 }
 0x541   :  { %4528 = vsyncpa [#allocation4], 1 }
 0x542   :  { %4529 = vsyncpa [#allocation16], 1 }

</bundles_post_ra>
